<compile_context>
chip_gen: v7x
topology: tpu7x:2x2x1
jax: 0.10.0
libtpu: 0.0.40
codegen_flags: <defaults>
</compile_context>

<pallas_src>
import functools

import jax
import jax.numpy as jnp
from jax import lax
from jax.experimental import pallas as pl
from jax.experimental.pallas import tpu as pltpu

EPS = 1e-5          # InstanceNorm2d default eps
NEG_SLOPE = 1e-2    # nnU-Net LeakyReLU default negative_slope
# TODO(synk): Dropout2d(p=0) / eval-mode dropout is the identity, so it is omitted.


def _pick_tile_rows(H, W, target_pixels=1024):
    """Largest H-tile with H % th == 0, (th*W) % 8 == 0 and th*W <= target_pixels."""
    best = H
    for th in range(1, H + 1):
        if H % th:
            continue
        if (th * W) % 8 and th != H:
            continue
        if th * W <= target_pixels:
            best = th
    return best


def _conv_stats_kernel(x_ref, w_ref, conv_ref, stats_ref, *, TH, W, KH, KW, Cin):
    """Pass 1: fused 9-tap conv (one bf16 matmul, f32 acc) + per-channel sum / sumsq.

    Grid = (N, T).  x block (whole padded image) is resident across the T axis; the
    stats output block is resident across T and accumulated ("arbitrary" axis).
    """
    t = pl.program_id(1)

    @pl.when(t == 0)
    def _():
        stats_ref[...] = jnp.zeros_like(stats_ref)

    h0 = t * TH
    if TH % 8 == 0:
        h0 = pl.multiple_of(h0, 8)

    # Build the im2col slab (TH*W, KH*KW*Cin) from shifted windows of the resident
    # padded image (bf16), column order (dy, dx, c) matching the reshaped weights.
    taps = []
    for dy in range(KH):
        rows = x_ref[0, pl.ds(h0 + dy, TH)]          # (TH, Wp, Cin) bf16
        for dx in range(KW):
            taps.append(rows[:, dx:dx + W, :].reshape(TH * W, Cin))
    slab = jnp.concatenate(taps, axis=1)             # (TH*W, KH*KW*Cin) bf16

    # ONE MXU matmul, bf16 operands, f32 accumulation.
    acc = jnp.dot(slab, w_ref[...], preferred_element_type=jnp.float32)  # (TH*W, Cpad)
    conv_ref[0] = acc

    # Two-phase InstanceNorm statistics: accumulate sum and sum-of-squares per channel.
    ssum = jnp.sum(acc, axis=0, keepdims=True)            # (1, Cpad)
    ssq = jnp.sum(acc * acc, axis=0, keepdims=True)       # (1, Cpad)
    stats_ref[0] += jnp.concatenate([ssum, ssq], axis=0)  # (2, Cpad)


def _norm_act_kernel(conv_ref, stats_ref, gb_ref, o_ref, *, HW, eps, slope):
    """Pass 2: per-channel normalize + affine + LeakyReLU on one conv tile (all f32)."""
    inv_n = 1.0 / float(HW)
    st = stats_ref[0]                                    # (2, Cpad): [sum, sumsq]
    gb = gb_ref[...]                                     # (2, Cpad): [gamma, beta]
    mean = st[0:1] * inv_n
    var = jnp.maximum(st[1:2] * inv_n - mean * mean, 0.0)
    inv_std = lax.rsqrt(var + eps)
    scale = gb[0:1] * inv_std                            # gamma / std
    shift = gb[1:2] - mean * scale                       # beta - mean * gamma / std
    y = conv_ref[0] * scale + shift
    o_ref[0] = jnp.where(y >= 0, y, slope * y).astype(o_ref.dtype)


def conv_dropout_norm_relu(x_nchw, weight_oihw, bias, gamma, beta, *, tile_rows=None):
    """Forward pass equivalent to ConvDropoutNormReLU (eval mode). NCHW in/out."""
    N, Cin, H, W = x_nchw.shape
    Cout, _, KH, KW = weight_oihw.shape
    ph, pw = (KH - 1) // 2, (KW - 1) // 2
    Hp, Wp = H + 2 * ph, W + 2 * pw
    Cpad = ((Cout + 127) // 128) * 128                   # lane-dense channel axis
    HW = H * W

    if tile_rows is None:
        tile_rows = _pick_tile_rows(H, W)
    assert H % tile_rows == 0, (H, tile_rows)
    T = H // tile_rows
    THW = tile_rows * W

    # ---- layout glue (outside the hot path) -------------------------------------
    x = jnp.transpose(x_nchw, (0, 2, 3, 1)).astype(jnp.bfloat16)       # NHWC, bf16
    x = jnp.pad(x, ((0, 0), (ph, ph), (pw, pw), (0, 0)))
    # (Cout, Cin, KH, KW) -> (KH, KW, Cin, Cout) -> (KH*KW*Cin, Cout) -> pad to Cpad.
    w2 = jnp.transpose(weight_oihw, (2, 3, 1, 0)).reshape(KH * KW * Cin, Cout)
    w2 = jnp.pad(w2, ((0, 0), (0, Cpad - Cout))).astype(jnp.bfloat16)
    # gamma/beta packed as one lane-dense (2, Cpad) block; padded channels are zero so
    # they stay exactly zero through norm/affine/ReLU and are sliced off below.
    gb = jnp.pad(jnp.stack([gamma, beta], axis=0).astype(jnp.float32),
                 ((0, 0), (0, Cpad - Cout)))
    # Conv bias cancels exactly under InstanceNorm (per-channel constant shift), so it
    # is intentionally not applied.
    del bias

    # ---- pass 1: conv + stats ----------------------------------------------------
    k1 = functools.partial(_conv_stats_kernel, TH=tile_rows, W=W, KH=KH, KW=KW, Cin=Cin)
    conv_out, stats = pl.pallas_call(
        k1,
        out_shape=(jax.ShapeDtypeStruct((N, HW, Cpad), jnp.float32),
                   jax.ShapeDtypeStruct((N, 2, Cpad), jnp.float32)),
        grid_spec=pltpu.PrefetchScalarGridSpec(
            num_scalar_prefetch=0,
            grid=(N, T),
            in_specs=[
                # whole padded image resident across the H-tile axis (no re-DMA per t)
                pl.BlockSpec((1, Hp, Wp, Cin), lambda n, t: (n, 0, 0, 0)),
                pl.BlockSpec((KH * KW * Cin, Cpad), lambda n, t: (0, 0)),
            ],
            out_specs=[
                pl.BlockSpec((1, THW, Cpad), lambda n, t: (n, t, 0)),
                pl.BlockSpec((1, 2, Cpad), lambda n, t: (n, 0, 0)),   # resident accumulator
            ],
        ),
        # NOTE: for large spatial tiles on v5e/v6e raise vmem_limit_bytes here.
        compiler_params=pltpu.CompilerParams(
            dimension_semantics=("parallel", "arbitrary")),
    )(x, w2)

    # ---- pass 2: normalize + affine + LeakyReLU ----------------------------------
    k2 = functools.partial(_norm_act_kernel, HW=HW, eps=EPS, slope=NEG_SLOPE)
    out = pl.pallas_call(
        k2,
        out_shape=jax.ShapeDtypeStruct((N, HW, Cpad), x_nchw.dtype),
        grid_spec=pltpu.PrefetchScalarGridSpec(
            num_scalar_prefetch=0,
            grid=(N, T),
            in_specs=[
                pl.BlockSpec((1, THW, Cpad), lambda n, t: (n, t, 0)),
                pl.BlockSpec((1, 2, Cpad), lambda n, t: (n, 0, 0)),
                pl.BlockSpec((2, Cpad), lambda n, t: (0, 0)),
            ],
            out_specs=pl.BlockSpec((1, THW, Cpad), lambda n, t: (n, t, 0)),
        ),
        compiler_params=pltpu.CompilerParams(
            dimension_semantics=("parallel", "parallel")),
    )(conv_out, stats, gb)

    out = out[:, :, :Cout].reshape(N, H, W, Cout)          # drop padded channels
    return jnp.transpose(out, (0, 3, 1, 2))                # back to NCHW


def _reference(x_nchw, weight_oihw, bias, gamma, beta):
    """Pure-JAX f32 reference of the same forward pass (for correctness check)."""
    KH, KW = weight_oihw.shape[2], weight_oihw.shape[3]
    ph, pw = (KH - 1) // 2, (KW - 1) // 2
    y = lax.conv_general_dilated(
        x_nchw, weight_oihw, window_strides=(1, 1),
        padding=[(ph, ph), (pw, pw)],
        dimension_numbers=("NCHW", "OIHW", "NCHW"),
        precision=lax.Precision.HIGHEST,
    )
    y = y + bias.reshape(1, -1, 1, 1)
    mean = y.mean(axis=(2, 3), keepdims=True)
    var = ((y - mean) ** 2).mean(axis=(2, 3), keepdims=True)
    yh = (y - mean) / jnp.sqrt(var + EPS)
    yh = yh * gamma.reshape(1, -1, 1, 1) + beta.reshape(1, -1, 1, 1)
    return jnp.where(yh >= 0, yh, NEG_SLOPE * yh)


if __name__ == "__main__":
    # Small, module-consistent shapes: N=2, Cin=4, Cout=8, H=W=16, kernel_size=(3,3).
    N, Cin, Cout, H, W, K = 2, 4, 8, 16, 16, 3

    key = jax.random.PRNGKey(0)
    kx, kw, kb, kg, kbeta = jax.random.split(key, 5)

    x = jax.random.normal(kx, (N, Cin, H, W), jnp.float32)
    weight = jax.random.normal(kw, (Cout, Cin, K, K), jnp.float32) * 0.1   # PyTorch OIHW
    bias = jax.random.normal(kb, (Cout,), jnp.float32) * 0.1
    gamma = 1.0 + 0.1 * jax.random.normal(kg, (Cout,), jnp.float32)        # IN affine weight
    beta = 0.1 * jax.random.normal(kbeta, (Cout,), jnp.float32)            # IN affine bias

    ref = jax.block_until_ready(_reference(x, weight, bias, gamma, beta))

    # Check the auto-tiled path and a forced 2-tile path (exercises the two-phase
    # InstanceNorm stats accumulation across the "arbitrary" grid axis).
    for tr in (None, 8):
        out = conv_dropout_norm_relu(x, weight, bias, gamma, beta, tile_rows=tr)
        out = jax.block_until_ready(out)
        assert out.shape == (N, Cout, H, W), out.shape
        err = float(jnp.max(jnp.abs(out - ref)))
        # bf16 MXU operands (f32 accumulation) vs. f32 HIGHEST reference.
        assert jnp.allclose(out, ref, atol=5e-2, rtol=5e-2), err

    print("KERNEL_OK")
</pallas_src>

<mosaic_0001>
module attributes {stable_mosaic.version = 11 : i64} {
  func.func @_conv_stats_kernel(%arg0: i32, %arg1: i32, %arg2: memref<1x18x18x4xbf16, #tpu.memory_space<vmem>>, %arg3: memref<36x128xbf16, #tpu.memory_space<vmem>>, %arg4: memref<1x256x128xf32, #tpu.memory_space<vmem>>, %arg5: memref<1x2x128xf32, #tpu.memory_space<vmem>>) attributes {dimension_semantics = [#tpu.dimension_semantics<parallel>, #tpu.dimension_semantics<arbitrary>], iteration_bounds = array<i64: 2, 1>, scalar_prefetch = 0 : i64, scratch_operands = 0 : i64, tpu.core_type = #tpu.core_type<tc>, window_params = [{transform_indices = @transform_0, window_bounds = array<i64: 1, 18, 18, 4>}, {pipeline_mode = #tpu.pipeline_mode<synchronous>, transform_indices = @transform_1, window_bounds = array<i64: 36, 128>}, {transform_indices = @transform_2, window_bounds = array<i64: 1, 256, 128>}, {transform_indices = @transform_3, window_bounds = array<i64: 1, 2, 128>}]} {
    %c0_i32 = arith.constant 0 : i32
    %0 = arith.cmpi eq, %arg1, %c0_i32 : i32
    %1 = arith.extui %0 : i1 to i32
    %c0_i32_0 = arith.constant 0 : i32
    %2 = arith.cmpi ne, %1, %c0_i32_0 : i32
    scf.if %2 {
      %cst_23 = arith.constant 0.000000e+00 : f32
      %53 = vector.broadcast %cst_23 : f32 to vector<1x2x128xf32>
      %c0_24 = arith.constant 0 : index
      %c0_25 = arith.constant 0 : index
      %c0_26 = arith.constant 0 : index
      %54 = vector.load %arg5[%c0_24, %c0_25, %c0_26] : memref<1x2x128xf32, #tpu.memory_space<vmem>>, vector<1x2x128xf32>
      tpu.vector_store %arg5[%c0_24, %c0_25, %c0_26], %53 {strides = array<i32>} : memref<1x2x128xf32, #tpu.memory_space<vmem>>, vector<1x2x128xf32>,
    } else {
    }
    %c16_i32 = arith.constant 16 : i32
    %3 = arith.muli %arg1, %c16_i32 : i32
    %4 = tpu.assume_multiple %3, 8 : i32
    %c0_i32_1 = arith.constant 0 : i32
    %5 = arith.addi %4, %c0_i32_1 : i32
    %c0 = arith.constant 0 : index
    %6 = arith.index_cast %5 : i32 to index
    %c0_2 = arith.constant 0 : index
    %c0_3 = arith.constant 0 : index
    %7 = vector.load %arg2[%c0, %6, %c0_2, %c0_3] : memref<1x18x18x4xbf16, #tpu.memory_space<vmem>>, vector<1x16x18x4xbf16>
    %8 = vector.shape_cast %7 : vector<1x16x18x4xbf16> to vector<16x18x4xbf16>
    %9 = vector.extract_strided_slice %8 {offsets = [0, 0, 0], sizes = [16, 16, 4], strides = [1, 1, 1]} : vector<16x18x4xbf16> to vector<16x16x4xbf16>
    %10 = vector.shape_cast %9 : vector<16x16x4xbf16> to vector<256x4xbf16>
    %11 = vector.extract_strided_slice %8 {offsets = [0, 1, 0], sizes = [16, 16, 4], strides = [1, 1, 1]} : vector<16x18x4xbf16> to vector<16x16x4xbf16>
    %12 = vector.shape_cast %11 : vector<16x16x4xbf16> to vector<256x4xbf16>
    %13 = vector.extract_strided_slice %8 {offsets = [0, 2, 0], sizes = [16, 16, 4], strides = [1, 1, 1]} : vector<16x18x4xbf16> to vector<16x16x4xbf16>
    %14 = vector.shape_cast %13 : vector<16x16x4xbf16> to vector<256x4xbf16>
    %c1_i32 = arith.constant 1 : i32
    %15 = arith.addi %4, %c1_i32 : i32
    %c0_4 = arith.constant 0 : index
    %16 = arith.index_cast %15 : i32 to index
    %c0_5 = arith.constant 0 : index
    %c0_6 = arith.constant 0 : index
    %17 = vector.load %arg2[%c0_4, %16, %c0_5, %c0_6] : memref<1x18x18x4xbf16, #tpu.memory_space<vmem>>, vector<1x16x18x4xbf16>
    %18 = vector.shape_cast %17 : vector<1x16x18x4xbf16> to vector<16x18x4xbf16>
    %19 = vector.extract_strided_slice %18 {offsets = [0, 0, 0], sizes = [16, 16, 4], strides = [1, 1, 1]} : vector<16x18x4xbf16> to vector<16x16x4xbf16>
    %20 = vector.shape_cast %19 : vector<16x16x4xbf16> to vector<256x4xbf16>
    %21 = vector.extract_strided_slice %18 {offsets = [0, 1, 0], sizes = [16, 16, 4], strides = [1, 1, 1]} : vector<16x18x4xbf16> to vector<16x16x4xbf16>
    %22 = vector.shape_cast %21 : vector<16x16x4xbf16> to vector<256x4xbf16>
    %23 = vector.extract_strided_slice %18 {offsets = [0, 2, 0], sizes = [16, 16, 4], strides = [1, 1, 1]} : vector<16x18x4xbf16> to vector<16x16x4xbf16>
    %24 = vector.shape_cast %23 : vector<16x16x4xbf16> to vector<256x4xbf16>
    %c2_i32 = arith.constant 2 : i32
    %25 = arith.addi %4, %c2_i32 : i32
    %c0_7 = arith.constant 0 : index
    %26 = arith.index_cast %25 : i32 to index
    %c0_8 = arith.constant 0 : index
    %c0_9 = arith.constant 0 : index
    %27 = vector.load %arg2[%c0_7, %26, %c0_8, %c0_9] : memref<1x18x18x4xbf16, #tpu.memory_space<vmem>>, vector<1x16x18x4xbf16>
    %28 = vector.shape_cast %27 : vector<1x16x18x4xbf16> to vector<16x18x4xbf16>
    %29 = vector.extract_strided_slice %28 {offsets = [0, 0, 0], sizes = [16, 16, 4], strides = [1, 1, 1]} : vector<16x18x4xbf16> to vector<16x16x4xbf16>
    %30 = vector.shape_cast %29 : vector<16x16x4xbf16> to vector<256x4xbf16>
    %31 = vector.extract_strided_slice %28 {offsets = [0, 1, 0], sizes = [16, 16, 4], strides = [1, 1, 1]} : vector<16x18x4xbf16> to vector<16x16x4xbf16>
    %32 = vector.shape_cast %31 : vector<16x16x4xbf16> to vector<256x4xbf16>
    %33 = vector.extract_strided_slice %28 {offsets = [0, 2, 0], sizes = [16, 16, 4], strides = [1, 1, 1]} : vector<16x18x4xbf16> to vector<16x16x4xbf16>
    %34 = vector.shape_cast %33 : vector<16x16x4xbf16> to vector<256x4xbf16>
    %35 = tpu.concatenate %10, %12, %14, %20, %22, %24, %30, %32, %34 in 1 : vector<256x4xbf16>, vector<256x4xbf16>, vector<256x4xbf16>, vector<256x4xbf16>, vector<256x4xbf16>, vector<256x4xbf16>, vector<256x4xbf16>, vector<256x4xbf16>, vector<256x4xbf16> -> vector<256x36xbf16>
    %c0_10 = arith.constant 0 : index
    %c0_11 = arith.constant 0 : index
    %36 = vector.load %arg3[%c0_10, %c0_11] : memref<36x128xbf16, #tpu.memory_space<vmem>>, vector<36x128xbf16>
    %cst = arith.constant dense<0.000000e+00> : vector<256x128xf32>
    %37 = tpu.matmul %35, %36, %cst {dimension_numbers = #tpu.dot_dimension_numbers<[1], [0], [0], [1], [0, 0, 1, 1], [], []>} : vector<256x36xbf16>, vector<36x128xbf16>, vector<256x128xf32> -> vector<256x128xf32>
    %c0_12 = arith.constant 0 : index
    %c0_13 = arith.constant 0 : index
    %c0_14 = arith.constant 0 : index
    %38 = vector.load %arg4[%c0_12, %c0_13, %c0_14] : memref<1x256x128xf32, #tpu.memory_space<vmem>>, vector<1x256x128xf32>
    %39 = vector.shape_cast %38 : vector<1x256x128xf32> to vector<256x128xf32>
    %40 = vector.shape_cast %37 : vector<256x128xf32> to vector<1x256x128xf32>
    tpu.vector_store %arg4[%c0_12, %c0_13, %c0_14], %40 {strides = array<i32>} : memref<1x256x128xf32, #tpu.memory_space<vmem>>, vector<1x256x128xf32>,
    %cst_15 = arith.constant dense<0.000000e+00> : vector<128xf32>
    %41 = vector.multi_reduction <add>, %37, %cst_15 [0] : vector<256x128xf32> to vector<128xf32>
    %42 = vector.shape_cast %41 : vector<128xf32> to vector<1x128xf32>
    %43 = arith.mulf %37, %37 : vector<256x128xf32>
    %cst_16 = arith.constant dense<0.000000e+00> : vector<128xf32>
    %44 = vector.multi_reduction <add>, %43, %cst_16 [0] : vector<256x128xf32> to vector<128xf32>
    %45 = vector.shape_cast %44 : vector<128xf32> to vector<1x128xf32>
    %c0_17 = arith.constant 0 : index
    %c0_18 = arith.constant 0 : index
    %c0_19 = arith.constant 0 : index
    %46 = vector.load %arg5[%c0_17, %c0_18, %c0_19] : memref<1x2x128xf32, #tpu.memory_space<vmem>>, vector<1x2x128xf32>
    %47 = vector.shape_cast %46 : vector<1x2x128xf32> to vector<2x128xf32>
    %48 = tpu.concatenate %42, %45 in 0 : vector<1x128xf32>, vector<1x128xf32> -> vector<2x128xf32>
    %49 = arith.addf %47, %48 : vector<2x128xf32>
    %c0_20 = arith.constant 0 : index
    %c0_21 = arith.constant 0 : index
    %c0_22 = arith.constant 0 : index
    %50 = vector.load %arg5[%c0_20, %c0_21, %c0_22] : memref<1x2x128xf32, #tpu.memory_space<vmem>>, vector<1x2x128xf32>
    %51 = vector.shape_cast %50 : vector<1x2x128xf32> to vector<2x128xf32>
    %52 = vector.shape_cast %49 : vector<2x128xf32> to vector<1x2x128xf32>
    tpu.vector_store %arg5[%c0_20, %c0_21, %c0_22], %52 {strides = array<i32>} : memref<1x2x128xf32, #tpu.memory_space<vmem>>, vector<1x2x128xf32>,
    return
  }
  func.func @transform_0(%arg0: i32, %arg1: i32) -> (i32, i32, i32, i32) {
    %c0_i32 = arith.constant 0 : i32
    %c0_i32_0 = arith.constant 0 : i32
    %c0_i32_1 = arith.constant 0 : i32
    %c0_i32_2 = arith.constant 0 : i32
    return %arg0, %c0_i32, %c0_i32_0, %c0_i32_1 : i32, i32, i32, i32
  }
  func.func @transform_1(%arg0: i32, %arg1: i32) -> (i32, i32) {
    %c0_i32 = arith.constant 0 : i32
    %c0_i32_0 = arith.constant 0 : i32
    %c0_i32_1 = arith.constant 0 : i32
    return %c0_i32, %c0_i32_0 : i32, i32
  }
  func.func @transform_2(%arg0: i32, %arg1: i32) -> (i32, i32, i32) {
    %c0_i32 = arith.constant 0 : i32
    %c0_i32_0 = arith.constant 0 : i32
    return %arg0, %arg1, %c0_i32 : i32, i32, i32
  }
  func.func @transform_3(%arg0: i32, %arg1: i32) -> (i32, i32, i32) {
    %c0_i32 = arith.constant 0 : i32
    %c0_i32_0 = arith.constant 0 : i32
    %c0_i32_1 = arith.constant 0 : i32
    return %arg0, %c0_i32, %c0_i32_0 : i32, i32, i32
  }
}

</mosaic_0001>

<bundles_post_ra>
// kernel: tpu_custom_call.1
= control target key start
LH: loop header
LB: loop body
LE: loop exit
PB: predicated region body
PF: predicated region fallthrough
CT: control target
= control target key end

     0   :  { %9 = vsyncpa [#allocation3], 0  ;;  %s6050_s0 = inlined_call_operand.vmem [shape: bf16[2,18,18,4], index: 0, kind: input, shape index: {}]   ;;  %s6051_s1 = inlined_call_operand.vmem [shape: bf16[36,128], index: 1, kind: input, shape index: {}]   ;;  %s6052_s2 = inlined_call_operand.hbm [shape: f32[2,256,128], index: 2, kind: output, shape index: {0}]   ;;  %s6053_s3 = inlined_call_operand.hbm [shape: f32[2,2,128], index: 3, kind: output, shape index: {1}]  }
   0x1   :  { %11 = vsyncpa [#allocation3 + $0x1], 0 }
   0x2   :  { %12 = vsyncpa [#allocation5], 0 }
   0x3   :  { %14 = vsyncpa [#allocation5 + $0x1], 0  ;;  %s4154_s12 = smov 0   ;;  %s4156_s13 = smov 0  }
   0x4   :  { %s4158_s14 = smov 0   ;;  %s4160_s15 = smov 0  }
   0x5   :  { %s4162_s16 = smov 0   ;;  %s4164_s17 = smov 0  }
   0x6 LB: > { %s3473_s18 = sadd.s32 4294967295, %s4120_s17   ;;  %s3474_s19 = sadd.s32 4294967294, %s4120_s17   ;;  %s4120_s17 = sphi %s4164_s17, %s20_s17   ;;  %s4116_s16 = sphi %s4162_s16, %s6064_s16   ;;  %s4112_s15 = sphi %s4160_s15, %s6063_s15   ;;  %s4108_s14 = sphi %s4158_s14, %s6062_s14   ;;  %s4104_s13 = sphi %s4156_s13, %s6061_s13   ;;  %s4100_s12 = sphi %s4154_s12, %s6060_s12  }
   0x7   : > { %s32_s20 = sadd.s32 1, %s4116_s16  ;;  %s88_s21 = sadd.s32 1, %s4108_s14 }
   0x8   : > { %p34_p0 = scmp.ge.s32.totalorder %s32_s20, 2  ;;  %p98_p1 = scmp.ne.s32.totalorder %s4108_s14, %s4104_s13 }
   0x9   : > { %p99_p2 = scmp.eq.s32.totalorder %s3473_s18, 1  ;;  %p104_p3 = scmp.ne.s32.totalorder %s4104_s13, %s4100_s12 }
   0xa   : > { %s6066_s20 = smov (%p34_p0, %s32_s20), 0  ;;  %p105_p5 = scmp.eq.s32.totalorder %s3474_s19, 1 }
   0xb   : > { %p4194_p4 = por %p99_p2, %p98_p1  ;;  %s83_s23 = ssub.s32 %s4116_s16, %s6066_s20 }
   0xc   : > { %p3477_p6 = scmp.ge.s32.totalorder %s4120_s17, 1  ;;  %p86_p7 = scmp.eq.s32.totalorder %s83_s23, 0 }
   0xd   : > { %p4201_p8 = por %p105_p5, %p104_p3  ;;  %p160_p9 = scmp.lt.s32.totalorder %s4120_s17, 3 }
   0xe   : > { %s4207_s25 = scalar_select %p86_p7, %s4108_s14, %s88_s21  }
   0xf   : > { %p161_p10 = pnand %p3477_p6, %p160_p9 }
  0x10   : > { %p189_p11 = scmp.lt.s32.totalorder (!%p161_p10), %s4112_s15, 1  ;;  %vm688_vm0 = vcmask (!%p161_p10), 1042432   ;;  %vm689_vm1 = vcmask (!%p161_p10), 1046532   ;;  %s4122_s4 = smov (!%p161_p10), 12   ;;  %vm253_vm3 = vsmask.f32 (!%p161_p10), 3328 }
  0x11   : > { %164 = sbr.rel (%p161_p10) target bundleno = 731 (0x2db), region = 28  ;;  %vm4245_vm2 = vmor (!%p161_p10), %vm688_vm0, %vm689_vm1  ;;  %vm254_vm4 = vsmask.f32 (!%p161_p10), 7440  ;;  %s4123_s5 = smov (!%p161_p10), 20   ;;  %vm2683_vm6 = vcmask (!%p161_p10), 31744   ;;  %vm2732_vm7 = vcmask (!%p161_p10), 64512  }
  0x12   : > { %s4124_s6 = smov (!%p161_p10), 8   ;;  %vm4289_vm5 = vmor (!%p161_p10), %vm253_vm3, %vm254_vm4  ;;  %s4125_s7 = smov (!%p161_p10), 4   ;;  %vm2765_vm8 = vcmask (!%p161_p10), 97280   ;;  %vm2798_vm9 = vcmask (!%p161_p10), 130048   ;;  %vm2831_vm10 = vcmask (!%p161_p10), 162816   ;;  %vm2864_vm11 = vcmask (!%p161_p10), 195584  }
  0x13   : > { %s4126_s8 = smov (!%p161_p10), 16   ;;  %s4127_s9 = smov (!%p161_p10), 24   ;;  %vm2897_vm12 = vcmask (!%p161_p10), 228352   ;;  %vm3016_vm13 = vcmask (!%p161_p10), 1041408   ;;  %vm2930_vm14 = vcmask (!%p161_p10), 261120   ;;  %vm2983_vm15 = vcmask (!%p161_p10), 293888  }
  0x14   : > { %s4128_s10 = smov (!%p161_p10), 28   ;;  %s4129_s19 = smov (!%p161_p10), 32  }
  0x15   : > { %s5874_s28 = sand.u32 (!%p161_p10), 1, %s4104_s13   ;;  %s4131_s21 = smov (!%p161_p10), [#allocation2]  }
  0x16   : > { %s3478_s29 = sshll.u32 (!%p161_p10), %s5874_s28, 8  ;;  %s3325_s18 = scalar_lea.sflag (!%p161_p10), [#allocation3], %s5874_s28 }
  0x17   : > { %s4014_s23 = sshll.u32 (!%p161_p10), %s4131_s21, 4  ;;  %s4015_s23 = int_to_ptr.vmem [resolvable:$false] %s4014_s23 }
  0x18   : > { %s190_s26 = scalar_select %p189_p11, %s4112_s15, 1 }
  0x1a   : > { %s3861_s27 = smul.u32 216, %s190_s26  ;;  %s4016_s26 = scalar_lea.vmem %s4015_s23, 8192 }
  0x1c   : > { %s4214_s30 = scalar_lea.vmem %s6050_s0, %s3861_s27 }
  0x1d   : > { %v4217_v0 = vld [vmem:[%s4214_s30 + $0x18] sm:$0xf]  ;;  %v4220_v1 = vld [vmem:[%s4214_s30 + $0x1c] sm:$0xf]  ;;  %v3497_v2 = vld [vmem:[%s4214_s30 + $0xc] sm:$0xf] }
  0x1e   : > { %v889_v3 = vshll.u32 %v4220_v1, 16  ;;  %v893_v4 = vshrl.u32 %v4220_v1, 16  ;;  %v3674_v5 = vcombine.low %v4217_v0, %v4220_v1  ;;  %v880_v6 = vshrl.u32 %v4217_v0, 16  ;;  %v4229_v7 = vld [vmem:[%s4214_s30 + $0x10] sm:$0xf] }
  0x1f   : > { %v883_v8 = vshll.u32 %v4217_v0, 16  ;;  %v865_v9 = vshll.u32 %v4229_v7, 16  ;;  %v869_v10 = vshrl.u32 %v4229_v7, 16  ;;  %v3673_v11 = vcombine.low %v3497_v2, %v4229_v7  ;;  %v4236_v12 = vld [vmem:[%s4214_s30 + $0x14] sm:$0x1] }
  0x20   : > { %v4238_v13 = vrot.slane %v893_v4, 4  ;;  %2253 = vrot.lane.b32.xlu1 %v3674_v5, %s4122_s4  ;;  %v4241_v14 = vrot.slane %v880_v6, 4  ;;  %v856_v15 = vshrl.u32 %v3497_v2, 16  ;;  %v859_v16 = vshll.u32 %v3497_v2, 16  ;;  %v205_v18 = vld [vmem:[%s4214_s30] sm:$0xf] }
  0x21   : > { %v4250_v19 = vrot.slane %v883_v8, 5  ;;  %v4252_v20 = vrot.slane %v869_v10, 4  ;;  %2251 = vrot.lane.b32.xlu0 %v3673_v11, %s4122_s4  ;;  %v3545_v21 = vrot.slane %v3497_v2, 9  ;;  %v1289_v22 = vrot.slane %v4229_v7, 5  ;;  %v206_v23 = vld [vmem:[%s4214_s30 + $0x4] sm:$0xf] }
  0x22   : > { %v4257_v24 = vrot.slane %v856_v15, 4  ;;  %v4259_v25 = vrot.slane %v859_v16, 5  ;;  %v1292_v26 = vrot.slane %v4236_v12, 5  ;;  %v207_v27 = vld [vmem:[%s4214_s30 + $0x8] sm:$0x1]  ;;  %v3481_v28 = vrot.slane %v205_v18, 9 }
  0x23   : > { %v1290_v29 = vsel %vm4245_vm2, %v3545_v21, %v1289_v22  ;;  %v1291_v30 = vrot.slane %v1289_v22, 4  ;;  %v693_v31 = vrot.slane %v206_v23, 5  ;;  %v696_v32 = vrot.slane %v207_v27, 5  ;;  %v208_v33 = vld [vmem:[%s4214_s30 + $0xc] sm:$0xf] }
  0x24   : > { %v209_v34 = vld [vmem:[%s4214_s30 + $0x10] sm:$0xf]  ;;  %v210_v35 = vld [vmem:[%s4214_s30 + $0x14] sm:$0x1]  ;;  %v3482_v36 = vrot.slane %v208_v33, 9  ;;  %v257_v37 = vshrl.u32 %v205_v18, 16  ;;  %v886_v38 = vor.u32 %v4250_v19, %v4241_v14  ;;  %v862_v39 = vor.u32 %v4259_v25, %v4257_v24 }
  0x25   : > { %v1293_v40 = vsel %vm4245_vm2, %v1291_v30, %v1292_v26  ;;  %v694_v41 = vsel %vm4245_vm2, %v3481_v28, %v693_v31  ;;  %v695_v42 = vrot.slane %v693_v31, 4  ;;  %v700_v43 = vrot.slane %v209_v34, 5  ;;  %v3502_v56 = vld [vmem:[%s4214_s30 + $0x20] sm:$0x1] }
  0x26   : > { %v3705_v44 = vcombine.low %v1290_v29, %v1293_v40  ;;  %v703_v45 = vrot.slane %v210_v35, 5  ;;  %v259_v46 = vrot.slane %v257_v37, 4  ;;  %v260_v47 = vshll.u32 %v205_v18, 16  ;;  %v4307_v40 = vld [vmem:[%s4214_s30 + $0x24] sm:$0xf] }
  0x27   : > { %v697_v48 = vsel %vm4245_vm2, %v695_v42, %v696_v32  ;;  %v701_v49 = vsel %vm4245_vm2, %v3482_v36, %v700_v43  ;;  %v702_v50 = vrot.slane %v700_v43, 4  ;;  %v266_v51 = vshll.u32 %v206_v23, 16  ;;  %v4314_v42 = vld [vmem:[%s4214_s30 + $0x28] sm:$0xf] }
  0x28   : > { %2411 = vrot.lane.b32.xlu0 %v3705_v44, %s4123_s5  ;;  %v3657_v52 = vcombine.low %v694_v41, %v697_v48  ;;  %v262_v53 = vrot.slane %v260_v47, 5  ;;  %v270_v54 = vshrl.u32 %v206_v23, 16  ;;  %v276_v55 = vshll.u32 %v207_v27, 16  ;;  %v4322_v44 = vld [vmem:[%s4214_s30 + $0x18] sm:$0xf] }
  0x29   : > { %v704_v57 = vsel %vm4245_vm2, %v702_v50, %v703_v45  ;;  %v268_v58 = vrot.slane %v266_v51, 5  ;;  %v3546_v59 = vrot.slane %v4217_v0, 9  ;;  %v1296_v60 = vrot.slane %v4220_v1, 5  ;;  %v4329_v48 = vld [vmem:[%s4214_s30 + $0x1c] sm:$0xf] }
  0x2a   : > { %2171 = vrot.lane.b32.xlu1 %v3657_v52, %s4124_s6  ;;  %v3658_v61 = vcombine.low %v701_v49, %v704_v57  ;;  %v263_v62 = vor.u32 %v262_v53, %v259_v46  ;;  %v272_v63 = vrot.slane %v270_v54, 4  ;;  %v278_v2 = vrot.slane %v276_v55, 5  ;;  %v4340_v55 = vld [vmem:[%s4214_s30 + $0x2c] sm:$0x1] }
  0x2b   : > { %v1297_v5 = vsel %vm4245_vm2, %v3546_v59, %v1296_v60  ;;  %v1298_v6 = vrot.slane %v1296_v60, 4  ;;  %v1299_v0 = vrot.slane %v3502_v56, 5  ;;  %v281_v8 = vshrl.u32 %v208_v33, 16 }
  0x2c   : > { %v264_v10 = vrot.slane %v263_v62, 4  ;;  %v273_v11 = vor.u32 %v272_v63, %v268_v58  ;;  %v284_v14 = vshll.u32 %v208_v33, 16  ;;  %v290_v15 = vshll.u32 %v209_v34, 16 }
  0x2d   : > { %v1300_v16 = vsel %vm4245_vm2, %v1298_v6, %v1299_v0  ;;  %v283_v18 = vrot.slane %v281_v8, 4  ;;  %v294_v19 = vshrl.u32 %v209_v34, 16  ;;  %v300_v21 = vshll.u32 %v210_v35, 16 }
  0x2e   : > { %2173 = vrot.lane.b32.xlu1 %v3658_v61, %s4124_s6  ;;  %v269_v22 = vsel %vm4289_vm5, %v264_v10, %v268_v58  ;;  %v274_v23 = vrot.slane %v273_v11, 4  ;;  %v3706_v24 = vcombine.low %v1297_v5, %v1300_v16  ;;  %v286_v25 = vrot.slane %v284_v14, 5  ;;  %v4353_v5 = vld [vmem:[%s4214_s30 + $0x18] sm:$0xf] }
  0x2f   : > { %v292_v26 = vrot.slane %v290_v15, 5  ;;  %v296_v27 = vrot.slane %v294_v19, 4  ;;  %v302_v28 = vrot.slane %v300_v21, 5  ;;  %v887_v29 = vrot.slane %v886_v38, 4 }
  0x30   : > { %v279_v30 = vsel %vm4289_vm5, %v274_v23, %v278_v2  ;;  %v287_v31 = vor.u32 %v286_v25, %v283_v18  ;;  %v891_v32 = vrot.slane %v889_v3, 5  ;;  %v899_v33 = vshll.u32 %v3502_v56, 16  ;;  %v4350_v2 = vld [vmem:[%s4214_s30 + $0x20] sm:$0x1]  ;;  %v4360_v18 = vld [vmem:[%s4214_s30 + $0x1c] sm:$0xf] }
  0x31   : > { %v3641_v34 = vcombine.low %v269_v22, %v279_v30  ;;  %v297_v35 = vor.u32 %v296_v27, %v292_v26  ;;  %v863_v36 = vrot.slane %v862_v39, 4  ;;  %v867_v37 = vrot.slane %v865_v9, 5  ;;  %v4366_v27 = vld [vmem:[%s4214_s30 + $0x20] sm:$0x1] }
  0x32   : > { %2413 = vrot.lane.b32.xlu1 %v3706_v24, %s4123_s5  ;;  %v288_v38 = vrot.slane %v287_v31, 4  ;;  %v892_v41 = vsel %vm4289_vm5, %v887_v29, %v891_v32  ;;  %v896_v1 = vor.u32 %v4238_v13, %v891_v32  ;;  %v901_v3 = vrot.slane %v899_v33, 5 }
  0x33   : > { %2091 = vrot.lane.b32.xlu0 %v3641_v34, %s4125_s7  ;;  %v298_v39 = vrot.slane %v297_v35, 4  ;;  %v868_v7 = vsel %vm4289_vm5, %v863_v36, %v867_v37  ;;  %v872_v9 = vor.u32 %v4252_v20, %v867_v37  ;;  %v875_v43 = vshll.u32 %v4236_v12, 16 }
  0x34   : > { %v293_v13 = vsel %vm4289_vm5, %v288_v38, %v292_v26  ;;  %v897_v45 = vrot.slane %v896_v1, 4  ;;  %v1476_v46 = vshrl.u32 %v4307_v40, 16  ;;  %v1479_v47 = vshll.u32 %v4307_v40, 16 }
  0x35   : > { %v303_v49 = vsel %vm4289_vm5, %v298_v39, %v302_v28  ;;  %v873_v50 = vrot.slane %v872_v9, 4  ;;  %v877_v20 = vrot.slane %v875_v43, 5  ;;  %v1489_v12 = vshrl.u32 %v4314_v42, 16  ;;  %v214_v43 = vld [vmem:[%s4214_s30 + $0x24] sm:$0xf] }
  0x36   : > { %v3642_v51 = vcombine.low %v293_v13, %v303_v49  ;;  %v902_v52 = vsel %vm4289_vm5, %v897_v45, %v901_v3  ;;  %v3722_v53 = vcombine.low %v4307_v40, %v4314_v42  ;;  %v1452_v54 = vshrl.u32 %v4322_v44, 16  ;;  %v215_v49 = vld [vmem:[%s4214_s30 + $0x28] sm:$0xf] }
  0x37   : > { %v3690_v56 = vcombine.low %v892_v41, %v902_v52  ;;  %v878_v57 = vsel %vm4289_vm5, %v873_v50, %v877_v20  ;;  %v1455_v58 = vshll.u32 %v4322_v44, 16  ;;  %v1465_v59 = vshrl.u32 %v4329_v48, 16  ;;  %v216_v52 = vld [vmem:[%s4214_s30 + $0x2c] sm:$0x1] }
  0x38   : > { %2093 = vrot.lane.b32.xlu0 %v3642_v51, %s4125_s7  ;;  %v3689_v60 = vcombine.low %v868_v7, %v878_v57  ;;  %v3721_v61 = vcombine.low %v4322_v44, %v4329_v48  ;;  %v1478_v62 = vrot.slane %v1476_v46, 4  ;;  %v1481_v63 = vrot.slane %v1479_v47, 5 }
  0x39   : > { %2333 = vrot.lane.b32.xlu1 %v3690_v56, %s4126_s8  ;;  %v1485_v6 = vshll.u32 %v4314_v42, 16  ;;  %v1491_v0 = vrot.slane %v1489_v12, 4  ;;  %v1495_v8 = vshll.u32 %v4340_v55, 16  ;;  %v1454_v10 = vrot.slane %v1452_v54, 4 }
  0x3a   : > { %v1482_v11 = vor.u32 %v1481_v63, %v1478_v62  ;;  %v1457_v14 = vrot.slane %v1455_v58, 5  ;;  %v1461_v15 = vshll.u32 %v4329_v48, 16  ;;  %v1467_v16 = vrot.slane %v1465_v59, 4 }
  0x3b   : > { %v1487_v19 = vrot.slane %v1485_v6, 5  ;;  %v1497_v21 = vrot.slane %v1495_v8, 5  ;;  %v1471_v22 = vshll.u32 %v4350_v2, 16  ;;  %v305_v23 = vshrl.u32 %v4353_v5, 16 }
  0x3c   : > { %2331 = vrot.lane.b32.xlu0 %v3689_v60, %s4126_s8  ;;  %v1483_v24 = vrot.slane %v1482_v11, 4  ;;  %v1458_v25 = vor.u32 %v1457_v14, %v1454_v10  ;;  %v1463_v26 = vrot.slane %v1461_v15, 5  ;;  %v308_v28 = vshll.u32 %v4353_v5, 16  ;;  %v3950_v10 = vld [vmem:[%s6051_s1] sm:$0xff]  }
  0x3d   : > { %2493 = vrot.lane.b32.xlu1 %v3722_v53, %s4127_s9  ;;  %v1492_v29 = vor.u32 %v1491_v0, %v1487_v19  ;;  %v1473_v30 = vrot.slane %v1471_v22, 5  ;;  %v307_v31 = vrot.slane %v305_v23, 4  ;;  %v314_v32 = vshll.u32 %v4360_v18, 16  ;;  %3815 = vmatprep.subr.bf16.mxu0 %v3950_v10 }
  0x3e   : > { %v1488_v33 = vsel %vm4289_vm5, %v1483_v24, %v1487_v19  ;;  %v1459_v34 = vrot.slane %v1458_v25, 4  ;;  %v1468_v35 = vor.u32 %v1467_v16, %v1463_v26  ;;  %v310_v36 = vrot.slane %v308_v28, 5  ;;  %3853 = vmatprep.subr.bf16.mxu1 %v3950_v10  ;;  %3816 = vmatpush3.bf16.msra.mxu0 %v3950_v10 }
  0x3f   : > { %v1493_v37 = vrot.slane %v1492_v29, 4  ;;  %v316_v38 = vrot.slane %v314_v32, 5  ;;  %v318_v41 = vshrl.u32 %v4360_v18, 16  ;;  %v324_v1 = vshll.u32 %v4366_v27, 16  ;;  %v4406_v29 = vld [vmem:[%s4214_s30 + $0x30] sm:$0xf]  ;;  %3856 = vmatpush3.bf16.msra.mxu1 %v3950_v10 }
  0x40   : > { %2491 = vrot.lane.b32.xlu0 %v3721_v61, %s4127_s9  ;;  %v1464_v3 = vsel %vm4289_vm5, %v1459_v34, %v1463_v26  ;;  %v1469_v39 = vrot.slane %v1468_v35, 4  ;;  %v311_v7 = vor.u32 %v310_v36, %v307_v31  ;;  %v3609_v9 = vrot.slane %v4322_v44, 9  ;;  %v3953_v31 = vld [vmem:[%s6051_s1 + $0x8] sm:$0xff]  }
  0x41   : > { %v1498_v13 = vsel %vm4289_vm5, %v1493_v37, %v1497_v21  ;;  %v320_v45 = vrot.slane %v318_v41, 4  ;;  %v326_v46 = vrot.slane %v324_v1, 5  ;;  %v1885_v47 = vrot.slane %v4329_v48, 5  ;;  %v4426_v1 = vld [vmem:[%s4214_s30 + $0x24] sm:$0xf]  ;;  %3817 = vmatprep.subr.bf16.mxu0 %v3953_v31  ;;  %3854 = vmatprep.subr.bf16.mxu1 %v3953_v31 }
  0x42   : > { %v3738_v50 = vcombine.low %v1488_v33, %v1498_v13  ;;  %v1474_v20 = vsel %vm4289_vm5, %v1469_v39, %v1473_v30  ;;  %v312_v12 = vrot.slane %v311_v7, 4  ;;  %v1888_v51 = vrot.slane %v4350_v2, 5  ;;  %3818 = vmatpush3.bf16.msra.mxu0 %v3953_v31 }
  0x43   : > { %v3737_v53 = vcombine.low %v1464_v3, %v1474_v20  ;;  %v321_v54 = vor.u32 %v320_v45, %v316_v38  ;;  %v1886_v44 = vsel %vm4245_vm2, %v3609_v9, %v1885_v47  ;;  %v1887_v56 = vrot.slane %v1885_v47, 4  ;;  %v4435_v9 = vld [vmem:[%s4214_s30 + $0x28] sm:$0xf]  ;;  %3857 = vmatpush3.bf16.msra.mxu1 %v3953_v31  ;;  %v3508_v20 = vld [vmem:[%s4214_s30 + $0x38] sm:$0x1] }
  0x44   : > { %2573 = vrot.lane.b32.xlu1 %v3738_v50, %s4128_s10  ;;  %v317_v48 = vsel %vm4289_vm5, %v312_v12, %v316_v38  ;;  %v329_v57 = vshrl.u32 %v214_v43, 16  ;;  %v332_v58 = vshll.u32 %v214_v43, 16  ;;  %v338_v59 = vshll.u32 %v215_v49, 16  ;;  %v3507_v38 = vld [vmem:[%s4214_s30 + $0x34] sm:$0xf] }
  0x45   : > { %2571 = vrot.lane.b32.xlu0 %v3737_v53, %s4128_s10  ;;  %v322_v60 = vrot.slane %v321_v54, 4  ;;  %v1889_v61 = vsel %vm4245_vm2, %v1887_v56, %v1888_v51  ;;  %v342_v62 = vshrl.u32 %v215_v49, 16  ;;  %v348_v63 = vshll.u32 %v216_v52, 16  ;;  %v4450_v54 = vld [vmem:[%s4214_s30 + $0x2c] sm:$0x1] }
  0x46   : > { %v3753_v2 = vcombine.low %v1886_v44, %v1889_v61  ;;  %v331_v6 = vrot.slane %v329_v57, 4  ;;  %v334_v0 = vrot.slane %v332_v58, 5  ;;  %v340_v8 = vrot.slane %v338_v59, 5 }
  0x47   : > { %v327_v11 = vsel %vm4289_vm5, %v322_v60, %v326_v46  ;;  %v344_v14 = vrot.slane %v342_v62, 4  ;;  %v350_v15 = vrot.slane %v348_v63, 5  ;;  %v3610_v16 = vrot.slane %v4307_v40, 9 }
  0x48   : > { %v3643_v19 = vcombine.low %v317_v48, %v327_v11  ;;  %v335_v21 = vor.u32 %v334_v0, %v331_v6  ;;  %v1892_v22 = vrot.slane %v4314_v42, 5  ;;  %v1895_v23 = vrot.slane %v4340_v55, 5 }
  0x49   : > { %2651 = vrot.lane.b32.xlu0 %v3753_v2, %s4129_s19  ;;  %v345_v24 = vor.u32 %v344_v14, %v340_v8  ;;  %v3484_v25 = vrot.slane %v214_v43, 9  ;;  %v714_v26 = vrot.slane %v215_v49, 5  ;;  %v717_v28 = vrot.slane %v216_v52, 5 }
  0x4a   : > { %2095 = vrot.lane.b32.xlu1 %v3643_v19, %s4125_s7  ;;  %v336_v40 = vrot.slane %v335_v21, 4  ;;  %v1893_v42 = vsel %vm4245_vm2, %v3610_v16, %v1892_v22  ;;  %v1894_v55 = vrot.slane %v1892_v22, 4  ;;  %v3483_v30 = vrot.slane %v4353_v5, 9 }
  0x4b   : > { %v346_v32 = vrot.slane %v345_v24, 4  ;;  %v715_v33 = vsel %vm4245_vm2, %v3484_v25, %v714_v26  ;;  %v716_v34 = vrot.slane %v714_v26, 4  ;;  %v707_v35 = vrot.slane %v4360_v18, 5  ;;  %v4459_v25 = vld [vmem:[%s4214_s30 + $0x3c] sm:$0xf] }
  0x4c   : > { %v341_v36 = vsel %vm4289_vm5, %v336_v40, %v340_v8  ;;  %v1896_v37 = vsel %vm4245_vm2, %v1894_v55, %v1895_v23  ;;  %v710_v5 = vrot.slane %v4366_v27, 5  ;;  %v928_v41 = vshrl.u32 %v4406_v29, 16 }
  0x4d   : > { %v351_v3 = vsel %vm4289_vm5, %v346_v32, %v350_v15  ;;  %v3754_v18 = vcombine.low %v1893_v42, %v1896_v37  ;;  %v718_v39 = vsel %vm4245_vm2, %v716_v34, %v717_v28  ;;  %v708_v7 = vsel %vm4245_vm2, %v3483_v30, %v707_v35  ;;  %v4472_v32 = vld [vmem:[%s4214_s30 + $0x40] sm:$0xf]  ;;  %v4481_v37 = vld [vmem:[%s4214_s30 + $0x30] sm:$0xf] }
  0x4e   : > { %v3644_v27 = vcombine.low %v341_v36, %v351_v3  ;;  %v3660_v43 = vcombine.low %v715_v33, %v718_v39  ;;  %v709_v13 = vrot.slane %v707_v35, 4  ;;  %v931_v45 = vshll.u32 %v4406_v29, 16 }
  0x4f   : > { %2653 = vrot.lane.b32.xlu0 %v3754_v18, %s4129_s19  ;;  %v941_v46 = vshrl.u32 %v3507_v38, 16  ;;  %v3676_v47 = vcombine.low %v4406_v29, %v3507_v38  ;;  %v904_v49 = vshrl.u32 %v4426_v1, 16  ;;  %v907_v50 = vshll.u32 %v4426_v1, 16 }
  0x50   : > { %2097 = vrot.lane.b32.xlu1 %v3644_v27, %s4125_s7  ;;  %v711_v12 = vsel %vm4245_vm2, %v709_v13, %v710_v5  ;;  %v917_v51 = vshrl.u32 %v4435_v9, 16  ;;  %v3675_v52 = vcombine.low %v4426_v1, %v4435_v9  ;;  %v930_v53 = vrot.slane %v928_v41, 4  ;;  %v4484_v5 = vld [vmem:[%s4214_s30 + $0x34] sm:$0xf]  ;;  %v4494_v27 = vld [vmem:[%s4214_s30 + $0x44] sm:$0x1] }
  0x51   : > { %v3659_v44 = vcombine.low %v708_v7, %v711_v12  ;;  %v933_v56 = vrot.slane %v931_v45, 5  ;;  %v937_v48 = vshll.u32 %v3507_v38, 16  ;;  %v943_v57 = vrot.slane %v941_v46, 4 }
  0x52   : > { %v947_v58 = vshll.u32 %v3508_v20, 16  ;;  %v906_v59 = vrot.slane %v904_v49, 4  ;;  %v909_v60 = vrot.slane %v907_v50, 5  ;;  %v913_v61 = vshll.u32 %v4435_v9, 16 }
  0x53   : > { %2175 = vrot.lane.b32.xlu0 %v3659_v44, %s4124_s6  ;;  %v934_v62 = vor.u32 %v933_v56, %v930_v53  ;;  %v939_v63 = vrot.slane %v937_v48, 5  ;;  %v919_v2 = vrot.slane %v917_v51, 4  ;;  %v923_v6 = vshll.u32 %v4450_v54, 16  ;;  %v4510_v51 = vld [vmem:[%s4214_s30 + $0x30] sm:$0xf] }
  0x54   : > { %2177 = vrot.lane.b32.xlu1 %v3660_v43, %s4124_s6  ;;  %v949_v0 = vrot.slane %v947_v58, 5  ;;  %v910_v8 = vor.u32 %v909_v60, %v906_v59  ;;  %v915_v10 = vrot.slane %v913_v61, 5  ;;  %v3548_v11 = vrot.slane %v4406_v29, 9  ;;  %v4515_v59 = vld [vmem:[%s4214_s30 + $0x34] sm:$0xf] }
  0x55   : > { %v935_v14 = vrot.slane %v934_v62, 4  ;;  %v944_v15 = vor.u32 %v943_v57, %v939_v63  ;;  %v925_v16 = vrot.slane %v923_v6, 5  ;;  %v1310_v19 = vrot.slane %v3507_v38, 5 }
  0x56   : > { %v911_v21 = vrot.slane %v910_v8, 4  ;;  %v920_v22 = vor.u32 %v919_v2, %v915_v10  ;;  %v1313_v23 = vrot.slane %v3508_v20, 5  ;;  %v3547_v24 = vrot.slane %v4426_v1, 9 }
  0x57   : > { %2255 = vrot.lane.b32.xlu0 %v3675_v52, %s4122_s4  ;;  %v940_v26 = vsel %vm4289_vm5, %v935_v14, %v939_v63  ;;  %v945_v28 = vrot.slane %v944_v15, 4  ;;  %v1311_v29 = vsel %vm4245_vm2, %v3548_v11, %v1310_v19  ;;  %v1312_v40 = vrot.slane %v1310_v19, 4 }
  0x58   : > { %2257 = vrot.lane.b32.xlu1 %v3676_v47, %s4122_s4  ;;  %v916_v42 = vsel %vm4289_vm5, %v911_v21, %v915_v10  ;;  %v921_v55 = vrot.slane %v920_v22, 4  ;;  %v1303_v30 = vrot.slane %v4435_v9, 5  ;;  %v1306_v31 = vrot.slane %v4450_v54, 5  ;;  %v4503_v47 = vld [vmem:[%s4214_s30 + $0x38] sm:$0x1] }
  0x59   : > { %v950_v33 = vsel %vm4289_vm5, %v945_v28, %v949_v0  ;;  %v1314_v34 = vsel %vm4245_vm2, %v1312_v40, %v1313_v23  ;;  %v1524_v35 = vshrl.u32 %v4459_v25, 16  ;;  %v1527_v36 = vshll.u32 %v4459_v25, 16  ;;  %v4522_v10 = vld [vmem:[%s4214_s30 + $0x38] sm:$0x1]  ;;  %v220_v40 = vld [vmem:[%s4214_s30 + $0x3c] sm:$0xf] }
  0x5a   : > { %v3692_v38 = vcombine.low %v940_v26, %v950_v33  ;;  %v926_v41 = vsel %vm4289_vm5, %v921_v55, %v925_v16  ;;  %v3708_v1 = vcombine.low %v1311_v29, %v1314_v34  ;;  %v1304_v3 = vsel %vm4245_vm2, %v3547_v24, %v1303_v30 }
  0x5b   : > { %v3691_v18 = vcombine.low %v916_v42, %v926_v41  ;;  %v1305_v39 = vrot.slane %v1303_v30, 4  ;;  %v1537_v7 = vshrl.u32 %v4472_v32, 16  ;;  %v3724_v9 = vcombine.low %v4459_v25, %v4472_v32 }
  0x5c   : > { %2337 = vrot.lane.b32.xlu1 %v3692_v38, %s4126_s8  ;;  %v1500_v43 = vshrl.u32 %v4481_v37, 16  ;;  %v1503_v13 = vshll.u32 %v4481_v37, 16  ;;  %v1513_v45 = vshrl.u32 %v4484_v5, 16  ;;  %v3723_v46 = vcombine.low %v4481_v37, %v4484_v5  ;;  %v221_v38 = vld [vmem:[%s4214_s30 + $0x40] sm:$0xf] }
  0x5d   : > { %2335 = vrot.lane.b32.xlu0 %v3691_v18, %s4126_s8  ;;  %v1307_v49 = vsel %vm4245_vm2, %v1305_v39, %v1306_v31  ;;  %v1526_v50 = vrot.slane %v1524_v35, 4  ;;  %v1529_v20 = vrot.slane %v1527_v36, 5  ;;  %v1533_v12 = vshll.u32 %v4472_v32, 16 }
  0x5e   : > { %v3707_v52 = vcombine.low %v1304_v3, %v1307_v49  ;;  %v1539_v53 = vrot.slane %v1537_v7, 4  ;;  %v1543_v54 = vshll.u32 %v4494_v27, 16  ;;  %v1502_v44 = vrot.slane %v1500_v43, 4  ;;  %v222_v43 = vld [vmem:[%s4214_s30 + $0x44] sm:$0x1] }
  0x5f   : > { %v1530_v56 = vor.u32 %v1529_v20, %v1526_v50  ;;  %v1535_v48 = vrot.slane %v1533_v12, 5  ;;  %v1505_v57 = vrot.slane %v1503_v13, 5  ;;  %v1509_v58 = vshll.u32 %v4484_v5, 16 }
  0x60   : > { %2417 = vrot.lane.b32.xlu1 %v3708_v1, %s4123_s5  ;;  %v1545_v60 = vrot.slane %v1543_v54, 5  ;;  %v1515_v61 = vrot.slane %v1513_v45, 4  ;;  %v1519_v62 = vshll.u32 %v4503_v47, 16  ;;  %v353_v63 = vshrl.u32 %v4510_v51, 16 }
  0x61   : > { %2415 = vrot.lane.b32.xlu0 %v3707_v52, %s4123_s5  ;;  %v1531_v2 = vrot.slane %v1530_v56, 4  ;;  %v1540_v6 = vor.u32 %v1539_v53, %v1535_v48  ;;  %v1506_v0 = vor.u32 %v1505_v57, %v1502_v44  ;;  %v1511_v8 = vrot.slane %v1509_v58, 5 }
  0x62   : > { %v1521_v11 = vrot.slane %v1519_v62, 5  ;;  %v355_v14 = vrot.slane %v353_v63, 4  ;;  %v356_v15 = vshll.u32 %v4510_v51, 16  ;;  %v362_v16 = vshll.u32 %v4515_v59, 16 }
  0x63   : > { %v1536_v19 = vsel %vm4289_vm5, %v1531_v2, %v1535_v48  ;;  %v1541_v21 = vrot.slane %v1540_v6, 4  ;;  %v1507_v22 = vrot.slane %v1506_v0, 4  ;;  %v1516_v23 = vor.u32 %v1515_v61, %v1511_v8 }
  0x64   : > { %2497 = vrot.lane.b32.xlu1 %v3724_v9, %s4127_s9  ;;  %v358_v24 = vrot.slane %v356_v15, 5  ;;  %v364_v26 = vrot.slane %v362_v16, 5  ;;  %v366_v28 = vshrl.u32 %v4515_v59, 16  ;;  %v372_v29 = vshll.u32 %v4522_v10, 16 }
  0x65   : > { %2495 = vrot.lane.b32.xlu0 %v3723_v46, %s4127_s9  ;;  %v1546_v42 = vsel %vm4289_vm5, %v1541_v21, %v1545_v60  ;;  %v1512_v55 = vsel %vm4289_vm5, %v1507_v22, %v1511_v8  ;;  %v1517_v30 = vrot.slane %v1516_v23, 4  ;;  %v3611_v31 = vrot.slane %v4481_v37, 9  ;;  %v3513_v21 = vld [vmem:[%s4214_s30 + $0x4c] sm:$0xf] }
  0x66   : > { %v3740_v33 = vcombine.low %v1536_v19, %v1546_v42  ;;  %v359_v34 = vor.u32 %v358_v24, %v355_v14  ;;  %v368_v35 = vrot.slane %v366_v28, 4  ;;  %v374_v36 = vrot.slane %v372_v29, 5 }
  0x67   : > { %v1522_v41 = vsel %vm4289_vm5, %v1517_v30, %v1521_v11  ;;  %v1899_v1 = vrot.slane %v4484_v5, 5  ;;  %v1902_v3 = vrot.slane %v4503_v47, 5  ;;  %v377_v18 = vshrl.u32 %v220_v40, 16 }
  0x68   : > { %2577 = vrot.lane.b32.xlu1 %v3740_v33, %s4128_s10  ;;  %v3739_v39 = vcombine.low %v1512_v55, %v1522_v41  ;;  %v360_v7 = vrot.slane %v359_v34, 4  ;;  %v369_v9 = vor.u32 %v368_v35, %v364_v26  ;;  %v380_v37 = vshll.u32 %v220_v40, 16  ;;  %v4584_v55 = vld [vmem:[%s4214_s30 + $0x40] sm:$0xf] }
  0x69   : > { %v1900_v13 = vsel %vm4245_vm2, %v3611_v31, %v1899_v1  ;;  %v1901_v45 = vrot.slane %v1899_v1, 4  ;;  %v379_v46 = vrot.slane %v377_v18, 4  ;;  %v386_v49 = vshll.u32 %v221_v38, 16 }
  0x6a   : > { %2575 = vrot.lane.b32.xlu0 %v3739_v39, %s4128_s10  ;;  %v365_v5 = vsel %vm4289_vm5, %v360_v7, %v364_v26  ;;  %v370_v47 = vrot.slane %v369_v9, 4  ;;  %v382_v50 = vrot.slane %v380_v37, 5  ;;  %v390_v20 = vshrl.u32 %v221_v38, 16  ;;  %v4600_v39 = vld [vmem:[%s4214_s30 + $0x44] sm:$0x1] }
  0x6b   : > { %v1903_v12 = vsel %vm4245_vm2, %v1901_v45, %v1902_v3  ;;  %v388_v52 = vrot.slane %v386_v49, 5  ;;  %v396_v53 = vshll.u32 %v222_v43, 16  ;;  %v3612_v54 = vrot.slane %v4459_v25, 9  ;;  %v4559_v25 = vld [vmem:[%s4214_s30 + $0x48] sm:$0xf] }
  0x6c   : > { %v375_v44 = vsel %vm4289_vm5, %v370_v47, %v374_v36  ;;  %v3755_v56 = vcombine.low %v1900_v13, %v1903_v12  ;;  %v383_v48 = vor.u32 %v382_v50, %v379_v46  ;;  %v392_v57 = vrot.slane %v390_v20, 4 }
  0x6d   : > { %v3645_v58 = vcombine.low %v365_v5, %v375_v44  ;;  %v398_v60 = vrot.slane %v396_v53, 5  ;;  %v1906_v61 = vrot.slane %v4472_v32, 5  ;;  %v1909_v62 = vrot.slane %v4494_v27, 5 }
  0x6e   : > { %2655 = vrot.lane.b32.xlu0 %v3755_v56, %s4129_s19  ;;  %v384_v63 = vrot.slane %v383_v48, 4  ;;  %v393_v2 = vor.u32 %v392_v57, %v388_v52  ;;  %v3486_v6 = vrot.slane %v220_v40, 9  ;;  %v728_v0 = vrot.slane %v221_v38, 5  ;;  %v3514_v38 = vld [vmem:[%s4214_s30 + $0x50] sm:$0x1] }
  0x6f   : > { %2099 = vrot.lane.b32.xlu1 %v3645_v58, %s4125_s7  ;;  %v1907_v8 = vsel %vm4245_vm2, %v3612_v54, %v1906_v61  ;;  %v1908_v11 = vrot.slane %v1906_v61, 4  ;;  %v731_v14 = vrot.slane %v222_v43, 5  ;;  %v3485_v32 = vrot.slane %v4510_v51, 9  ;;  %v4576_v51 = vld [vmem:[%s4214_s30 + $0x3c] sm:$0xf] }
  0x70   : > { %v389_v27 = vsel %vm4289_vm5, %v384_v63, %v388_v52  ;;  %v394_v15 = vrot.slane %v393_v2, 4  ;;  %v729_v16 = vsel %vm4245_vm2, %v3486_v6, %v728_v0  ;;  %v730_v19 = vrot.slane %v728_v0, 4  ;;  %v4609_v63 = vld [vmem:[%s4214_s30 + $0x54] sm:$0xf] }
  0x71   : > { %v1910_v22 = vsel %vm4245_vm2, %v1908_v11, %v1909_v62  ;;  %v721_v23 = vrot.slane %v4515_v59, 5  ;;  %v724_v24 = vrot.slane %v4522_v10, 5  ;;  %v976_v26 = vshrl.u32 %v4559_v25, 16 }
  0x72   : > { %v399_v28 = vsel %vm4289_vm5, %v394_v15, %v398_v60  ;;  %v3756_v29 = vcombine.low %v1907_v8, %v1910_v22  ;;  %v732_v40 = vsel %vm4245_vm2, %v730_v19, %v731_v14  ;;  %v979_v42 = vshll.u32 %v4559_v25, 16  ;;  %v4631_v22 = vld [vmem:[%s4214_s30 + $0x48] sm:$0xf] }
  0x73   : > { %v3646_v59 = vcombine.low %v389_v27, %v399_v28  ;;  %v3662_v30 = vcombine.low %v729_v16, %v732_v40  ;;  %v722_v10 = vsel %vm4245_vm2, %v3485_v32, %v721_v23  ;;  %v723_v31 = vrot.slane %v721_v23, 4  ;;  %v4622_v27 = vld [vmem:[%s4214_s30 + $0x58] sm:$0xf]  ;;  %v4634_v23 = vld [vmem:[%s4214_s30 + $0x4c] sm:$0xf] }
  0x74   : > { %2657 = vrot.lane.b32.xlu0 %v3756_v29, %s4129_s19  ;;  %v989_v33 = vshrl.u32 %v3513_v21, 16  ;;  %v3678_v34 = vcombine.low %v4559_v25, %v3513_v21  ;;  %v952_v35 = vshrl.u32 %v4576_v51, 16  ;;  %v955_v36 = vshll.u32 %v4576_v51, 16 }
  0x75   : > { %2101 = vrot.lane.b32.xlu1 %v3646_v59, %s4125_s7  ;;  %v725_v41 = vsel %vm4245_vm2, %v723_v31, %v724_v24  ;;  %v965_v1 = vshrl.u32 %v4584_v55, 16  ;;  %v3677_v3 = vcombine.low %v4576_v51, %v4584_v55  ;;  %v978_v18 = vrot.slane %v976_v26, 4  ;;  %v4644_v59 = vld [vmem:[%s4214_s30 + $0x5c] sm:$0x1] }
  0x76   : > { %v3661_v7 = vcombine.low %v722_v10, %v725_v41  ;;  %v981_v9 = vrot.slane %v979_v42, 5  ;;  %v985_v43 = vshll.u32 %v3513_v21, 16  ;;  %v991_v37 = vrot.slane %v989_v33, 4 }
  0x77   : > { %v995_v13 = vshll.u32 %v3514_v38, 16  ;;  %v954_v45 = vrot.slane %v952_v35, 4  ;;  %v957_v46 = vrot.slane %v955_v36, 5  ;;  %v961_v49 = vshll.u32 %v4584_v55, 16 }
  0x78   : > { %2179 = vrot.lane.b32.xlu0 %v3661_v7, %s4124_s6  ;;  %v982_v5 = vor.u32 %v981_v9, %v978_v18  ;;  %v987_v47 = vrot.slane %v985_v43, 5  ;;  %v967_v50 = vrot.slane %v965_v1, 4  ;;  %v971_v20 = vshll.u32 %v4600_v39, 16  ;;  %v4660_v1 = vld [vmem:[%s4214_s30 + $0x48] sm:$0xf] }
  0x79   : > { %2181 = vrot.lane.b32.xlu1 %v3662_v30, %s4124_s6  ;;  %v997_v12 = vrot.slane %v995_v13, 5  ;;  %v958_v52 = vor.u32 %v957_v46, %v954_v45  ;;  %v963_v53 = vrot.slane %v961_v49, 5  ;;  %v3550_v54 = vrot.slane %v4559_v25, 9  ;;  %v4665_v45 = vld [vmem:[%s4214_s30 + $0x4c] sm:$0xf] }
  0x7a   : > { %v983_v44 = vrot.slane %v982_v5, 4  ;;  %v992_v56 = vor.u32 %v991_v37, %v987_v47  ;;  %v973_v48 = vrot.slane %v971_v20, 5  ;;  %v1324_v57 = vrot.slane %v3513_v21, 5 }
  0x7b   : > { %v959_v58 = vrot.slane %v958_v52, 4  ;;  %v968_v60 = vor.u32 %v967_v50, %v963_v53  ;;  %v1327_v61 = vrot.slane %v3514_v38, 5  ;;  %v3549_v62 = vrot.slane %v4576_v51, 9 }
  0x7c   : > { %2259 = vrot.lane.b32.xlu0 %v3677_v3, %s4122_s4  ;;  %v988_v2 = vsel %vm4289_vm5, %v983_v44, %v987_v47  ;;  %v993_v6 = vrot.slane %v992_v56, 4  ;;  %v1325_v0 = vsel %vm4245_vm2, %v3550_v54, %v1324_v57  ;;  %v1326_v25 = vrot.slane %v1324_v57, 4 }
  0x7d   : > { %2261 = vrot.lane.b32.xlu1 %v3678_v34, %s4122_s4  ;;  %v964_v8 = vsel %vm4289_vm5, %v959_v58, %v963_v53  ;;  %v969_v11 = vrot.slane %v968_v60, 4  ;;  %v1317_v14 = vrot.slane %v4584_v55, 5  ;;  %v1320_v32 = vrot.slane %v4600_v39, 5  ;;  %v4653_v34 = vld [vmem:[%s4214_s30 + $0x50] sm:$0x1] }
  0x7e   : > { %v998_v15 = vsel %vm4289_vm5, %v993_v6, %v997_v12  ;;  %v1328_v16 = vsel %vm4245_vm2, %v1326_v25, %v1327_v61  ;;  %v1572_v19 = vshrl.u32 %v4609_v63, 16  ;;  %v1575_v21 = vshll.u32 %v4609_v63, 16  ;;  %v4672_v53 = vld [vmem:[%s4214_s30 + $0x50] sm:$0x1]  ;;  %v226_v25 = vld [vmem:[%s4214_s30 + $0x54] sm:$0xf] }
  0x7f   : > { %v3694_v24 = vcombine.low %v988_v2, %v998_v15  ;;  %v974_v26 = vsel %vm4289_vm5, %v969_v11, %v973_v48  ;;  %v3710_v51 = vcombine.low %v1325_v0, %v1328_v16  ;;  %v1318_v28 = vsel %vm4245_vm2, %v3549_v62, %v1317_v14 }
  0x80   : > { %v3693_v29 = vcombine.low %v964_v8, %v974_v26  ;;  %v1319_v40 = vrot.slane %v1317_v14, 4  ;;  %v1585_v42 = vshrl.u32 %v4622_v27, 16  ;;  %v3726_v55 = vcombine.low %v4609_v63, %v4622_v27 }
  0x81   : > { %2341 = vrot.lane.b32.xlu1 %v3694_v24, %s4126_s8  ;;  %v1548_v30 = vshrl.u32 %v4631_v22, 16  ;;  %v1551_v10 = vshll.u32 %v4631_v22, 16  ;;  %v1561_v31 = vshrl.u32 %v4634_v23, 16  ;;  %v3725_v33 = vcombine.low %v4631_v22, %v4634_v23  ;;  %v227_v24 = vld [vmem:[%s4214_s30 + $0x58] sm:$0xf] }
  0x82   : > { %2339 = vrot.lane.b32.xlu0 %v3693_v29, %s4126_s8  ;;  %v1321_v35 = vsel %vm4245_vm2, %v1319_v40, %v1320_v32  ;;  %v1574_v36 = vrot.slane %v1572_v19, 4  ;;  %v1577_v38 = vrot.slane %v1575_v21, 5  ;;  %v1581_v41 = vshll.u32 %v4622_v27, 16 }
  0x83   : > { %v3709_v3 = vcombine.low %v1318_v28, %v1321_v35  ;;  %v1587_v18 = vrot.slane %v1585_v42, 4  ;;  %v1591_v39 = vshll.u32 %v4644_v59, 16  ;;  %v1550_v7 = vrot.slane %v1548_v30, 4  ;;  %v228_v30 = vld [vmem:[%s4214_s30 + $0x5c] sm:$0x1] }
  0x84   : > { %v1578_v9 = vor.u32 %v1577_v38, %v1574_v36  ;;  %v1583_v43 = vrot.slane %v1581_v41, 5  ;;  %v1553_v37 = vrot.slane %v1551_v10, 5  ;;  %v1557_v13 = vshll.u32 %v4634_v23, 16 }
  0x85   : > { %2421 = vrot.lane.b32.xlu1 %v3710_v51, %s4123_s5  ;;  %v1593_v46 = vrot.slane %v1591_v39, 5  ;;  %v1563_v49 = vrot.slane %v1561_v31, 4  ;;  %v1567_v5 = vshll.u32 %v4653_v34, 16  ;;  %v401_v47 = vshrl.u32 %v4660_v1, 16 }
  0x86   : > { %2419 = vrot.lane.b32.xlu0 %v3709_v3, %s4123_s5  ;;  %v1579_v50 = vrot.slane %v1578_v9, 4  ;;  %v1588_v20 = vor.u32 %v1587_v18, %v1583_v43  ;;  %v1554_v12 = vor.u32 %v1553_v37, %v1550_v7  ;;  %v1559_v52 = vrot.slane %v1557_v13, 5 }
  0x87   : > { %v1569_v54 = vrot.slane %v1567_v5, 5  ;;  %v403_v44 = vrot.slane %v401_v47, 4  ;;  %v404_v56 = vshll.u32 %v4660_v1, 16  ;;  %v410_v48 = vshll.u32 %v4665_v45, 16 }
  0x88   : > { %v1584_v57 = vsel %vm4289_vm5, %v1579_v50, %v1583_v43  ;;  %v1589_v58 = vrot.slane %v1588_v20, 4  ;;  %v1555_v60 = vrot.slane %v1554_v12, 4  ;;  %v1564_v61 = vor.u32 %v1563_v49, %v1559_v52 }
  0x89   : > { %2501 = vrot.lane.b32.xlu1 %v3726_v55, %s4127_s9  ;;  %v406_v62 = vrot.slane %v404_v56, 5  ;;  %v412_v2 = vrot.slane %v410_v48, 5  ;;  %v414_v6 = vshrl.u32 %v4665_v45, 16  ;;  %v420_v0 = vshll.u32 %v4672_v53, 16 }
  0x8a   : > { %2499 = vrot.lane.b32.xlu0 %v3725_v33, %s4127_s9  ;;  %v1594_v8 = vsel %vm4289_vm5, %v1589_v58, %v1593_v46  ;;  %v1560_v11 = vsel %vm4289_vm5, %v1555_v60, %v1559_v52  ;;  %v1565_v14 = vrot.slane %v1564_v61, 4  ;;  %v3613_v32 = vrot.slane %v4631_v22, 9  ;;  %v4720_v58 = vld [vmem:[%s4214_s30 + $0x64] sm:$0xf] }
  0x8b   : > { %v3742_v15 = vcombine.low %v1584_v57, %v1594_v8  ;;  %v407_v16 = vor.u32 %v406_v62, %v403_v44  ;;  %v416_v19 = vrot.slane %v414_v6, 4  ;;  %v422_v21 = vrot.slane %v420_v0, 5 }
  0x8c   : > { %v1570_v26 = vsel %vm4289_vm5, %v1565_v14, %v1569_v54  ;;  %v1913_v51 = vrot.slane %v4634_v23, 5  ;;  %v1916_v28 = vrot.slane %v4653_v34, 5  ;;  %v425_v29 = vshrl.u32 %v226_v25, 16  ;;  %v4738_v14 = vld [vmem:[%s4214_s30 + $0x58] sm:$0xf] }
  0x8d   : > { %2581 = vrot.lane.b32.xlu1 %v3742_v15, %s4128_s10  ;;  %v3741_v40 = vcombine.low %v1560_v11, %v1570_v26  ;;  %v408_v42 = vrot.slane %v407_v16, 4  ;;  %v417_v55 = vor.u32 %v416_v19, %v412_v2  ;;  %v428_v22 = vshll.u32 %v226_v25, 16  ;;  %v3520_v26 = vld [vmem:[%s4214_s30 + $0x68] sm:$0x1] }
  0x8e   : > { %v1914_v10 = vsel %vm4245_vm2, %v3613_v32, %v1913_v51  ;;  %v1915_v31 = vrot.slane %v1913_v51, 4  ;;  %v427_v33 = vrot.slane %v425_v29, 4  ;;  %v434_v35 = vshll.u32 %v227_v24, 16 }
  0x8f   : > { %2579 = vrot.lane.b32.xlu0 %v3741_v40, %s4128_s10  ;;  %v413_v23 = vsel %vm4289_vm5, %v408_v42, %v412_v2  ;;  %v418_v34 = vrot.slane %v417_v55, 4  ;;  %v430_v36 = vrot.slane %v428_v22, 5  ;;  %v438_v38 = vshrl.u32 %v227_v24, 16  ;;  %v4728_v2 = vld [vmem:[%s4214_s30 + $0x54] sm:$0xf] }
  0x90   : > { %v1917_v41 = vsel %vm4245_vm2, %v1915_v31, %v1916_v28  ;;  %v436_v3 = vrot.slane %v434_v35, 5  ;;  %v444_v18 = vshll.u32 %v228_v30, 16  ;;  %v3614_v39 = vrot.slane %v4609_v63, 9  ;;  %v4709_v63 = vld [vmem:[%s4214_s30 + $0x60] sm:$0xf] }
  0x91   : > { %v423_v7 = vsel %vm4289_vm5, %v418_v34, %v422_v21  ;;  %v3757_v9 = vcombine.low %v1914_v10, %v1917_v41  ;;  %v431_v43 = vor.u32 %v430_v36, %v427_v33  ;;  %v440_v37 = vrot.slane %v438_v38, 4  ;;  %v4758_v55 = vld [vmem:[%s4214_s30 + $0x5c] sm:$0x1] }
  0x92   : > { %v3647_v13 = vcombine.low %v413_v23, %v423_v7  ;;  %v446_v46 = vrot.slane %v444_v18, 5  ;;  %v1920_v49 = vrot.slane %v4622_v27, 5  ;;  %v1923_v5 = vrot.slane %v4644_v59, 5  ;;  %v4730_v6 = vpop.permute.xlu1 %2253 }
  0x93   : > { %2659 = vrot.lane.b32.xlu0 %v3757_v9, %s4129_s19  ;;  %v432_v47 = vrot.slane %v431_v43, 4  ;;  %v441_v50 = vor.u32 %v440_v37, %v436_v3  ;;  %v3488_v20 = vrot.slane %v226_v25, 9  ;;  %v742_v12 = vrot.slane %v227_v24, 5  ;;  %v4749_v51 = vpop.permute.xlu0 %2251 }
  0x94   : > { %2103 = vrot.lane.b32.xlu1 %v3647_v13, %s4125_s7  ;;  %v1921_v52 = vsel %vm4245_vm2, %v3614_v39, %v1920_v49  ;;  %v1922_v54 = vrot.slane %v1920_v49, 4  ;;  %v745_v44 = vrot.slane %v228_v30, 5  ;;  %v3487_v27 = vrot.slane %v4660_v1, 9 }
  0x95   : > { %v437_v59 = vsel %vm4289_vm5, %v432_v47, %v436_v3  ;;  %v442_v56 = vrot.slane %v441_v50, 4  ;;  %v743_v48 = vsel %vm4245_vm2, %v3488_v20, %v742_v12  ;;  %v744_v57 = vrot.slane %v742_v12, 4 }
  0x96   : > { %v1924_v60 = vsel %vm4245_vm2, %v1922_v54, %v1923_v5  ;;  %v735_v61 = vrot.slane %v4665_v45, 5  ;;  %v738_v62 = vrot.slane %v4672_v53, 5  ;;  %v1024_v1 = vshrl.u32 %v4709_v63, 16 }
  0x97   : > { %v447_v0 = vsel %vm4289_vm5, %v442_v56, %v446_v46  ;;  %v3758_v25 = vcombine.low %v1921_v52, %v1924_v60  ;;  %v746_v8 = vsel %vm4245_vm2, %v744_v57, %v745_v44  ;;  %v1027_v11 = vshll.u32 %v4709_v63, 16  ;;  %v4773_v52 = vld [vmem:[%s4214_s30 + $0x6c] sm:$0xf]  ;;  %v4788_v60 = vld [vmem:[%s4214_s30 + $0x70] sm:$0xf] }
  0x98   : > { %v3648_v45 = vcombine.low %v437_v59, %v447_v0  ;;  %v3664_v53 = vcombine.low %v743_v48, %v746_v8  ;;  %v736_v32 = vsel %vm4245_vm2, %v3487_v27, %v735_v61  ;;  %v737_v15 = vrot.slane %v735_v61, 4  ;;  %v4797_v0 = vld [vmem:[%s4214_s30 + $0x60] sm:$0xf] }
  0x99   : > { %2661 = vrot.lane.b32.xlu0 %v3758_v25, %s4129_s19  ;;  %v1037_v16 = vshrl.u32 %v4720_v58, 16  ;;  %v3680_v19 = vcombine.low %v4709_v63, %v4720_v58  ;;  %v1000_v21 = vshrl.u32 %v4728_v2, 16  ;;  %v1003_v24 = vshll.u32 %v4728_v2, 16  ;;  %v4800_v25 = vld [vmem:[%s4214_s30 + $0x64] sm:$0xf] }
  0x9a   : > { %2105 = vrot.lane.b32.xlu1 %v3648_v45, %s4125_s7  ;;  %v739_v28 = vsel %vm4245_vm2, %v737_v15, %v738_v62  ;;  %v1013_v29 = vshrl.u32 %v4738_v14, 16  ;;  %v3679_v40 = vcombine.low %v4728_v2, %v4738_v14  ;;  %v1026_v42 = vrot.slane %v1024_v1, 4  ;;  %v4769_v5 = vpop.permute.xlu0 %2411 }
  0x9b   : > { %v3663_v30 = vcombine.low %v736_v32, %v739_v28  ;;  %v1029_v22 = vrot.slane %v1027_v11, 5  ;;  %v1033_v10 = vshll.u32 %v4720_v58, 16  ;;  %v1039_v31 = vrot.slane %v1037_v16, 4 }
  0x9c   : > { %v1043_v33 = vshll.u32 %v3520_v26, 16  ;;  %v1002_v35 = vrot.slane %v1000_v21, 4  ;;  %v1005_v23 = vrot.slane %v1003_v24, 5  ;;  %v1009_v34 = vshll.u32 %v4738_v14, 16  ;;  %v4762_v36 = vpop.permute.xlu1 %2171 }
  0x9d   : > { %2183 = vrot.lane.b32.xlu0 %v3663_v30, %s4124_s6  ;;  %v1030_v38 = vor.u32 %v1029_v22, %v1026_v42  ;;  %v1035_v41 = vrot.slane %v1033_v10, 5  ;;  %v1015_v3 = vrot.slane %v1013_v29, 4  ;;  %v1019_v18 = vshll.u32 %v4758_v55, 16  ;;  %v4825_v10 = vld [vmem:[%s4214_s30 + $0x68] sm:$0x1] }
  0x9e   : > { %2185 = vrot.lane.b32.xlu1 %v3664_v53, %s4124_s6  ;;  %v1045_v39 = vrot.slane %v1043_v33, 5  ;;  %v1006_v7 = vor.u32 %v1005_v23, %v1002_v35  ;;  %v1011_v9 = vrot.slane %v1009_v34, 5  ;;  %v3552_v43 = vrot.slane %v4709_v63, 9 }
  0x9f   : > { %v1031_v37 = vrot.slane %v1030_v38, 4  ;;  %v1040_v13 = vor.u32 %v1039_v31, %v1035_v41  ;;  %v1021_v46 = vrot.slane %v1019_v18, 5  ;;  %v1338_v49 = vrot.slane %v4720_v58, 5  ;;  %v4830_v18 = vld [vmem:[%s4214_s30 + $0x60] sm:$0xf] }
  0xa0   : > { %v1007_v47 = vrot.slane %v1006_v7, 4  ;;  %v1016_v50 = vor.u32 %v1015_v3, %v1011_v9  ;;  %v1341_v20 = vrot.slane %v3520_v26, 5  ;;  %v3551_v12 = vrot.slane %v4728_v2, 9  ;;  %v4775_v54 = vpop.permute.xlu1 %2173 }
  0xa1   : > { %2263 = vrot.lane.b32.xlu0 %v3679_v40, %s4122_s4  ;;  %v1036_v63 = vsel %vm4289_vm5, %v1031_v37, %v1035_v41  ;;  %v1041_v44 = vrot.slane %v1040_v13, 4  ;;  %v1339_v27 = vsel %vm4245_vm2, %v3552_v43, %v1338_v49  ;;  %v1340_v59 = vrot.slane %v1338_v49, 4  ;;  %v3983_v43 = vld [vmem:[%s4214_s30] sm:$0xf]  ;;  %v3984_v37 = vld [vmem:[%s4214_s30 + $0x4] sm:$0xf] }
  0xa2   : > { %2265 = vrot.lane.b32.xlu1 %v3680_v19, %s4122_s4  ;;  %v1012_v56 = vsel %vm4289_vm5, %v1007_v47, %v1011_v9  ;;  %v1017_v48 = vrot.slane %v1016_v50, 4  ;;  %v1331_v57 = vrot.slane %v4738_v14, 5  ;;  %v1334_v58 = vrot.slane %v4758_v55, 5  ;;  %v4810_v19 = vld [vmem:[%s4214_s30 + $0x74] sm:$0x1] }
  0xa3   : > { %v1046_v61 = vsel %vm4289_vm5, %v1041_v44, %v1045_v39  ;;  %v1342_v62 = vsel %vm4245_vm2, %v1340_v59, %v1341_v20  ;;  %v1620_v1 = vshrl.u32 %v4773_v52, 16  ;;  %v1623_v2 = vshll.u32 %v4773_v52, 16 }
  0xa4   : > { %v3696_v8 = vcombine.low %v1036_v63, %v1046_v61  ;;  %v1022_v11 = vsel %vm4289_vm5, %v1017_v48, %v1021_v46  ;;  %v3712_v14 = vcombine.low %v1339_v27, %v1342_v62  ;;  %v1332_v45 = vsel %vm4245_vm2, %v3551_v12, %v1331_v57  ;;  %v4812_v24 = vpop.permute.xlu1 %2413  ;;  %v4838_v12 = vld [vmem:[%s4214_s30 + $0x64] sm:$0xf]  ;;  %v4848_v61 = vld [vmem:[%s4214_s30 + $0x68] sm:$0x1] }
  0xa5   : > { %v3695_v53 = vcombine.low %v1012_v56, %v1022_v11  ;;  %v1333_v32 = vrot.slane %v1331_v57, 4  ;;  %v1633_v15 = vshrl.u32 %v4788_v60, 16  ;;  %v3728_v16 = vcombine.low %v4773_v52, %v4788_v60  ;;  %v2092_v21 = vpop.permute.xlu0 %2091 }
  0xa6   : > { %2345 = vrot.lane.b32.xlu1 %v3696_v8, %s4126_s8  ;;  %v1596_v26 = vshrl.u32 %v4797_v0, 16  ;;  %v1599_v28 = vshll.u32 %v4797_v0, 16  ;;  %v1609_v29 = vshrl.u32 %v4800_v25, 16  ;;  %v3727_v40 = vcombine.low %v4797_v0, %v4800_v25 }
  0xa7   : > { %2343 = vrot.lane.b32.xlu0 %v3695_v53, %s4126_s8  ;;  %v1335_v42 = vsel %vm4245_vm2, %v1333_v32, %v1334_v58  ;;  %v1622_v55 = vrot.slane %v1620_v1, 4  ;;  %v1625_v30 = vrot.slane %v1623_v2, 5  ;;  %v1629_v22 = vshll.u32 %v4788_v60, 16 }
  0xa8   : > { %v3711_v31 = vcombine.low %v1332_v45, %v1335_v42  ;;  %v1635_v33 = vrot.slane %v1633_v15, 4  ;;  %v1639_v35 = vshll.u32 %v4810_v19, 16  ;;  %v1598_v23 = vrot.slane %v1596_v26, 4  ;;  %v4872_v42 = vld [vmem:[%s4214_s30 + $0x6c] sm:$0xf] }
  0xa9   : > { %v1626_v34 = vor.u32 %v1625_v30, %v1622_v55  ;;  %v1631_v38 = vrot.slane %v1629_v22, 5  ;;  %v1601_v41 = vrot.slane %v1599_v28, 5  ;;  %v1605_v3 = vshll.u32 %v4800_v25, 16 }
  0xaa   : > { %2425 = vrot.lane.b32.xlu1 %v3712_v14, %s4123_s5  ;;  %v1641_v39 = vrot.slane %v1639_v35, 5  ;;  %v1611_v7 = vrot.slane %v1609_v29, 4  ;;  %v1615_v9 = vshll.u32 %v4825_v10, 16  ;;  %v3625_v13 = vcombine.low %v3983_v43, %v3984_v37  ;;  %v2094_v46 = vpop.permute.xlu0 %2093  ;;  %v4892_v37 = vld [vmem:[%s4214_s30 + $0x74] sm:$0x1] }
  0xab   : > { %2423 = vrot.lane.b32.xlu0 %v3711_v31, %s4123_s5  ;;  %v1627_v49 = vrot.slane %v1626_v34, 4  ;;  %v1636_v47 = vor.u32 %v1635_v33, %v1631_v38  ;;  %v1602_v50 = vor.u32 %v1601_v41, %v1598_v23  ;;  %v1607_v20 = vrot.slane %v1605_v3, 5  ;;  %v4840_v63 = vpop.permute.xlu1 %2333  ;;  %v4877_v33 = vld [vmem:[%s4214_s30 + $0x70] sm:$0xf] }
  0xac   : > { %v1617_v44 = vrot.slane %v1615_v9, 5  ;;  %v449_v27 = vshrl.u32 %v4830_v18, 16  ;;  %v2686_v58 = vsel %vm2683_vm6, %v3625_v13, %v2092_v21  ;;  %v452_v1 = vshll.u32 %v4830_v18, 16 }
  0xad   : > { %v1632_v59 = vsel %vm4289_vm5, %v1627_v49, %v1631_v38  ;;  %v1637_v56 = vrot.slane %v1636_v47, 4  ;;  %v1603_v48 = vrot.slane %v1602_v50, 4  ;;  %v1612_v57 = vor.u32 %v1611_v7, %v1607_v20  ;;  %v3986_v38 = vld [vmem:[%s4214_s30 + $0x10] sm:$0xf] }
  0xae   : > { %2505 = vrot.lane.b32.xlu1 %v3728_v16, %s4127_s9  ;;  %v451_v62 = vrot.slane %v449_v27, 4  ;;  %v458_v2 = vshll.u32 %v4838_v12, 16  ;;  %v4852_v8 = vpop.permute.xlu0 %2331  ;;  %v4861_v53 = vsel %vm2732_vm7, %v2686_v58, %v4762_v36  ;;  %v454_v15 = vrot.slane %v452_v1, 5 }
  0xaf   : > { %2503 = vrot.lane.b32.xlu0 %v3727_v40, %s4127_s9  ;;  %v1642_v11 = vsel %vm4289_vm5, %v1637_v56, %v1641_v39  ;;  %v1608_v14 = vsel %vm4289_vm5, %v1603_v48, %v1607_v20  ;;  %v1613_v45 = vrot.slane %v1612_v57, 4  ;;  %v462_v21 = vshrl.u32 %v4838_v12, 16  ;;  %v4864_v26 = vpop.permute.xlu1 %2493 }
  0xb0   : > { %v3744_v32 = vcombine.low %v1632_v59, %v1642_v11  ;;  %v460_v16 = vrot.slane %v458_v2, 5  ;;  %v468_v29 = vshll.u32 %v4848_v61, 16  ;;  %v3615_v40 = vrot.slane %v4797_v0, 9 }
  0xb1   : > { %v1618_v28 = vsel %vm4289_vm5, %v1613_v45, %v1617_v44  ;;  %v1927_v36 = vrot.slane %v4800_v25, 5  ;;  %v455_v30 = vor.u32 %v454_v15, %v451_v62  ;;  %v464_v22 = vrot.slane %v462_v21, 4  ;;  %v3985_v25 = vld [vmem:[%s4214_s30 + $0xc] sm:$0xf] }
  0xb2   : > { %2585 = vrot.lane.b32.xlu1 %v3744_v32, %s4128_s10  ;;  %v3743_v55 = vcombine.low %v1608_v14, %v1618_v28  ;;  %v1930_v31 = vrot.slane %v4825_v10, 5  ;;  %v4879_v35 = vpop.permute.xlu0 %2491  ;;  %v470_v23 = vrot.slane %v468_v29, 5  ;;  %v3626_v41 = vcombine.low %v3985_v25, %v3986_v38  ;;  %v4952_v38 = vld [vmem:[%s4214_s30 + $0x6c] sm:$0xf] }
  0xb3   : > { %v1928_v0 = vsel %vm4245_vm2, %v3615_v40, %v1927_v36  ;;  %v1929_v34 = vrot.slane %v1927_v36, 4  ;;  %v456_v3 = vrot.slane %v455_v30, 4  ;;  %v465_v39 = vor.u32 %v464_v22, %v460_v16 }
  0xb4   : > { %2583 = vrot.lane.b32.xlu0 %v3743_v55, %s4128_s10  ;;  %v473_v7 = vshrl.u32 %v4872_v42, 16  ;;  %v476_v10 = vshll.u32 %v4872_v42, 16  ;;  %v2689_v43 = vsel %vm2683_vm6, %v3626_v41, %v2094_v46  ;;  %v482_v13 = vshll.u32 %v4877_v33, 16 }
  0xb5   : > { %v1931_v9 = vsel %vm4245_vm2, %v1929_v34, %v1930_v31  ;;  %v486_v49 = vshrl.u32 %v4877_v33, 16  ;;  %v461_v47 = vsel %vm4289_vm5, %v456_v3, %v460_v16  ;;  %v466_v50 = vrot.slane %v465_v39, 4  ;;  %v4961_v39 = vld [vmem:[%s4214_s30 + $0x70] sm:$0xf] }
  0xb6   : > { %v3759_v20 = vcombine.low %v1928_v0, %v1931_v9  ;;  %v2736_v44 = vsel %vm2732_vm7, %v2689_v43, %v4775_v54  ;;  %v4900_v27 = vpop.permute.xlu1 %2573  ;;  %v475_v59 = vrot.slane %v473_v7, 4  ;;  %v478_v56 = vrot.slane %v476_v10, 5 }
  0xb7   : > { %v484_v48 = vrot.slane %v482_v13, 5  ;;  %v488_v46 = vrot.slane %v486_v49, 4  ;;  %v4902_v57 = vpop.permute.xlu0 %2571  ;;  %v471_v58 = vsel %vm4289_vm5, %v466_v50, %v470_v23  ;;  %v492_v62 = vshll.u32 %v4892_v37, 16 }
  0xb8   : > { %2663 = vrot.lane.b32.xlu0 %v3759_v20, %s4129_s19  ;;  %v3616_v1 = vrot.slane %v4773_v52, 9  ;;  %v1934_v2 = vrot.slane %v4788_v60, 5  ;;  %v3649_v54 = vcombine.low %v461_v47, %v471_v58  ;;  %v479_v11 = vor.u32 %v478_v56, %v475_v59  ;;  %v4978_v47 = vld [vmem:[%s4214_s30 + $0x80] sm:$0x1] }
  0xb9   : > { %v489_v14 = vor.u32 %v488_v46, %v484_v48  ;;  %v1937_v45 = vrot.slane %v4810_v19, 5  ;;  %v494_v32 = vrot.slane %v492_v62, 5  ;;  %v2769_v52 = vsel %vm2765_vm8, %v2736_v44, %v4730_v6 }
  0xba   : > { %v1935_v15 = vsel %vm4245_vm2, %v3616_v1, %v1934_v2  ;;  %v1936_v16 = vrot.slane %v1934_v2, 4  ;;  %2107 = vrot.lane.b32.xlu1 %v3649_v54, %s4125_s7  ;;  %v480_v21 = vrot.slane %v479_v11, 4  ;;  %v2802_v29 = vsel %vm2798_vm9, %v2769_v52, %v4840_v63 }
  0xbb   : > { %v490_v28 = vrot.slane %v489_v14, 4  ;;  %v4916_v60 = vpop.permute.xlu0 %2651  ;;  %v2767_v40 = vsel %vm2765_vm8, %v4861_v53, %v4749_v51  ;;  %v3490_v36 = vrot.slane %v4872_v42, 9  ;;  %v756_v23 = vrot.slane %v4877_v33, 5  ;;  %v4938_v42 = vld [vmem:[%s4214_s30 + $0x78] sm:$0xf] }
  0xbc   : > { %v1938_v19 = vsel %vm4245_vm2, %v1936_v16, %v1937_v45  ;;  %v4926_v55 = vpop.permute.xlu1 %2095  ;;  %v485_v6 = vsel %vm4289_vm5, %v480_v21, %v484_v48  ;;  %v2800_v31 = vsel %vm2798_vm9, %v2767_v40, %v4852_v8  ;;  %v759_v51 = vrot.slane %v4892_v37, 5  ;;  %v4944_v8 = vld [vmem:[%s4214_s30 + $0x7c] sm:$0xf]  ;;  %v3955_v16 = vld [vmem:[%s6051_s1 + $0x10] ss:$0 sps:$4 sm:$0x33]  }
  0xbd   : > { %v495_v30 = vsel %vm4289_vm5, %v490_v28, %v494_v32  ;;  %v3760_v22 = vcombine.low %v1935_v15, %v1938_v19  ;;  %v3489_v53 = vrot.slane %v4830_v18, 9  ;;  %v749_v0 = vrot.slane %v4838_v12, 5  ;;  %3859 = vmatprep.subr.msk.bf16.mxu0 %vm3016_vm13, %v3955_v16  ;;  %3860 = vmatprep.subr.msk.bf16.mxu1 %vm3016_vm13, %v3955_v16 }
  0xbe   : > { %v3650_v63 = vcombine.low %v485_v6, %v495_v30  ;;  %v752_v34 = vrot.slane %v4848_v61, 5  ;;  %v757_v33 = vsel %vm4245_vm2, %v3490_v36, %v756_v23  ;;  %v758_v25 = vrot.slane %v756_v23, 4 }
  0xbf   : > { %2665 = vrot.lane.b32.xlu0 %v3760_v22, %s4129_s19  ;;  %v2835_v18 = vsel %vm2831_vm10, %v2802_v29, %v4812_v24  ;;  %v750_v12 = vsel %vm4245_vm2, %v3489_v53, %v749_v0  ;;  %v751_v61 = vrot.slane %v749_v0, 4  ;;  %v2833_v3 = vsel %vm2831_vm10, %v2800_v31, %v4769_v5  ;;  %v3987_v22 = vld [vmem:[%s4214_s30 + $0x18] sm:$0xf]  ;;  %v3988_v31 = vld [vmem:[%s4214_s30 + $0x1c] sm:$0xf] }
  0xc0   : > { %2109 = vrot.lane.b32.xlu1 %v3650_v63, %s4125_s7  ;;  %v2868_v41 = vsel %vm2864_vm11, %v2835_v18, %v4864_v26  ;;  %v760_v24 = vsel %vm4245_vm2, %v758_v25, %v759_v51  ;;  %v1072_v10 = vshrl.u32 %v4938_v42, 16  ;;  %v1075_v9 = vshll.u32 %v4938_v42, 16 }
  0xc1   : > { %v4963_v7 = vpop.permute.xlu0 %2653  ;;  %v1085_v43 = vshrl.u32 %v4944_v8, 16  ;;  %v3666_v26 = vcombine.low %v757_v33, %v760_v24  ;;  %v753_v5 = vsel %vm4245_vm2, %v751_v61, %v752_v34  ;;  %v2866_v13 = vsel %vm2864_vm11, %v2833_v3, %v4879_v35  ;;  %v4987_v35 = vld [vmem:[%s4214_s30 + $0x74] sm:$0x1] }
  0xc2   : > { %v4970_v37 = vpop.permute.xlu1 %2097  ;;  %v1048_v49 = vshrl.u32 %v4952_v38, 16  ;;  %v3665_v50 = vcombine.low %v750_v12, %v753_v5  ;;  %v3682_v20 = vcombine.low %v4938_v42, %v4944_v8  ;;  %v1051_v44 = vshll.u32 %v4952_v38, 16 }
  0xc3   : > { %v1061_v59 = vshrl.u32 %v4961_v39, 16  ;;  %v1074_v56 = vrot.slane %v1072_v10, 4  ;;  %v1077_v48 = vrot.slane %v1075_v9, 5  ;;  %v1081_v46 = vshll.u32 %v4944_v8, 16 }
  0xc4   : > { %2189 = vrot.lane.b32.xlu1 %v3666_v26, %s4124_s6  ;;  %2187 = vrot.lane.b32.xlu0 %v3665_v50, %s4124_s6  ;;  %v3681_v62 = vcombine.low %v4952_v38, %v4961_v39  ;;  %v4996_v1 = vsel %vm2897_vm12, %v2868_v41, %v4900_v27  ;;  %v1087_v2 = vrot.slane %v1085_v43, 4  ;;  %v1091_v54 = vshll.u32 %v4978_v47, 16  ;;  %v5033_v43 = vld [vmem:[%s4214_s30 + $0x84] sm:$0xf] }
  0xc5   : > { %v4989_v58 = vpop.permute.xlu0 %2175  ;;  %v1078_v14 = vor.u32 %v1077_v48, %v1074_v56  ;;  %v1083_v45 = vrot.slane %v1081_v46, 5  ;;  %v1050_v32 = vrot.slane %v1048_v49, 4  ;;  %v1053_v15 = vrot.slane %v1051_v44, 5  ;;  %v5053_v44 = vld [vmem:[%s4214_s30 + $0x78] sm:$0xf] }
  0xc6   : > { %v4999_v11 = vpop.permute.xlu1 %2177  ;;  %v2899_v21 = vsel %vm2897_vm12, %v2866_v13, %v4902_v57  ;;  %v1057_v27 = vshll.u32 %v4961_v39, 16  ;;  %v1063_v28 = vrot.slane %v1061_v59, 4  ;;  %v1067_v52 = vshll.u32 %v4987_v35, 16 }
  0xc7   : > { %v1079_v19 = vrot.slane %v1078_v14, 4  ;;  %v1088_v29 = vor.u32 %v1087_v2, %v1083_v45  ;;  %v1093_v40 = vrot.slane %v1091_v54, 5  ;;  %v1054_v36 = vor.u32 %v1053_v15, %v1050_v32  ;;  %v3990_v2 = vld [vmem:[%s4214_s30 + $0x28] sm:$0xf] }
  0xc8   : > { %2269 = vrot.lane.b32.xlu1 %v3682_v20, %s4122_s4  ;;  %2267 = vrot.lane.b32.xlu0 %v3681_v62, %s4122_s4  ;;  %v1059_v30 = vrot.slane %v1057_v27, 5  ;;  %v3627_v63 = vcombine.low %v3987_v22, %v3988_v31  ;;  %v3554_v57 = vrot.slane %v4938_v42, 9  ;;  %v1069_v34 = vrot.slane %v1067_v52, 5  ;;  %v5050_v20 = vld [vmem:[%s4214_s30 + $0x88] sm:$0xf] }
  0xc9   : > { %v5009_v6 = vpop.permute.xlu0 %2255  ;;  %v1084_v51 = vsel %vm4289_vm5, %v1079_v19, %v1083_v45  ;;  %v1089_v53 = vrot.slane %v1088_v29, 4  ;;  %v1055_v0 = vrot.slane %v1054_v36, 4  ;;  %v1352_v25 = vrot.slane %v4944_v8, 5  ;;  %v3989_v62 = vld [vmem:[%s4214_s30 + $0x24] sm:$0xf] }
  0xca   : > { %v5015_v23 = vpop.permute.xlu1 %2257  ;;  %v1064_v33 = vor.u32 %v1063_v28, %v1059_v30  ;;  %v1355_v18 = vrot.slane %v4978_v47, 5  ;;  %v3553_v42 = vrot.slane %v4952_v38, 9  ;;  %v1345_v41 = vrot.slane %v4961_v39, 5  ;;  %v5077_v27 = vld [vmem:[%s4214_s30 + $0x8c] sm:$0x1] }
  0xcb   : > { %v1094_v12 = vsel %vm4289_vm5, %v1089_v53, %v1093_v40  ;;  %v1060_v61 = vsel %vm4289_vm5, %v1055_v0, %v1059_v30  ;;  %v1348_v3 = vrot.slane %v4987_v35, 5  ;;  %v1353_v8 = vsel %vm4245_vm2, %v3554_v57, %v1352_v25  ;;  %v5060_v35 = vld [vmem:[%s4214_s30 + $0x7c] sm:$0xf]  ;;  %v5094_v22 = vld [vmem:[%s4214_s30 + $0x80] sm:$0x1] }
  0xcc   : > { %v3698_v24 = vcombine.low %v1084_v51, %v1094_v12  ;;  %v1065_v10 = vrot.slane %v1064_v33, 4  ;;  %v1354_v9 = vrot.slane %v1352_v25, 4  ;;  %v1346_v26 = vsel %vm4245_vm2, %v3553_v42, %v1345_v41  ;;  %v5102_v33 = vld [vmem:[%s4214_s30 + $0x78] sm:$0xf] }
  0xcd   : > { %v1347_v5 = vrot.slane %v1345_v41, 4  ;;  %v2932_v47 = vsel %vm2930_vm14, %v2899_v21, %v4916_v60  ;;  %v3018_v50 = vsel %vm3016_vm13, %v3955_v16, 0  ;;  %v1668_v46 = vshrl.u32 %v5033_v43, 16  ;;  %v5111_v41 = vld [vmem:[%s4214_s30 + $0x7c] sm:$0xf] }
  0xce   : > { %v5035_v38 = vpop.permute.xlu1 %2337  ;;  %2349 = vrot.lane.b32.xlu1 %v3698_v24, %s4126_s8  ;;  %v1070_v13 = vsel %vm4289_vm5, %v1065_v10, %v1069_v34  ;;  %v1356_v49 = vsel %vm4245_vm2, %v1354_v9, %v1355_v18  ;;  %3821 = vmatprep.mubr.msk.bf16.mxu0 %vm2983_vm15, %v2932_v47  ;;  %v2692_v60 = vsel %vm2683_vm6, %v3627_v63, %v4926_v55  ;;  %v1671_v45 = vshll.u32 %v5033_v43, 16 }
  0xcf   : > { %v5039_v39 = vpop.permute.xlu0 %2335  ;;  %v3697_v59 = vcombine.low %v1060_v61, %v1070_v13  ;;  %v3714_v56 = vcombine.low %v1353_v8, %v1356_v49  ;;  %v1349_v48 = vsel %vm4245_vm2, %v1347_v5, %v1348_v3  ;;  %3820 = vmatpush3.bf16.msra.mxu0 %v3018_v50  ;;  %v3628_v54 = vcombine.low %v3989_v62, %v3990_v2  ;;  %v5116_v5 = vld [vmem:[%s4214_s30 + $0x80] sm:$0x1] }
  0xd0   : > { %v2934_v14 = vsel %vm2930_vm14, %v4996_v1, %v4963_v7  ;;  %3858 = vmatpush3.bf16.msra.mxu1 %v3018_v50  ;;  %v3713_v15 = vcombine.low %v1346_v26, %v1349_v48  ;;  %v1681_v16 = vshrl.u32 %v5050_v20, 16  ;;  %v1644_v55 = vshrl.u32 %v5053_v44, 16 }
  0xd1   : > { %2347 = vrot.lane.b32.xlu0 %v3697_v59, %s4126_s8  ;;  %v1647_v21 = vshll.u32 %v5053_v44, 16  ;;  %v2695_v7 = vsel %vm2683_vm6, %v3628_v54, %v4970_v37  ;;  %v3730_v1 = vcombine.low %v5033_v43, %v5050_v20  ;;  %v1657_v52 = vshrl.u32 %v5060_v35, 16 }
  0xd2   : > { %v5070_v32 = vpop.permute.xlu1 %2417  ;;  %2429 = vrot.lane.b32.xlu1 %v3714_v56, %s4123_s5  ;;  %v3729_v19 = vcombine.low %v5053_v44, %v5060_v35  ;;  %3822 = vmatmul.mubr.msk.bf16.vlgmr.msra.gmra.mrb[0].mxu0 %vm2983_vm15, %v2934_v14  ;;  %v2738_v29 = vsel %vm2732_vm7, %v2692_v60, %v4989_v58  ;;  %v1670_v40 = vrot.slane %v1668_v46, 4  ;;  %v1673_v36 = vrot.slane %v1671_v45, 5 }
  0xd3   : > { %v5079_v28 = vpop.permute.xlu0 %2415  ;;  %v1677_v30 = vshll.u32 %v5050_v20, 16  ;;  %v1683_v37 = vrot.slane %v1681_v16, 4  ;;  %v1687_v31 = vshll.u32 %v5077_v27, 16  ;;  %v1646_v63 = vrot.slane %v1644_v55, 4 }
  0xd4   : > { %v1649_v57 = vrot.slane %v1647_v21, 5  ;;  %v1674_v53 = vor.u32 %v1673_v36, %v1670_v40  ;;  %v1653_v58 = vshll.u32 %v5060_v35, 16  ;;  %v1659_v34 = vrot.slane %v1657_v52, 4  ;;  %v239_v36 = vld [vmem:[%s4214_s30 + $0x88] sm:$0xf] }
  0xd5   : > { %2427 = vrot.lane.b32.xlu0 %v3713_v15, %s4123_s5  ;;  %v1679_v0 = vrot.slane %v1677_v30, 5  ;;  %v2740_v18 = vsel %vm2732_vm7, %v2695_v7, %v4999_v11  ;;  %v1689_v42 = vrot.slane %v1687_v31, 5  ;;  %v1663_v61 = vshll.u32 %v5094_v22, 16  ;;  %v238_v7 = vld [vmem:[%s4214_s30 + $0x84] sm:$0xf] }
  0xd6   : > { %v5097_v51 = vpop.permute.xlu1 %2497  ;;  %2509 = vrot.lane.b32.xlu1 %v3730_v1, %s4127_s9  ;;  %v1650_v12 = vor.u32 %v1649_v57, %v1646_v63  ;;  %v1675_v3 = vrot.slane %v1674_v53, 4  ;;  %v1655_v10 = vrot.slane %v1653_v58, 5  ;;  %v2773_v8 = vsel %vm2765_vm8, %v2740_v18, %v5015_v23  ;;  %v240_v57 = vld [vmem:[%s4214_s30 + $0x8c] sm:$0x1] }
  0xd7   : > { %v5104_v25 = vpop.permute.xlu0 %2495  ;;  %v1684_v24 = vor.u32 %v1683_v37, %v1679_v0  ;;  %v1665_v26 = vrot.slane %v1663_v61, 5  ;;  %v497_v13 = vshrl.u32 %v5102_v33, 16  ;;  %v500_v11 = vshll.u32 %v5102_v33, 16 }
  0xd8   : > { %v1651_v9 = vrot.slane %v1650_v12, 4  ;;  %v1680_v49 = vsel %vm4289_vm5, %v1675_v3, %v1679_v0  ;;  %v1660_v50 = vor.u32 %v1659_v34, %v1655_v10  ;;  %v506_v59 = vshll.u32 %v5111_v41, 16 }
  0xd9   : > { %2507 = vrot.lane.b32.xlu0 %v3729_v19, %s4127_s9  ;;  %v1685_v47 = vrot.slane %v1684_v24, 4  ;;  %v499_v48 = vrot.slane %v497_v13, 4  ;;  %v502_v46 = vrot.slane %v500_v11, 5  ;;  %v510_v60 = vshrl.u32 %v5111_v41, 16 }
  0xda   : > { %v5124_v56 = vpop.permute.xlu1 %2577  ;;  %v1656_v23 = vsel %vm4289_vm5, %v1651_v9, %v1655_v10  ;;  %v1661_v54 = vrot.slane %v1660_v50, 4  ;;  %v508_v14 = vrot.slane %v506_v59, 5  ;;  %v516_v45 = vshll.u32 %v5116_v5, 16 }
  0xdb   : > { %v1690_v2 = vsel %vm4289_vm5, %v1685_v47, %v1689_v42  ;;  %v503_v16 = vor.u32 %v502_v46, %v499_v48  ;;  %v512_v55 = vrot.slane %v510_v60, 4  ;;  %v3617_v21 = vrot.slane %v5053_v44, 9 }
  0xdc   : > { %v5129_v62 = vpop.permute.xlu0 %2575  ;;  %v3746_v15 = vcombine.low %v1680_v49, %v1690_v2  ;;  %v1666_v1 = vsel %vm4289_vm5, %v1661_v54, %v1665_v26  ;;  %v2771_v52 = vsel %vm2765_vm8, %v2738_v29, %v5009_v6  ;;  %v1941_v19 = vrot.slane %v5060_v35, 5 }
  0xdd   : > { %v1944_v40 = vrot.slane %v5094_v22, 5  ;;  %v3745_v30 = vcombine.low %v1656_v23, %v1666_v1  ;;  %v504_v37 = vrot.slane %v503_v16, 4  ;;  %v513_v31 = vor.u32 %v512_v55, %v508_v14  ;;  %v5185_v1 = vld [vmem:[%s4214_s30 + $0x90] sm:$0xf] }
  0xde   : > { %2589 = vrot.lane.b32.xlu1 %v3746_v15, %s4128_s10  ;;  %v518_v63 = vrot.slane %v516_v45, 5  ;;  %v1942_v53 = vsel %vm4245_vm2, %v3617_v21, %v1941_v19  ;;  %v1943_v0 = vrot.slane %v1941_v19, 4  ;;  %v2806_v6 = vsel %vm2798_vm9, %v2773_v8, %v5035_v38 }
  0xdf   : > { %v521_v35 = vshrl.u32 %v238_v7, 16  ;;  %2587 = vrot.lane.b32.xlu0 %v3745_v30, %s4128_s10  ;;  %v509_v22 = vsel %vm4289_vm5, %v504_v37, %v508_v14  ;;  %v514_v58 = vrot.slane %v513_v31, 4  ;;  %v524_v34 = vshll.u32 %v238_v7, 16  ;;  %v5199_v37 = vld [vmem:[%s4214_s30 + $0x84] sm:$0xf] }
  0xe0   : > { %v5145_v44 = vpop.permute.xlu0 %2655  ;;  %v530_v18 = vshll.u32 %v239_v36, 16  ;;  %v1945_v42 = vsel %vm4245_vm2, %v1943_v0, %v1944_v40  ;;  %v534_v61 = vshrl.u32 %v239_v36, 16  ;;  %v540_v3 = vshll.u32 %v240_v57, 16 }
  0xe1   : > { %v5151_v29 = vpop.permute.xlu1 %2099  ;;  %v523_v12 = vrot.slane %v521_v35, 4  ;;  %v519_v38 = vsel %vm4289_vm5, %v514_v58, %v518_v63  ;;  %v3761_v24 = vcombine.low %v1942_v53, %v1945_v42  ;;  %v526_v10 = vrot.slane %v524_v34, 5  ;;  %v5208_v53 = vld [vmem:[%s4214_s30 + $0x88] sm:$0xf] }
  0xe2   : > { %v532_v8 = vrot.slane %v530_v18, 5  ;;  %v3651_v9 = vcombine.low %v509_v22, %v519_v38  ;;  %v2804_v26 = vsel %vm2798_vm9, %v2771_v52, %v5039_v39  ;;  %v536_v13 = vrot.slane %v534_v61, 4  ;;  %v5188_v52 = vld [vmem:[%s4214_s30 + $0x94] sm:$0xf]  ;;  %v5222_v18 = vld [vmem:[%s4214_s30 + $0x98] sm:$0x1] }
  0xe3   : > { %v3618_v11 = vrot.slane %v5033_v43, 9  ;;  %2667 = vrot.lane.b32.xlu0 %v3761_v24, %s4129_s19  ;;  %v527_v49 = vor.u32 %v526_v10, %v523_v12  ;;  %v542_v47 = vrot.slane %v540_v3, 5  ;;  %v1948_v50 = vrot.slane %v5050_v20, 5 }
  0xe4   : > { %v1951_v59 = vrot.slane %v5077_v27, 5  ;;  %2111 = vrot.lane.b32.xlu1 %v3651_v9, %s4125_s7  ;;  %v537_v48 = vor.u32 %v536_v13, %v532_v8  ;;  %v2839_v46 = vsel %vm2831_vm10, %v2806_v6, %v5070_v32  ;;  %v3492_v39 = vrot.slane %v238_v7, 9 }
  0xe5   : > { %v770_v43 = vrot.slane %v239_v36, 5  ;;  %v528_v2 = vrot.slane %v527_v49, 4  ;;  %v1949_v20 = vsel %vm4245_vm2, %v3618_v11, %v1948_v50  ;;  %v1950_v54 = vrot.slane %v1948_v50, 4 }
  0xe6   : > { %v5166_v23 = vpop.permute.xlu0 %2657  ;;  %v773_v27 = vrot.slane %v240_v57, 5  ;;  %v538_v14 = vrot.slane %v537_v48, 4  ;;  %v3491_v32 = vrot.slane %v5102_v33, 9  ;;  %v763_v21 = vrot.slane %v5111_v41, 5 }
  0xe7   : > { %v5171_v60 = vpop.permute.xlu1 %2101  ;;  %v771_v45 = vsel %vm4245_vm2, %v3492_v39, %v770_v43  ;;  %v772_v15 = vrot.slane %v770_v43, 4  ;;  %v533_v16 = vsel %vm4289_vm5, %v528_v2, %v532_v8  ;;  %v1952_v55 = vsel %vm4245_vm2, %v1950_v54, %v1951_v59 }
  0xe8   : > { %v766_v7 = vrot.slane %v5116_v5, 5  ;;  %v543_v33 = vsel %vm4289_vm5, %v538_v14, %v542_v47  ;;  %v3762_v40 = vcombine.low %v1949_v20, %v1952_v55  ;;  %v2837_v36 = vsel %vm2831_vm10, %v2804_v26, %v5079_v28  ;;  %v5237_v26 = vld [vmem:[%s4214_s30 + $0x8c] sm:$0x1]  ;;  %v3991_v55 = vld [vmem:[%s4214_s30 + $0x30] sm:$0xf] }
  0xe9   : > { %v774_v30 = vsel %vm4245_vm2, %v772_v15, %v773_v27  ;;  %v3652_v5 = vcombine.low %v533_v16, %v543_v33  ;;  %v764_v31 = vsel %vm4245_vm2, %v3491_v32, %v763_v21  ;;  %v765_v63 = vrot.slane %v763_v21, 4 }
  0xea   : > { %v5190_v19 = vpop.permute.xlu0 %2179  ;;  %v2872_v57 = vsel %vm2864_vm11, %v2839_v46, %v5097_v51  ;;  %2669 = vrot.lane.b32.xlu0 %v3762_v40, %s4129_s19  ;;  %v3668_v28 = vcombine.low %v771_v45, %v774_v30  ;;  %v1120_v0 = vshrl.u32 %v5185_v1, 16  ;;  %v1123_v6 = vshll.u32 %v5185_v1, 16 }
  0xeb   : > { %v5201_v41 = vpop.permute.xlu1 %2181  ;;  %v1133_v35 = vshrl.u32 %v5188_v52, 16  ;;  %2113 = vrot.lane.b32.xlu1 %v3652_v5, %s4125_s7  ;;  %v767_v22 = vsel %vm4245_vm2, %v765_v63, %v766_v7  ;;  %v2870_v51 = vsel %vm2864_vm11, %v2837_v36, %v5104_v25  ;;  %v1096_v58 = vshrl.u32 %v5199_v37, 16 }
  0xec   : > { %v1099_v34 = vshll.u32 %v5199_v37, 16  ;;  %v3667_v12 = vcombine.low %v764_v31, %v767_v22  ;;  %v3684_v61 = vcombine.low %v5185_v1, %v5188_v52  ;;  %v1109_v3 = vshrl.u32 %v5208_v53, 16 }
  0xed   : > { %v3683_v38 = vcombine.low %v5199_v37, %v5208_v53  ;;  %v2905_v25 = vsel %vm2897_vm12, %v2872_v57, %v5124_v56  ;;  %v1122_v10 = vrot.slane %v1120_v0, 4  ;;  %v1125_v8 = vrot.slane %v1123_v6, 5  ;;  %v5273_v6 = vld [vmem:[%s4214_s30 + $0x9c] sm:$0xf] }
  0xee   : > { %v5224_v42 = vpop.permute.xlu0 %2259  ;;  %v1129_v9 = vshll.u32 %v5188_v52, 16  ;;  %2191 = vrot.lane.b32.xlu0 %v3667_v12, %s4124_s6  ;;  %v1135_v13 = vrot.slane %v1133_v35, 4  ;;  %v1139_v11 = vshll.u32 %v5222_v18, 16  ;;  %v1098_v49 = vrot.slane %v1096_v58, 4  ;;  %v5281_v58 = vld [vmem:[%s4214_s30 + $0xa0] sm:$0xf] }
  0xef   : > { %v5231_v24 = vpop.permute.xlu1 %2261  ;;  %v1101_v47 = vrot.slane %v1099_v34, 5  ;;  %2193 = vrot.lane.b32.xlu1 %v3668_v28, %s4124_s6  ;;  %v1126_v50 = vor.u32 %v1125_v8, %v1122_v10  ;;  %v1105_v56 = vshll.u32 %v5208_v53, 16  ;;  %v1111_v48 = vrot.slane %v1109_v3, 4  ;;  %v3993_v12 = vld [vmem:[%s4214_s30 + $0x3c] sm:$0xf] }
  0xf0   : > { %v1131_v59 = vrot.slane %v1129_v9, 5  ;;  %v2903_v46 = vsel %vm2897_vm12, %v2870_v51, %v5129_v62  ;;  %v1141_v39 = vrot.slane %v1139_v11, 5  ;;  %v1115_v2 = vshll.u32 %v5237_v26, 16  ;;  %v3992_v62 = vld [vmem:[%s4214_s30 + $0x34] sm:$0xf] }
  0xf1   : > { %v1102_v43 = vor.u32 %v1101_v47, %v1098_v49  ;;  %v1127_v54 = vrot.slane %v1126_v50, 4  ;;  %v1107_v14 = vrot.slane %v1105_v56, 5  ;;  %v2936_v45 = vsel %vm2930_vm14, %v2903_v46, %v5145_v44  ;;  %v5292_v10 = vld [vmem:[%s4214_s30 + $0x90] sm:$0xf]  ;;  %v5295_v8 = vld [vmem:[%s4214_s30 + $0x94] sm:$0xf] }
  0xf2   : > { %v1136_v27 = vor.u32 %v1135_v13, %v1131_v59  ;;  %2271 = vrot.lane.b32.xlu0 %v3683_v38, %s4122_s4  ;;  %v1117_v16 = vrot.slane %v1115_v2, 5  ;;  %v3629_v21 = vcombine.low %v3991_v55, %v3992_v62  ;;  %v3556_v7 = vrot.slane %v5185_v1, 9  ;;  %3825 = vmatprep.mubr.msk.bf16.mxu0 %vm2983_vm15, %v2936_v45 }
  0xf3   : > { %v5246_v20 = vpop.permute.xlu1 %2341  ;;  %v1103_v32 = vrot.slane %v1102_v43, 4  ;;  %2273 = vrot.lane.b32.xlu1 %v3684_v61, %s4122_s4  ;;  %v1132_v33 = vsel %vm4289_vm5, %v1127_v54, %v1131_v59  ;;  %v1112_v40 = vor.u32 %v1111_v48, %v1107_v14  ;;  %v1366_v36 = vrot.slane %v5188_v52, 5  ;;  %v3994_v61 = vld [vmem:[%s4214_s30 + $0x40] sm:$0xf]  ;;  %v5309_v59 = vld [vmem:[%s4214_s30 + $0xa4] sm:$0x1] }
  0xf4   : > { %v5250_v15 = vpop.permute.xlu0 %2339  ;;  %v1137_v44 = vrot.slane %v1136_v27, 4  ;;  %v1369_v5 = vrot.slane %v5222_v18, 5  ;;  %v3555_v1 = vrot.slane %v5199_v37, 9  ;;  %v1359_v31 = vrot.slane %v5208_v53, 5 }
  0xf5   : > { %v1108_v30 = vsel %vm4289_vm5, %v1103_v32, %v1107_v14  ;;  %v1113_v28 = vrot.slane %v1112_v40, 4  ;;  %v1367_v52 = vsel %vm4245_vm2, %v3556_v7, %v1366_v36  ;;  %v1368_v0 = vrot.slane %v1366_v36, 4  ;;  %v5326_v14 = vld [vmem:[%s4214_s30 + $0x98] sm:$0x1] }
  0xf6   : > { %v1142_v57 = vsel %vm4289_vm5, %v1137_v44, %v1141_v39  ;;  %v1360_v53 = vsel %vm4245_vm2, %v3555_v1, %v1359_v31  ;;  %v1361_v22 = vrot.slane %v1359_v31, 4  ;;  %v1362_v51 = vrot.slane %v5237_v26, 5 }
  0xf7   : > { %v5266_v63 = vpop.permute.xlu1 %2421  ;;  %v3700_v37 = vcombine.low %v1132_v33, %v1142_v57  ;;  %v1118_v34 = vsel %vm4289_vm5, %v1113_v28, %v1117_v16  ;;  %v1370_v18 = vsel %vm4245_vm2, %v1368_v0, %v1369_v5  ;;  %v3630_v3 = vcombine.low %v3993_v12, %v3994_v61  ;;  %v5333_v33 = vld [vmem:[%s4214_s30 + $0x90] sm:$0xf]  ;;  %v5342_v5 = vld [vmem:[%s4214_s30 + $0x94] sm:$0xf] }
  0xf8   : > { %v5275_v35 = vpop.permute.xlu0 %2419  ;;  %v2938_v38 = vsel %vm2930_vm14, %v2905_v25, %v5166_v23  ;;  %v3699_v9 = vcombine.low %v1108_v30, %v1118_v34  ;;  %v3716_v26 = vcombine.low %v1367_v52, %v1370_v18  ;;  %v1363_v13 = vsel %vm4245_vm2, %v1361_v22, %v1362_v51  ;;  %v5351_v34 = vld [vmem:[%s4214_s30 + $0x98] sm:$0x1] }
  0xf9   : > { %2353 = vrot.lane.b32.xlu1 %v3700_v37, %s4126_s8  ;;  %v1716_v11 = vshrl.u32 %v5273_v6, 16  ;;  %3826 = vmatmul.mubr.msk.bf16.gmra.mrb[4].mxu0 %vm2983_vm15, %v2938_v38  ;;  %v2698_v23 = vsel %vm2683_vm6, %v3629_v21, %v5151_v29  ;;  %v3715_v25 = vcombine.low %v1360_v53, %v1363_v13  ;;  %v1719_v47 = vshll.u32 %v5273_v6, 16 }
  0xfa   : > { %v1729_v50 = vshrl.u32 %v5281_v58, 16  ;;  %2351 = vrot.lane.b32.xlu0 %v3699_v9, %s4126_s8  ;;  %v2701_v48 = vsel %vm2683_vm6, %v3630_v3, %v5171_v60  ;;  %v1692_v46 = vshrl.u32 %v5292_v10, 16  ;;  %v1695_v39 = vshll.u32 %v5292_v10, 16 }
  0xfb   : > { %v5302_v49 = vpop.permute.xlu1 %2501  ;;  %v1705_v29 = vshrl.u32 %v5295_v8, 16  ;;  %v3732_v43 = vcombine.low %v5273_v6, %v5281_v58  ;;  %v3731_v2 = vcombine.low %v5292_v10, %v5295_v8  ;;  %v2744_v54 = vsel %vm2732_vm7, %v2701_v48, %v5201_v41 }
  0xfc   : > { %v5311_v56 = vpop.permute.xlu0 %2499  ;;  %v1718_v27 = vrot.slane %v1716_v11, 4  ;;  %v1721_v60 = vrot.slane %v1719_v47, 5  ;;  %v1725_v45 = vshll.u32 %v5281_v58, 16  ;;  %v1731_v32 = vrot.slane %v1729_v50, 4 }
  0xfd   : > { %2433 = vrot.lane.b32.xlu1 %v3716_v26, %s4123_s5  ;;  %v1735_v16 = vshll.u32 %v5309_v59, 16  ;;  %v1694_v55 = vrot.slane %v1692_v46, 4  ;;  %v1697_v62 = vrot.slane %v1695_v39, 5  ;;  %v1701_v21 = vshll.u32 %v5295_v8, 16 }
  0xfe   : > { %v1707_v7 = vrot.slane %v1705_v29, 4  ;;  %2431 = vrot.lane.b32.xlu0 %v3715_v25, %s4123_s5  ;;  %v2742_v44 = vsel %vm2732_vm7, %v2698_v23, %v5190_v19  ;;  %v1722_v40 = vor.u32 %v1721_v60, %v1718_v27  ;;  %v1727_v36 = vrot.slane %v1725_v45, 5 }
  0xff   : > { %v5335_v41 = vpop.permute.xlu1 %2581  ;;  %v1711_v30 = vshll.u32 %v5326_v14, 16  ;;  %v1737_v31 = vrot.slane %v1735_v16, 5  ;;  %v1698_v57 = vor.u32 %v1697_v62, %v1694_v55  ;;  %v1703_v28 = vrot.slane %v1701_v21, 5  ;;  %v5376_v16 = vld [vmem:[%s4214_s30 + $0xa0] sm:$0xf] }
 0x100   : > { %v2777_v52 = vsel %vm2765_vm8, %v2744_v54, %v5231_v24  ;;  %v1723_v0 = vrot.slane %v1722_v40, 4  ;;  %v1732_v37 = vor.u32 %v1731_v32, %v1727_v36  ;;  %v545_v53 = vshrl.u32 %v5333_v33, 16  ;;  %v244_v54 = vld [vmem:[%s4214_s30 + $0x9c] sm:$0xf] }
 0x101   : > { %v5344_v1 = vpop.permute.xlu0 %2579  ;;  %2513 = vrot.lane.b32.xlu1 %v3732_v43, %s4127_s9  ;;  %v1713_v19 = vrot.slane %v1711_v30, 5  ;;  %v1699_v22 = vrot.slane %v1698_v57, 4  ;;  %v1708_v51 = vor.u32 %v1707_v7, %v1703_v28  ;;  %v548_v18 = vshll.u32 %v5333_v33, 16  ;;  %v246_v7 = vld [vmem:[%s4214_s30 + $0xa4] sm:$0x1] }
 0x102   : > { %v554_v12 = vshll.u32 %v5342_v5, 16  ;;  %2511 = vrot.lane.b32.xlu0 %v3731_v2, %s4127_s9  ;;  %v1728_v24 = vsel %vm4289_vm5, %v1723_v0, %v1727_v36  ;;  %v1733_v61 = vrot.slane %v1732_v37, 4  ;;  %v547_v3 = vrot.slane %v545_v53, 4 }
 0x103   : > { %v558_v38 = vshrl.u32 %v5342_v5, 16  ;;  %v1704_v26 = vsel %vm4289_vm5, %v1699_v22, %v1703_v28  ;;  %v1709_v13 = vrot.slane %v1708_v51, 4  ;;  %v550_v11 = vrot.slane %v548_v18, 5 }
 0x104   : > { %v556_v23 = vrot.slane %v554_v12, 5  ;;  %v1738_v47 = vsel %vm4289_vm5, %v1733_v61, %v1737_v31  ;;  %v2775_v50 = vsel %vm2765_vm8, %v2742_v44, %v5224_v42  ;;  %v564_v46 = vshll.u32 %v5351_v34, 16 }
 0x105   : > { %v5359_v9 = vpop.permute.xlu0 %2659  ;;  %v560_v48 = vrot.slane %v558_v38, 4  ;;  %v3748_v39 = vcombine.low %v1728_v24, %v1738_v47  ;;  %v1714_v29 = vsel %vm4289_vm5, %v1709_v13, %v1713_v19  ;;  %v551_v43 = vor.u32 %v550_v11, %v547_v3 }
 0x106   : > { %v5363_v25 = vpop.permute.xlu1 %2103  ;;  %v3619_v2 = vrot.slane %v5292_v10, 9  ;;  %v3747_v27 = vcombine.low %v1704_v26, %v1714_v29  ;;  %v566_v45 = vrot.slane %v564_v46, 5  ;;  %v1955_v32 = vrot.slane %v5295_v8, 5 }
 0x107   : > { %v561_v60 = vor.u32 %v560_v48, %v556_v23  ;;  %2593 = vrot.lane.b32.xlu1 %v3748_v39, %s4128_s10  ;;  %v552_v42 = vrot.slane %v551_v43, 4  ;;  %v780_v55 = vrot.slane %v5351_v34, 5  ;;  %v1958_v62 = vrot.slane %v5326_v14, 5 }
 0x108   : > { %v2810_v21 = vsel %vm2798_vm9, %v2777_v52, %v5246_v20  ;;  %2591 = vrot.lane.b32.xlu0 %v3747_v27, %s4128_s10  ;;  %v1956_v44 = vsel %vm4245_vm2, %v3619_v2, %v1955_v32  ;;  %v1957_v8 = vrot.slane %v1955_v32, 4  ;;  %v569_v40 = vshrl.u32 %v244_v54, 16  ;;  %v5420_v2 = vld [vmem:[%s4214_s30 + $0xa8] sm:$0xf]  ;;  %v5436_v32 = vld [vmem:[%s4214_s30 + $0x9c] sm:$0xf] }
 0x109   : > { %v562_v10 = vrot.slane %v561_v60, 4  ;;  %v557_v30 = vsel %vm4289_vm5, %v552_v42, %v556_v23  ;;  %v572_v31 = vshll.u32 %v244_v54, 16  ;;  %v578_v14 = vshll.u32 %v5376_v16, 16 }
 0x10a   : > { %v582_v57 = vshrl.u32 %v5376_v16, 16  ;;  %v1959_v52 = vsel %vm4245_vm2, %v1957_v8, %v1958_v62  ;;  %v571_v0 = vrot.slane %v569_v40, 4  ;;  %v588_v37 = vshll.u32 %v246_v7, 16 }
 0x10b   : > { %v5387_v36 = vpop.permute.xlu0 %2661  ;;  %v567_v28 = vsel %vm4289_vm5, %v562_v10, %v566_v45  ;;  %v3763_v53 = vcombine.low %v1956_v44, %v1959_v52  ;;  %v574_v22 = vrot.slane %v572_v31, 5  ;;  %v580_v51 = vrot.slane %v578_v14, 5  ;;  %v5433_v45 = vld [vmem:[%s4214_s30 + $0xac] sm:$0xf]  ;;  %v5447_v10 = vld [vmem:[%s4214_s30 + $0xa0] sm:$0xf] }
 0x10c   : > { %v5393_v20 = vpop.permute.xlu1 %2105  ;;  %v3653_v19 = vcombine.low %v557_v30, %v567_v28  ;;  %v2808_v18 = vsel %vm2798_vm9, %v2775_v50, %v5250_v15  ;;  %v584_v12 = vrot.slane %v582_v57, 4  ;;  %v590_v24 = vrot.slane %v588_v37, 5 }
 0x10d   : > { %v3620_v61 = vrot.slane %v5273_v6, 9  ;;  %2671 = vrot.lane.b32.xlu0 %v3763_v53, %s4129_s19  ;;  %v575_v38 = vor.u32 %v574_v22, %v571_v0  ;;  %v787_v26 = vrot.slane %v246_v7, 5  ;;  %v1962_v13 = vrot.slane %v5281_v58, 5 }
 0x10e   : > { %2115 = vrot.lane.b32.xlu1 %v3653_v19, %s4125_s7  ;;  %v1965_v11 = vrot.slane %v5309_v59, 5  ;;  %v585_v15 = vor.u32 %v584_v12, %v580_v51  ;;  %v2843_v47 = vsel %vm2831_vm10, %v2810_v21, %v5266_v63  ;;  %v3494_v6 = vrot.slane %v244_v54, 9 }
 0x10f   : > { %v5402_v3 = vpop.permute.xlu0 %2183  ;;  %v784_v50 = vrot.slane %v5376_v16, 5  ;;  %v576_v48 = vrot.slane %v575_v38, 4  ;;  %v1963_v46 = vsel %vm4245_vm2, %v3620_v61, %v1962_v13  ;;  %v1964_v39 = vrot.slane %v1962_v13, 4 }
 0x110   : > { %v5408_v23 = vpop.permute.xlu1 %2185  ;;  %v3493_v58 = vrot.slane %v5333_v33, 9  ;;  %v586_v29 = vrot.slane %v585_v15, 4  ;;  %v2841_v59 = vsel %vm2831_vm10, %v2808_v18, %v5275_v35  ;;  %v777_v63 = vrot.slane %v5342_v5, 5  ;;  %v5475_v18 = vld [vmem:[%s4214_s30 + $0xa4] sm:$0x1] }
 0x111   : > { %v786_v43 = vrot.slane %v784_v50, 4  ;;  %v581_v27 = vsel %vm4289_vm5, %v576_v48, %v580_v51  ;;  %v1966_v60 = vsel %vm4245_vm2, %v1964_v39, %v1965_v11  ;;  %v785_v33 = vsel %vm4245_vm2, %v3494_v6, %v784_v50 }
 0x112   : > { %v2876_v35 = vsel %vm2864_vm11, %v2843_v47, %v5302_v49  ;;  %v591_v42 = vsel %vm4289_vm5, %v586_v29, %v590_v24  ;;  %v3764_v62 = vcombine.low %v1963_v46, %v1966_v60  ;;  %v2874_v7 = vsel %vm2864_vm11, %v2841_v59, %v5311_v56  ;;  %v5457_v56 = vld [vmem:[%s4214_s30 + $0xb0] sm:$0x1]  ;;  %v3996_v60 = vld [vmem:[%s4214_s30 + $0x4c] sm:$0xf] }
 0x113   : > { %v5422_v54 = vpop.permute.xlu0 %2263  ;;  %v788_v21 = vsel %vm4245_vm2, %v786_v43, %v787_v26  ;;  %v3654_v49 = vcombine.low %v581_v27, %v591_v42  ;;  %v778_v44 = vsel %vm4245_vm2, %v3493_v58, %v777_v63  ;;  %v779_v8 = vrot.slane %v777_v63, 4  ;;  %v3995_v27 = vld [vmem:[%s4214_s30 + $0x48] sm:$0xf] }
 0x114   : > { %v5438_v5 = vpop.permute.xlu1 %2265  ;;  %v1168_v40 = vshrl.u32 %v5420_v2, 16  ;;  %2673 = vrot.lane.b32.xlu0 %v3764_v62, %s4129_s19  ;;  %v3670_v30 = vcombine.low %v785_v33, %v788_v21  ;;  %v1171_v31 = vshll.u32 %v5420_v2, 16  ;;  %v1181_v14 = vshrl.u32 %v5433_v45, 16 }
 0x115   : > { %v1144_v57 = vshrl.u32 %v5436_v32, 16  ;;  %2117 = vrot.lane.b32.xlu1 %v3654_v49, %s4125_s7  ;;  %v781_v28 = vsel %vm4245_vm2, %v779_v8, %v780_v55  ;;  %v3686_v52 = vcombine.low %v5420_v2, %v5433_v45  ;;  %v1147_v0 = vshll.u32 %v5436_v32, 16 }
 0x116   : > { %v1157_v37 = vshrl.u32 %v5447_v10, 16  ;;  %v3669_v53 = vcombine.low %v778_v44, %v781_v28  ;;  %v3685_v22 = vcombine.low %v5436_v32, %v5447_v10  ;;  %v2909_v51 = vsel %vm2897_vm12, %v2876_v35, %v5335_v41  ;;  %v3998_v28 = vld [vmem:[%s4214_s30 + $0x58] sm:$0xf] }
 0x117   : > { %v1170_v34 = vrot.slane %v1168_v40, 4  ;;  %v1173_v12 = vrot.slane %v1171_v31, 5  ;;  %v1177_v24 = vshll.u32 %v5433_v45, 16  ;;  %v1183_v61 = vrot.slane %v1181_v14, 4 }
 0x118   : > { %v5468_v19 = vpop.permute.xlu1 %2345  ;;  %v1187_v38 = vshll.u32 %v5457_v56, 16  ;;  %2195 = vrot.lane.b32.xlu0 %v3669_v53, %s4124_s6  ;;  %v1146_v26 = vrot.slane %v1144_v57, 4  ;;  %v1149_v13 = vrot.slane %v1147_v0, 5  ;;  %v1153_v11 = vshll.u32 %v5447_v10, 16  ;;  %v5519_v0 = vld [vmem:[%s4214_s30 + $0xb4] sm:$0xf] }
 0x119   : > { %v5477_v55 = vpop.permute.xlu0 %2343  ;;  %v1159_v41 = vrot.slane %v1157_v37, 4  ;;  %2197 = vrot.lane.b32.xlu1 %v3670_v30, %s4124_s6  ;;  %v2907_v15 = vsel %vm2897_vm12, %v2874_v7, %v5344_v1  ;;  %v1174_v47 = vor.u32 %v1173_v12, %v1170_v34  ;;  %v1179_v6 = vrot.slane %v1177_v24, 5  ;;  %v5522_v37 = vld [vmem:[%s4214_s30 + $0xb8] sm:$0xf]  ;;  %v5531_v12 = vld [vmem:[%s4214_s30 + $0xa8] sm:$0xf] }
 0x11a   : > { %v1163_v50 = vshll.u32 %v5475_v18, 16  ;;  %v1189_v46 = vrot.slane %v1187_v38, 5  ;;  %v1150_v39 = vor.u32 %v1149_v13, %v1146_v26  ;;  %v1155_v58 = vrot.slane %v1153_v11, 5  ;;  %v5538_v26 = vld [vmem:[%s4214_s30 + $0xac] sm:$0xf] }
 0x11b   : > { %v2940_v29 = vsel %vm2930_vm14, %v2907_v15, %v5359_v9  ;;  %v1175_v43 = vrot.slane %v1174_v47, 4  ;;  %v1184_v63 = vor.u32 %v1183_v61, %v1179_v6  ;;  %v3631_v33 = vcombine.low %v3995_v27, %v3996_v60 }
 0x11c   : > { %v5487_v48 = vpop.permute.xlu1 %2425  ;;  %v3558_v1 = vrot.slane %v5420_v2, 9  ;;  %3829 = vmatprep.mubr.msk.bf16.mxu0 %vm2983_vm15, %v2940_v29  ;;  %2275 = vrot.lane.b32.xlu0 %v3685_v22, %s4122_s4  ;;  %v1151_v35 = vrot.slane %v1150_v39, 4  ;;  %v1160_v42 = vor.u32 %v1159_v41, %v1155_v58  ;;  %v1165_v62 = vrot.slane %v1163_v50, 5 }
 0x11d   : > { %v5491_v59 = vpop.permute.xlu0 %2423  ;;  %v1380_v21 = vrot.slane %v5433_v45, 5  ;;  %2277 = vrot.lane.b32.xlu1 %v3686_v52, %s4122_s4  ;;  %v1180_v9 = vsel %vm4289_vm5, %v1175_v43, %v1179_v6  ;;  %v1185_v7 = vrot.slane %v1184_v63, 4  ;;  %v1383_v2 = vrot.slane %v5457_v56, 5  ;;  %v3997_v56 = vld [vmem:[%s4214_s30 + $0x54] sm:$0xf] }
 0x11e   : > { %v3557_v49 = vrot.slane %v5436_v32, 9  ;;  %v1156_v44 = vsel %vm4289_vm5, %v1151_v35, %v1155_v58  ;;  %v1161_v8 = vrot.slane %v1160_v42, 4  ;;  %v1373_v57 = vrot.slane %v5447_v10, 5  ;;  %v5553_v6 = vld [vmem:[%s4214_s30 + $0xbc] sm:$0x1] }
 0x11f   : > { %v1381_v45 = vsel %vm4245_vm2, %v3558_v1, %v1380_v21  ;;  %v1382_v40 = vrot.slane %v1380_v21, 4  ;;  %v1190_v14 = vsel %vm4289_vm5, %v1185_v7, %v1189_v46  ;;  %v1376_v32 = vrot.slane %v5475_v18, 5 }
 0x120   : > { %v5508_v30 = vpop.permute.xlu1 %2505  ;;  %v3632_v52 = vcombine.low %v3997_v56, %v3998_v28  ;;  %v3702_v53 = vcombine.low %v1180_v9, %v1190_v14  ;;  %v1166_v22 = vsel %vm4289_vm5, %v1161_v8, %v1165_v62  ;;  %v2942_v10 = vsel %vm2930_vm14, %v2909_v51, %v5387_v36 }
 0x121   : > { %v5510_v31 = vpop.permute.xlu0 %2503  ;;  %v1384_v34 = vsel %vm4245_vm2, %v1382_v40, %v1383_v2  ;;  %v3701_v18 = vcombine.low %v1156_v44, %v1166_v22  ;;  %v2704_v24 = vsel %vm2683_vm6, %v3631_v33, %v5363_v25  ;;  %v1374_v61 = vsel %vm4245_vm2, %v3557_v49, %v1373_v57  ;;  %3830 = vmatmul.mubr.msk.bf16.gmra.mrb[8].mxu0 %vm2983_vm15, %v2942_v10  ;;  %v5568_v33 = vld [vmem:[%s4214_s30 + $0xb0] sm:$0x1]  ;;  %v5575_v2 = vld [vmem:[%s4214_s30 + $0xa8] sm:$0xf]  ;;  %v5581_v40 = vld [vmem:[%s4214_s30 + $0xac] sm:$0xf] }
 0x122   : > { %v1375_v38 = vrot.slane %v1373_v57, 4  ;;  %2357 = vrot.lane.b32.xlu1 %v3702_v53, %s4126_s8  ;;  %v3718_v13 = vcombine.low %v1381_v45, %v1384_v34  ;;  %v1764_v36 = vshrl.u32 %v5519_v0, 16  ;;  %v1767_v51 = vshll.u32 %v5519_v0, 16  ;;  %v5587_v53 = vld [vmem:[%s4214_s30 + $0xb0] sm:$0x1] }
 0x123   : > { %v1777_v11 = vshrl.u32 %v5522_v37, 16  ;;  %2355 = vrot.lane.b32.xlu0 %v3701_v18, %s4126_s8  ;;  %v2707_v41 = vsel %vm2683_vm6, %v3632_v52, %v5393_v20  ;;  %v1740_v15 = vshrl.u32 %v5531_v12, 16  ;;  %v1743_v47 = vshll.u32 %v5531_v12, 16 }
 0x124   : > { %v1377_v25 = vsel %vm4245_vm2, %v1375_v38, %v1376_v32  ;;  %v3734_v46 = vcombine.low %v5519_v0, %v5522_v37  ;;  %v1753_v39 = vshrl.u32 %v5538_v26, 16  ;;  %v3733_v58 = vcombine.low %v5531_v12, %v5538_v26  ;;  %v5560_v29 = vpop.permute.xlu1 %2585 }
 0x125   : > { %v3717_v50 = vcombine.low %v1374_v61, %v1377_v25  ;;  %v2748_v20 = vsel %vm2732_vm7, %v2707_v41, %v5408_v23  ;;  %v1766_v63 = vrot.slane %v1764_v36, 4  ;;  %v1769_v27 = vrot.slane %v1767_v51, 5 }
 0x126   : > { %v5562_v43 = vpop.permute.xlu0 %2583  ;;  %v1773_v60 = vshll.u32 %v5522_v37, 16  ;;  %2437 = vrot.lane.b32.xlu1 %v3718_v13, %s4123_s5  ;;  %v1779_v1 = vrot.slane %v1777_v11, 4  ;;  %v1783_v35 = vshll.u32 %v5553_v6, 16  ;;  %v1742_v42 = vrot.slane %v1740_v15, 4 }
 0x127   : > { %v1745_v62 = vrot.slane %v1743_v47, 5  ;;  %2435 = vrot.lane.b32.xlu0 %v3717_v50, %s4123_s5  ;;  %v1770_v21 = vor.u32 %v1769_v27, %v1766_v63  ;;  %v1749_v23 = vshll.u32 %v5538_v26, 16  ;;  %v1755_v7 = vrot.slane %v1753_v39, 4 }
 0x128   : > { %v1775_v9 = vrot.slane %v1773_v60, 5  ;;  %v2746_v49 = vsel %vm2732_vm7, %v2704_v24, %v5402_v3  ;;  %v1785_v44 = vrot.slane %v1783_v35, 5  ;;  %v1759_v45 = vshll.u32 %v5568_v33, 16 }
 0x129   : > { %v1746_v8 = vor.u32 %v1745_v62, %v1742_v42  ;;  %v1771_v14 = vrot.slane %v1770_v21, 4  ;;  %v1751_v32 = vrot.slane %v1749_v23, 5  ;;  %v2781_v56 = vsel %vm2765_vm8, %v2748_v20, %v5438_v5 }
 0x12a   : > { %v1780_v57 = vor.u32 %v1779_v1, %v1775_v9  ;;  %2517 = vrot.lane.b32.xlu1 %v3734_v46, %s4127_s9  ;;  %v1761_v52 = vrot.slane %v1759_v45, 5  ;;  %v593_v3 = vshrl.u32 %v5575_v2, 16  ;;  %v596_v22 = vshll.u32 %v5575_v2, 16  ;;  %v5593_v10 = vpop.permute.xlu0 %2663  ;;  %v5616_v1 = vld [vmem:[%s4214_s30 + $0xb8] sm:$0xf] }
 0x12b   : > { %v1747_v28 = vrot.slane %v1746_v8, 4  ;;  %2515 = vrot.lane.b32.xlu0 %v3733_v58, %s4127_s9  ;;  %v1776_v18 = vsel %vm4289_vm5, %v1771_v14, %v1775_v9  ;;  %v1756_v24 = vor.u32 %v1755_v7, %v1751_v32  ;;  %v602_v61 = vshll.u32 %v5581_v40, 16  ;;  %v5607_v58 = vld [vmem:[%s4214_s30 + $0xb4] sm:$0xf]  ;;  %v252_v9 = vld [vmem:[%s4214_s30 + $0xbc] sm:$0x1] }
 0x12c   : > { %v5591_v34 = vpop.permute.xlu1 %2107  ;;  %v1781_v5 = vrot.slane %v1780_v57, 4  ;;  %v595_v13 = vrot.slane %v593_v3, 4  ;;  %v598_v36 = vrot.slane %v596_v22, 5  ;;  %v606_v51 = vshrl.u32 %v5581_v40, 16 }
 0x12d   : > { %v1752_v38 = vsel %vm4289_vm5, %v1747_v28, %v1751_v32  ;;  %v1757_v25 = vrot.slane %v1756_v24, 4  ;;  %v604_v41 = vrot.slane %v602_v61, 5  ;;  %v612_v15 = vshll.u32 %v5587_v53, 16 }
 0x12e   : > { %v1786_v11 = vsel %vm4289_vm5, %v1781_v5, %v1785_v44  ;;  %v599_v50 = vor.u32 %v598_v36, %v595_v13  ;;  %v608_v46 = vrot.slane %v606_v51, 4  ;;  %v3621_v39 = vrot.slane %v5531_v12, 9 }
 0x12f   : > { %v3750_v47 = vcombine.low %v1776_v18, %v1786_v11  ;;  %v1762_v20 = vsel %vm4289_vm5, %v1757_v25, %v1761_v52  ;;  %v2779_v63 = vsel %vm2765_vm8, %v2746_v49, %v5422_v54  ;;  %v1969_v27 = vrot.slane %v5538_v26, 5 }
 0x130   : > { %v1972_v60 = vrot.slane %v5568_v33, 5  ;;  %v3749_v42 = vcombine.low %v1752_v38, %v1762_v20  ;;  %v600_v12 = vrot.slane %v599_v50, 4  ;;  %v609_v62 = vor.u32 %v608_v46, %v604_v41 }
 0x131   : > { %2597 = vrot.lane.b32.xlu1 %v3750_v47, %s4128_s10  ;;  %v614_v21 = vrot.slane %v612_v15, 5  ;;  %v5622_v23 = vpop.permute.xlu0 %2665  ;;  %v1970_v54 = vsel %vm4245_vm2, %v3621_v39, %v1969_v27  ;;  %v1971_v7 = vrot.slane %v1969_v27, 4  ;;  %v2814_v26 = vsel %vm2798_vm9, %v2781_v56, %v5468_v19 }
 0x132   : > { %v5618_v35 = vpop.permute.xlu1 %2109  ;;  %v617_v33 = vshrl.u32 %v5607_v58, 16  ;;  %2595 = vrot.lane.b32.xlu0 %v3749_v42, %s4128_s10  ;;  %v605_v49 = vsel %vm4289_vm5, %v600_v12, %v604_v41  ;;  %v610_v44 = vrot.slane %v609_v62, 4  ;;  %v620_v8 = vshll.u32 %v5607_v58, 16  ;;  %v5668_v12 = vld [vmem:[%s4214_s30 + $0xc0] sm:$0xf] }
 0x133   : > { %v626_v45 = vshll.u32 %v5616_v1, 16  ;;  %v1973_v14 = vsel %vm4245_vm2, %v1971_v7, %v1972_v60  ;;  %v630_v32 = vshrl.u32 %v5616_v1, 16  ;;  %v636_v28 = vshll.u32 %v252_v9, 16  ;;  %v5671_v62 = vld [vmem:[%s4214_s30 + $0xc4] sm:$0xf] }
 0x134   : > { %v619_v57 = vrot.slane %v617_v33, 4  ;;  %v615_v19 = vsel %vm4289_vm5, %v610_v44, %v614_v21  ;;  %v3765_v56 = vcombine.low %v1970_v54, %v1973_v14  ;;  %v622_v52 = vrot.slane %v620_v8, 5  ;;  %v5687_v8 = vld [vmem:[%s4214_s30 + $0xb8] sm:$0xf] }
 0x135   : > { %v628_v3 = vrot.slane %v626_v45, 5  ;;  %v3655_v18 = vcombine.low %v605_v49, %v615_v19  ;;  %v2812_v5 = vsel %vm2798_vm9, %v2779_v63, %v5477_v55  ;;  %v632_v24 = vrot.slane %v630_v32, 4 }
 0x136   : > { %v5639_v22 = vpop.permute.xlu1 %2189  ;;  %v3622_v61 = vrot.slane %v5519_v0, 9  ;;  %2675 = vrot.lane.b32.xlu0 %v3765_v56, %s4129_s19  ;;  %v623_v38 = vor.u32 %v622_v52, %v619_v57  ;;  %v638_v13 = vrot.slane %v636_v28, 5  ;;  %v1976_v36 = vrot.slane %v5522_v37, 5  ;;  %v5647_v11 = vpop.permute.xlu0 %2187  ;;  %v3544_v52 = vld [vmem:[%s4214_s30 + $0xc8] sm:$0x1] }
 0x137   : > { %v1979_v51 = vrot.slane %v5553_v6, 5  ;;  %2119 = vrot.lane.b32.xlu1 %v3655_v18, %s4125_s7  ;;  %v633_v25 = vor.u32 %v632_v24, %v628_v3  ;;  %v2847_v41 = vsel %vm2831_vm10, %v2814_v26, %v5487_v48  ;;  %v3496_v55 = vrot.slane %v5607_v58, 9  ;;  %v5680_v26 = vld [vmem:[%s4214_s30 + $0xb4] sm:$0xf] }
 0x138   : > { %v798_v0 = vrot.slane %v5616_v1, 5  ;;  %v624_v15 = vrot.slane %v623_v38, 4  ;;  %v1977_v37 = vsel %vm4245_vm2, %v3622_v61, %v1976_v36  ;;  %v1978_v47 = vrot.slane %v1976_v36, 4 }
 0x139   : > { %v801_v6 = vrot.slane %v252_v9, 5  ;;  %v634_v50 = vrot.slane %v633_v25, 4  ;;  %v3495_v48 = vrot.slane %v5575_v2, 9  ;;  %v791_v60 = vrot.slane %v5581_v40, 5 }
 0x13a   : > { %v799_v46 = vsel %vm4245_vm2, %v3496_v55, %v798_v0  ;;  %v800_v39 = vrot.slane %v798_v0, 4  ;;  %v5659_v20 = vpop.permute.xlu1 %2269  ;;  %v629_v63 = vsel %vm4289_vm5, %v624_v15, %v628_v3  ;;  %v1980_v27 = vsel %vm4245_vm2, %v1978_v47, %v1979_v51  ;;  %v5689_v45 = vpop.permute.xlu0 %2267  ;;  %v3541_v51 = vld [vmem:[%s4214_s30 + $0xbc] sm:$0x1] }
 0x13b   : > { %v794_v42 = vrot.slane %v5587_v53, 5  ;;  %v639_v21 = vsel %vm4289_vm5, %v634_v50, %v638_v13  ;;  %v3766_v9 = vcombine.low %v1977_v37, %v1980_v27  ;;  %v2845_v54 = vsel %vm2831_vm10, %v2812_v5, %v5491_v59 }
 0x13c   : > { %v802_v7 = vsel %vm4245_vm2, %v800_v39, %v801_v6  ;;  %v3656_v33 = vcombine.low %v629_v63, %v639_v21  ;;  %v792_v53 = vsel %vm4245_vm2, %v3495_v48, %v791_v60  ;;  %v793_v49 = vrot.slane %v791_v60, 4 }
 0x13d   : > { %v2880_v44 = vsel %vm2864_vm11, %v2847_v41, %v5508_v30  ;;  %2677 = vrot.lane.b32.xlu0 %v3766_v9, %s4129_s19  ;;  %v3672_v59 = vcombine.low %v799_v46, %v802_v7  ;;  %v1216_v14 = vshrl.u32 %v5668_v12, 16  ;;  %v1219_v57 = vshll.u32 %v5668_v12, 16  ;;  %v4000_v7 = vld [vmem:[%s4214_s30 + $0x64] sm:$0xf] }
 0x13e   : > { %v1229_v32 = vshrl.u32 %v5671_v62, 16  ;;  %2121 = vrot.lane.b32.xlu1 %v3656_v33, %s4125_s7  ;;  %v795_v28 = vsel %vm4245_vm2, %v793_v49, %v794_v42  ;;  %v2878_v30 = vsel %vm2864_vm11, %v2845_v54, %v5510_v31  ;;  %v1192_v19 = vshrl.u32 %v5680_v26, 16  ;;  %v3999_v54 = vld [vmem:[%s4214_s30 + $0x60] sm:$0xf]  ;;  %s3795_s7 = sshll.u32 %s4112_s15, 12 }
 0x13f   : > { %v1195_v56 = vshll.u32 %v5680_v26, 16  ;;  %v3671_v3 = vcombine.low %v792_v53, %v795_v28  ;;  %v3688_v18 = vcombine.low %v5668_v12, %v5671_v62  ;;  %v1205_v5 = vshrl.u32 %v5687_v8, 16  ;;  %s5963_s11 = scalar_lea.hbm %s6052_s2, %s3795_s7 }
 0x140   : > { %v3687_v24 = vcombine.low %v5680_v26, %v5687_v8  ;;  %v5708_v61 = vpop.permute.xlu1 %2349  ;;  %v2913_v38 = vsel %vm2897_vm12, %v2880_v44, %v5560_v29  ;;  %v1218_v31 = vrot.slane %v1216_v14, 4  ;;  %v1221_v13 = vrot.slane %v1219_v57, 5 }
 0x141   : > { %v1225_v36 = vshll.u32 %v5671_v62, 16  ;;  %2199 = vrot.lane.b32.xlu0 %v3671_v3, %s4124_s6  ;;  %v1231_v25 = vrot.slane %v1229_v32, 4  ;;  %v1235_v41 = vshll.u32 %v3544_v52, 16  ;;  %v1194_v55 = vrot.slane %v1192_v19, 4  ;;  %v5745_v3 = vld [vmem:[%s4214_s30 + $0xcc] sm:$0xf] }
 0x142   : > { %v1197_v0 = vrot.slane %v1195_v56, 5  ;;  %2201 = vrot.lane.b32.xlu1 %v3672_v59, %s4124_s6  ;;  %v1222_v15 = vor.u32 %v1221_v13, %v1218_v31  ;;  %v1201_v47 = vshll.u32 %v5687_v8, 16  ;;  %v1207_v29 = vrot.slane %v1205_v5, 4  ;;  %v4001_v13 = vld [vmem:[%s4214_s30 + $0x6c] sm:$0xf] }
 0x143   : > { %v1227_v37 = vrot.slane %v1225_v36, 5  ;;  %v5717_v6 = vpop.permute.xlu0 %2347  ;;  %v2911_v50 = vsel %vm2897_vm12, %v2878_v30, %v5562_v43  ;;  %v1237_v46 = vrot.slane %v1235_v41, 5  ;;  %v1211_v48 = vshll.u32 %v3541_v51, 16  ;;  %v4002_v36 = vld [vmem:[%s4214_s30 + $0x70] sm:$0xf] }
 0x144   : > { %v1198_v39 = vor.u32 %v1197_v0, %v1194_v55  ;;  %v1223_v63 = vrot.slane %v1222_v15, 4  ;;  %v1203_v60 = vrot.slane %v1201_v47, 5  ;;  %v2944_v42 = vsel %vm2930_vm14, %v2911_v50, %v5593_v10  ;;  %v5728_v43 = vpop.permute.xlu1 %2429  ;;  %v5761_v55 = vld [vmem:[%s4214_s30 + $0xc0] sm:$0xf]  ;;  %v5764_v0 = vld [vmem:[%s4214_s30 + $0xc4] sm:$0xf] }
 0x145   : > { %v1232_v27 = vor.u32 %v1231_v25, %v1227_v37  ;;  %2279 = vrot.lane.b32.xlu0 %v3687_v24, %s4122_s4  ;;  %v1213_v9 = vrot.slane %v1211_v48, 5  ;;  %v3633_v33 = vcombine.low %v3999_v54, %v4000_v7  ;;  %v3560_v53 = vrot.slane %v5668_v12, 9  ;;  %3833 = vmatprep.mubr.msk.bf16.mxu0 %vm2983_vm15, %v2944_v42  ;;  %v5750_v24 = vld [vmem:[%s4214_s30 + $0xd0] sm:$0xf]  ;;  %v3608_v48 = vld [vmem:[%s4214_s30 + $0xd4] sm:$0x1] }
 0x146   : > { %v1199_v21 = vrot.slane %v1198_v39, 4  ;;  %2281 = vrot.lane.b32.xlu1 %v3688_v18, %s4122_s4  ;;  %v1228_v49 = vsel %vm4289_vm5, %v1223_v63, %v1227_v37  ;;  %v1208_v44 = vor.u32 %v1207_v29, %v1203_v60  ;;  %v1394_v59 = vrot.slane %v5671_v62, 5  ;;  %v3605_v7 = vld [vmem:[%s4214_s30 + $0xc8] sm:$0x1]  ;;  %s5885_s4 = scalar_lea.vmem [#allocation2], %s3478_s29 }
 0x147   : > { %v1233_v10 = vrot.slane %v1232_v27, 4  ;;  %v5734_v14 = vpop.permute.xlu0 %2427  ;;  %v1397_v57 = vrot.slane %v3544_v52, 5  ;;  %v3559_v32 = vrot.slane %v5680_v26, 9  ;;  %v1387_v28 = vrot.slane %v5687_v8, 5 }
 0x148   : > { %v1204_v12 = vsel %vm4289_vm5, %v1199_v21, %v1203_v60  ;;  %v1209_v19 = vrot.slane %v1208_v44, 4  ;;  %v1395_v62 = vsel %vm4245_vm2, %v3560_v53, %v1394_v59  ;;  %v1396_v56 = vrot.slane %v1394_v59, 4  ;;  %v5771_v29 = vpop.permute.xlu1 %2509 }
 0x149   : > { %v1238_v30 = vsel %vm4289_vm5, %v1233_v10, %v1237_v46  ;;  %v1388_v52 = vsel %vm4245_vm2, %v3559_v32, %v1387_v28  ;;  %v1389_v5 = vrot.slane %v1387_v28, 4  ;;  %v1390_v26 = vrot.slane %v3541_v51, 5 }
 0x14a   : > { %v3704_v18 = vcombine.low %v1228_v49, %v1238_v30  ;;  %v1214_v8 = vsel %vm4289_vm5, %v1209_v19, %v1213_v9  ;;  %v1398_v31 = vsel %vm4245_vm2, %v1396_v56, %v1397_v57  ;;  %v3634_v25 = vcombine.low %v4001_v13, %v4002_v36 }
 0x14b   : > { %v2946_v41 = vsel %vm2930_vm14, %v2913_v38, %v5622_v23  ;;  %v3703_v51 = vcombine.low %v1204_v12, %v1214_v8  ;;  %v3720_v15 = vcombine.low %v1395_v62, %v1398_v31  ;;  %v1391_v37 = vsel %vm4245_vm2, %v1389_v5, %v1390_v26  ;;  %v5773_v50 = vpop.permute.xlu0 %2507 }
 0x14c   : > { %2361 = vrot.lane.b32.xlu1 %v3704_v18, %s4126_s8  ;;  %v1812_v47 = vshrl.u32 %v5745_v3, 16  ;;  %3834 = vmatmul.mubr.msk.bf16.gmra.mrb[12].mxu0 %vm2983_vm15, %v2946_v41  ;;  %v2710_v23 = vsel %vm2683_vm6, %v3633_v33, %v5591_v34  ;;  %v3719_v38 = vcombine.low %v1388_v52, %v1391_v37  ;;  %v1815_v46 = vshll.u32 %v5745_v3, 16 }
 0x14d   : > { %v1825_v39 = vshrl.u32 %v5750_v24, 16  ;;  %2359 = vrot.lane.b32.xlu0 %v3703_v51, %s4126_s8  ;;  %v2713_v63 = vsel %vm2683_vm6, %v3634_v25, %v5618_v35  ;;  %v1788_v27 = vshrl.u32 %v5761_v55, 16  ;;  %v1791_v60 = vshll.u32 %v5761_v55, 16  ;;  %s3345_s8 = sshll.u32 %s5885_s4, 4  ;;  %s5966_s8 = int_to_ptr.vmem [resolvable:$true] %s3345_s8 }
 0x14e   : > { %v1801_v42 = vshrl.u32 %v5764_v0, 16  ;;  %v3736_v34 = vcombine.low %v5745_v3, %v5750_v24  ;;  %v3735_v21 = vcombine.low %v5761_v55, %v5764_v0  ;;  %v2752_v9 = vsel %vm2732_vm7, %v2713_v63, %v5639_v22  ;;  %p4017_p1 = scmp.lt.s32.totalorder %s5966_s8, %s4015_s23 }
 0x14f   : > { %v1814_v54 = vrot.slane %v1812_v47, 4  ;;  %v1817_v35 = vrot.slane %v1815_v46, 5  ;;  %v1821_v33 = vshll.u32 %v5750_v24, 16  ;;  %v1827_v53 = vrot.slane %v1825_v39, 4 }
 0x150   : > { %2441 = vrot.lane.b32.xlu1 %v3720_v15, %s4123_s5  ;;  %v1831_v49 = vshll.u32 %v3608_v48, 16  ;;  %v1790_v10 = vrot.slane %v1788_v27, 4  ;;  %v1793_v44 = vrot.slane %v1791_v60, 5  ;;  %v1797_v59 = vshll.u32 %v5764_v0, 16  ;;  %v2590_v30 = vpop.permute.xlu1 %2589 }
 0x151   : > { %v1803_v12 = vrot.slane %v1801_v42, 4  ;;  %2439 = vrot.lane.b32.xlu0 %v3719_v38, %s4123_s5  ;;  %v2750_v57 = vsel %vm2732_vm7, %v2710_v23, %v5647_v11  ;;  %v1818_v22 = vor.u32 %v1817_v35, %v1814_v54  ;;  %v1823_v32 = vrot.slane %v1821_v33, 5  ;;  %v2588_v19 = vpop.permute.xlu0 %2587 }
 0x152   : > { %v1807_v28 = vshll.u32 %v3605_v7, 16  ;;  %v1833_v62 = vrot.slane %v1831_v49, 5  ;;  %v1794_v56 = vor.u32 %v1793_v44, %v1790_v10  ;;  %v1799_v18 = vrot.slane %v1797_v59, 5 }
 0x153   : > { %v2785_v52 = vsel %vm2765_vm8, %v2752_v9, %v5659_v20  ;;  %v1819_v5 = vrot.slane %v1818_v22, 4  ;;  %v1828_v26 = vor.u32 %v1827_v53, %v1823_v32  ;;  %v3624_v31 = vrot.slane %v5745_v3, 9 }
 0x154   : > { %2521 = vrot.lane.b32.xlu1 %v3736_v34, %s4127_s9  ;;  %v1809_v8 = vrot.slane %v1807_v28, 5  ;;  %v1795_v13 = vrot.slane %v1794_v56, 4  ;;  %v1804_v11 = vor.u32 %v1803_v12, %v1799_v18  ;;  %v1990_v36 = vrot.slane %v5750_v24, 5 }
 0x155   : > { %v1993_v25 = vrot.slane %v3608_v48, 5  ;;  %2519 = vrot.lane.b32.xlu0 %v3735_v21, %s4127_s9  ;;  %v1824_v41 = vsel %vm4289_vm5, %v1819_v5, %v1823_v32  ;;  %v1829_v51 = vrot.slane %v1828_v26, 4  ;;  %v3623_v20 = vrot.slane %v5761_v55, 9  ;;  %v2668_v24 = vpop.permute.xlu0 %2667 }
 0x156   : > { %v1983_v15 = vrot.slane %v5764_v0, 5  ;;  %v1800_v37 = vsel %vm4289_vm5, %v1795_v13, %v1799_v18  ;;  %v1805_v47 = vrot.slane %v1804_v11, 4  ;;  %v2783_v3 = vsel %vm2765_vm8, %v2750_v57, %v5689_v45  ;;  %v2112_v55 = vpop.permute.xlu1 %2111  ;;  %v4006_v13 = vld [vmem:[%s4214_s30 + $0x88] sm:$0xf] }
 0x157   : > { %v1992_v23 = vrot.slane %v1990_v36, 4  ;;  %v1834_v38 = vsel %vm4289_vm5, %v1829_v51, %v1833_v62  ;;  %v1991_v46 = vsel %vm4245_vm2, %v3624_v31, %v1990_v36  ;;  %v1986_v48 = vrot.slane %v3605_v7, 5  ;;  %v4005_v31 = vld [vmem:[%s4214_s30 + $0x84] sm:$0xf] }
 0x158   : > { %v1985_v39 = vrot.slane %v1983_v15, 4  ;;  %v3752_v63 = vcombine.low %v1824_v41, %v1834_v38  ;;  %v1810_v0 = vsel %vm4289_vm5, %v1805_v47, %v1809_v8  ;;  %v1984_v45 = vsel %vm4245_vm2, %v3623_v20, %v1983_v15 }
 0x159   : > { %v1994_v27 = vsel %vm4245_vm2, %v1992_v23, %v1993_v25  ;;  %v3751_v60 = vcombine.low %v1800_v37, %v1810_v0  ;;  %v2818_v34 = vsel %vm2798_vm9, %v2785_v52, %v5708_v61  ;;  %v2816_v21 = vsel %vm2798_vm9, %v2783_v3, %v5717_v6 }
 0x15a   : > { %v1987_v42 = vsel %vm4245_vm2, %v1985_v39, %v1986_v48  ;;  %2601 = vrot.lane.b32.xlu1 %v3752_v63, %s4128_s10  ;;  %v3768_v4 = vcombine.low %v1991_v46, %v1994_v27  ;;  %v2851_v9 = vsel %vm2831_vm10, %v2818_v34, %v5728_v43  ;;  %v2849_v54 = vsel %vm2831_vm10, %v2816_v21, %v5734_v14 }
 0x15b   : > { %2599 = vrot.lane.b32.xlu0 %v3751_v60, %s4128_s10  ;;  %v3767_v7 = vcombine.low %v1984_v45, %v1987_v42  ;;  %v2884_v17 = vsel %vm2864_vm11, %v2851_v9, %v5771_v29  ;;  %v2882_v61 = vsel %vm2864_vm11, %v2849_v54, %v5773_v50  ;;  %v3639_v14 = vcombine.low %v5575_v2, %v5581_v40  ;;  %v4007_v54 = vld [vmem:[%s4214_s30 + $0x90] sm:$0xf] }
 0x15c   : > { %v2917_v6 = vsel %vm2897_vm12, %v2884_v17, %v2590_v30  ;;  %v2915_v35 = vsel %vm2897_vm12, %v2882_v61, %v2588_v19  ;;  %v2670_v33 = vpop.permute.xlu0 %2669  ;;  %v3640_v29 = vcombine.low %v5607_v58, %v5616_v1  ;;  %v4003_v30 = vld [vmem:[%s4214_s30 + $0x78] sm:$0xf]  ;;  %v4004_v19 = vld [vmem:[%s4214_s30 + $0x7c] sm:$0xf]  ;;  %v3636_v11 = vcombine.low %v4005_v31, %v4006_v13 }
 0x15d   : > { %v2948_v53 = vsel %vm2930_vm14, %v2915_v35, %v2668_v24  ;;  %v2114_v43 = vpop.permute.xlu1 %2113  ;;  %v2950_v49 = vsel %vm2930_vm14, %v2917_v6, %v2670_v33  ;;  %v3635_v62 = vcombine.low %v4003_v30, %v4004_v19 }
 0x15e   : > { %2681 = vrot.lane.b32.xlu1 %v3768_v4, %s4129_s19  ;;  %3837 = vmatprep.mubr.msk.bf16.mxu1 %vm2983_vm15, %v2948_v53  ;;  %v2719_v15 = vsel %vm2683_vm6, %v3636_v11, %v2114_v43 }
 0x15f   : > { %2679 = vrot.lane.b32.xlu0 %v3767_v7, %s4129_s19  ;;  %3838 = vmatmul.mubr.msk.bf16.vlgmr.msra.gmra.mrb[0].mxu1 %vm2983_vm15, %v2950_v49  ;;  %v2716_v18 = vsel %vm2683_vm6, %v3635_v62, %v2112_v55  ;;  %v4008_v7 = vld [vmem:[%s4214_s30 + $0x94] sm:$0xf]  ;;  %s4010_s19 = scalar_lea.vmem %s5966_s8, 4096 }
 0x160   : > { %v2192_v50 = vpop.permute.xlu0 %2191  ;;  %v3637_v17 = vcombine.low %v4007_v54, %v4008_v7  ;;  %p4011_p12 = scmp.ne.s32.totalorder %s5966_s8, %s4010_s19  ;;  %p4018_p2 = scmp.lt.s32.totalorder %s4016_s26, %s4010_s19 }
 0x161   : > { %v2194_v10 = vpop.permute.xlu1 %2193  ;;  %v2754_v52 = vsel %vm2732_vm7, %v2716_v18, %v2192_v50  ;;  %v4009_v50 = vld [vmem:[%s4214_s30 + $0x9c] sm:$0xf]  ;;  %s3479_s30 = sshll.u32 %s5874_s28, 1 }
 0x162   : > { %v2756_v47 = vsel %vm2732_vm7, %v2719_v15, %v2194_v10  ;;  %v3638_v10 = vcombine.low %v4009_v50, %v5376_v16  ;;  %s5946_s5 = scalar_lea.vmem [#allocation4], %s3479_s30  ;;  %p4012_p13 = pnand %p4011_p12, %p4194_p4 }
 0x163   : > { %p4019_p3 = por %p4018_p2, %p4017_p1 }
 0x164   : > { %v2272_v59 = vpop.permute.xlu0 %2271  ;;  %p4013_p0 = pneg %p4012_p13 }
 0x165   : > { %v2274_v44 = vpop.permute.xlu1 %2273  ;;  %v2787_v26 = vsel %vm2765_vm8, %v2754_v52, %v2272_v59 }
 0x166   : > { %v2789_v23 = vsel %vm2765_vm8, %v2756_v47, %v2274_v44  ;;  %p4020_p5 = pnand %p4019_p3, %p4013_p0 }
 0x16b   : > { %v2354_v12 = vpop.permute.xlu1 %2353 }
 0x16c   : > { %v2352_v57 = vpop.permute.xlu0 %2351  ;;  %v2822_v24 = vsel %vm2798_vm9, %v2789_v23, %v2354_v12 }
 0x16d   : > { %v2820_v36 = vsel %vm2798_vm9, %v2787_v26, %v2352_v57 }
 0x16f   : > { %v2434_v22 = vpop.permute.xlu1 %2433 }
 0x170   : > { %v2432_v32 = vpop.permute.xlu0 %2431  ;;  %v2855_v38 = vsel %vm2831_vm10, %v2822_v24, %v2434_v22 }
 0x171   : > { %v2853_v25 = vsel %vm2831_vm10, %v2820_v36, %v2432_v32 }
 0x173   : > { %v2514_v56 = vpop.permute.xlu1 %2513 }
 0x174   : > { %v2512_v28 = vpop.permute.xlu0 %2511  ;;  %v2888_v46 = vsel %vm2864_vm11, %v2855_v38, %v2514_v56 }
 0x175   : > { %v2886_v41 = vsel %vm2864_vm11, %v2853_v25, %v2512_v28 }
 0x179   : > { %v2594_v8 = vpop.permute.xlu1 %2593 }
 0x17a   : > { %v2592_v5 = vpop.permute.xlu0 %2591  ;;  %v2921_v39 = vsel %vm2897_vm12, %v2888_v46, %v2594_v8 }
 0x17b   : > { %v2919_v51 = vsel %vm2897_vm12, %v2886_v41, %v2592_v5 }
 0x17f   : > { %v2672_v20 = vpop.permute.xlu0 %2671 }
 0x180   : > { %v2952_v37 = vsel %vm2930_vm14, %v2919_v51, %v2672_v20  ;;  %v2116_v3 = vpop.permute.xlu1 %2115 }
 0x181   : > { %3841 = vmatprep.mubr.msk.bf16.mxu1 %vm2983_vm15, %v2952_v37  ;;  %v2722_v6 = vsel %vm2683_vm6, %v3637_v17, %v2116_v3 }
 0x186   : > { %v2674_v48 = vpop.permute.xlu0 %2673 }
 0x187   : > { %v2118_v55 = vpop.permute.xlu1 %2117  ;;  %v2954_v63 = vsel %vm2930_vm14, %v2921_v39, %v2674_v48 }
 0x188   : > { %3842 = vmatmul.mubr.msk.bf16.gmra.mrb[4].mxu1 %vm2983_vm15, %v2954_v63  ;;  %v2725_v56 = vsel %vm2683_vm6, %v3638_v10, %v2118_v55 }
 0x18a   : > { %v2196_v0 = vpop.permute.xlu0 %2195 }
 0x18b   : > { %v2198_v27 = vpop.permute.xlu1 %2197  ;;  %v2758_v35 = vsel %vm2732_vm7, %v2722_v6, %v2196_v0 }
 0x18c   : > { %v2760_v52 = vsel %vm2732_vm7, %v2725_v56, %v2198_v27 }
 0x18e   : > { %v2276_v60 = vpop.permute.xlu0 %2275 }
 0x18f   : > { %v2278_v45 = vpop.permute.xlu1 %2277  ;;  %v2791_v53 = vsel %vm2765_vm8, %v2758_v35, %v2276_v60 }
 0x190   : > { %v2793_v13 = vsel %vm2765_vm8, %v2760_v52, %v2278_v45 }
 0x194   : > { %v2358_v42 = vpop.permute.xlu1 %2357 }
 0x195   : > { %v2356_v34 = vpop.permute.xlu0 %2355  ;;  %v2826_v11 = vsel %vm2798_vm9, %v2793_v13, %v2358_v42 }
 0x196   : > { %v2824_v44 = vsel %vm2798_vm9, %v2791_v53, %v2356_v34 }
 0x198   : > { %v2438_v21 = vpop.permute.xlu1 %2437 }
 0x199   : > { %v2436_v4 = vpop.permute.xlu0 %2435  ;;  %v2859_v51 = vsel %vm2831_vm10, %v2826_v11, %v2438_v21 }
 0x19a   : > { %v2857_v12 = vsel %vm2831_vm10, %v2824_v44, %v2436_v4 }
 0x19c   : > { %v2518_v9 = vpop.permute.xlu1 %2517 }
 0x19d   : > { %v2516_v61 = vpop.permute.xlu0 %2515  ;;  %v2892_v20 = vsel %vm2864_vm11, %v2859_v51, %v2518_v9 }
 0x19e   : > { %v2890_v22 = vsel %vm2864_vm11, %v2857_v12, %v2516_v61 }
 0x1a3   : > { %v2598_v33 = vpop.permute.xlu1 %2597 }
 0x1a4   : > { %v2596_v43 = vpop.permute.xlu0 %2595  ;;  %v2925_v37 = vsel %vm2897_vm12, %v2892_v20, %v2598_v33 }
 0x1a5   : > { %v3823_v49 = vpop.f32.mrb[0].mxu0  ;;  %v2923_v16 = vsel %vm2897_vm12, %v2890_v22, %v2596_v43 }
 0x1a6   : > { %3183 = vst [vmem:[%s5885_s4 + $0x10] sm:$0xff] %v3823_v49  ;;  %v3054_v59 = vpop.f32.mrb[1].mxu0  ;;  %v3252_v26 = vmul.f32 %v3823_v49, %v3823_v49 }
 0x1a7   : > { %3181 = vst [vmem:[%s5885_s4] sm:$0xff] %v3054_v59  ;;  %v3824_v57 = vpop.f32.mrb[2].mxu0  ;;  %v3250_v30 = vmul.f32 %v3054_v59, %v3054_v59 }
 0x1a8   : > { %3184 = vst [vmem:[%s5885_s4 + $0x18] sm:$0xff] %v3824_v57  ;;  %v3057_v32 = vpop.f32.mrb[3].mxu0  ;;  %v2676_v28 = vpop.permute.xlu0 %2675  ;;  %v3253_v36 = vmul.f32 %v3824_v57, %v3824_v57 }
 0x1a9   : > { %3182 = vst [vmem:[%s5885_s4 + $0x8] sm:$0xff] %v3057_v32  ;;  %v3213_v19 = vadd.f32 %v3057_v32, %v3054_v59  ;;  %v3251_v62 = vmul.f32 %v3057_v32, %v3057_v32  ;;  %v2956_v18 = vsel %vm2930_vm14, %v2923_v16, %v2676_v28  ;;  %v2120_v5 = vpop.permute.xlu1 %2119 }
 0x1aa   : > { %3845 = vmatprep.mubr.msk.bf16.mxu1 %vm2983_vm15, %v2956_v18  ;;  %v2728_v60 = vsel %vm2683_vm6, %v3639_v14, %v2120_v5 }
 0x1ab   : > { %v3214_v8 = vadd.f32 %v3823_v49, %v3213_v19  ;;  %v3282_v31 = vadd.f32 %v3251_v62, %v3250_v30 }
 0x1ad   : > { %v3283_v25 = vadd.f32 %v3282_v31, %v3252_v26  ;;  %v3215_v41 = vadd.f32 %v3824_v57, %v3214_v8 }
 0x1af   : > { %v3284_v15 = vadd.f32 %v3283_v25, %v3253_v36  ;;  %v2678_v47 = vpop.permute.xlu0 %2677 }
 0x1b0   : > { %v2122_v3 = vpop.permute.xlu1 %2121  ;;  %v2958_v23 = vsel %vm2930_vm14, %v2925_v37, %v2678_v47 }
 0x1b1   : > { %3846 = vmatmul.mubr.msk.bf16.gmra.mrb[8].mxu1 %vm2983_vm15, %v2958_v23  ;;  %v2731_v42 = vsel %vm2683_vm6, %v3640_v29, %v2122_v3 }
 0x1b3   : > { %v2200_v24 = vpop.permute.xlu0 %2199 }
 0x1b4   : > { %v2202_v38 = vpop.permute.xlu1 %2201  ;;  %v2762_v21 = vsel %vm2732_vm7, %v2728_v60, %v2200_v24 }
 0x1b5   : > { %v2764_v34 = vsel %vm2732_vm7, %v2731_v42, %v2202_v38 }
 0x1b7   : > { %v2280_v39 = vpop.permute.xlu0 %2279 }
 0x1b8   : > { %v2282_v46 = vpop.permute.xlu1 %2281  ;;  %v2795_v54 = vsel %vm2765_vm8, %v2762_v21, %v2280_v39 }
 0x1b9   : > { %v2797_v9 = vsel %vm2765_vm8, %v2764_v34, %v2282_v46 }
 0x1be   : > { %v2362_v48 = vpop.permute.xlu1 %2361 }
 0x1bf   : > { %v2360_v55 = vpop.permute.xlu0 %2359  ;;  %v2830_v40 = vsel %vm2798_vm9, %v2797_v9, %v2362_v48 }
 0x1c0   : > { %v2828_v58 = vsel %vm2798_vm9, %v2795_v54, %v2360_v55 }
 0x1c2   : > { %v2442_v63 = vpop.permute.xlu1 %2441 }
 0x1c3   : > { %v2440_v0 = vpop.permute.xlu0 %2439  ;;  %v2863_v61 = vsel %vm2831_vm10, %v2830_v40, %v2442_v63 }
 0x1c4   : > { %v2861_v6 = vsel %vm2831_vm10, %v2828_v58, %v2440_v0 }
 0x1c6   : > { %v2522_v27 = vpop.permute.xlu1 %2521 }
 0x1c7   : > { %v2520_v45 = vpop.permute.xlu0 %2519  ;;  %v2896_v33 = vsel %vm2864_vm11, %v2863_v61, %v2522_v27 }
 0x1c8   : > { %v2894_v50 = vsel %vm2864_vm11, %v2861_v6, %v2520_v45  ;;  %v4130_v6 = vmov 0.0  }
 0x1c9   : > { %200 = vst [vmem:[%s5946_s5] sm:$0x3] %v4130_v6 }
 0x1cc   : > { %v3827_v4 = vpop.f32.mrb[4].mxu0  ;;  %v2602_v7 = vpop.permute.xlu1 %2601 }
 0x1cd   : > { %3187 = vst [vmem:[%s5885_s4 + $0x30] sm:$0xff] %v3827_v4  ;;  %v3070_v2 = vpop.f32.mrb[5].mxu0  ;;  %v2600_v1 = vpop.permute.xlu0 %2599  ;;  %v2929_v10 = vsel %vm2897_vm12, %v2896_v33, %v2602_v7  ;;  %v3256_v59 = vmul.f32 %v3827_v4, %v3827_v4 }
 0x1ce   : > { %3185 = vst [vmem:[%s5885_s4 + $0x20] sm:$0xff] %v3070_v2  ;;  %v3216_v14 = vadd.f32 %v3215_v41, %v3070_v2  ;;  %v3254_v29 = vmul.f32 %v3070_v2, %v3070_v2  ;;  %v3828_v17 = vpop.f32.mrb[6].mxu0  ;;  %v2927_v12 = vsel %vm2897_vm12, %v2894_v50, %v2600_v1 }
 0x1cf   : > { %3188 = vst [vmem:[%s5885_s4 + $0x38] sm:$0xff] %v3828_v17  ;;  %v3073_v35 = vpop.f32.mrb[7].mxu0  ;;  %v3257_v30 = vmul.f32 %v3828_v17, %v3828_v17 }
 0x1d0   : > { %v3285_v53 = vadd.f32 %v3284_v15, %v3254_v29  ;;  %3186 = vst [vmem:[%s5885_s4 + $0x28] sm:$0xff] %v3073_v35  ;;  %v3217_v43 = vadd.f32 %v3216_v14, %v3073_v35  ;;  %v3255_v49 = vmul.f32 %v3073_v35, %v3073_v35  ;;  %v2682_v44 = vpop.permute.xlu1 %2681 }
 0x1d1   : > { %v2962_v57 = vsel %vm2930_vm14, %v2929_v10, %v2682_v44  ;;  %v2680_v22 = vpop.permute.xlu0 %2679 }
 0x1d2   : > { %v3218_v32 = vadd.f32 %v3827_v4, %v3217_v43  ;;  %v3286_v16 = vadd.f32 %v3285_v53, %v3255_v49  ;;  %v2960_v28 = vsel %vm2930_vm14, %v2927_v12, %v2680_v22 }
 0x1d3   : > { %3849 = vmatprep.mubr.msk.bf16.mxu1 %vm2983_vm15, %v2960_v28 }
 0x1d4   : > { %v3287_v19 = vadd.f32 %v3286_v16, %v3256_v59  ;;  %v3219_v62 = vadd.f32 %v3828_v17, %v3218_v32  ;;  %3850 = vmatmul.mubr.msk.bf16.gmra.mrb[12].mxu1 %vm2983_vm15, %v2962_v57 }
 0x1d6   : > { %v3288_v56 = vadd.f32 %v3287_v19, %v3257_v30 }
 0x1f4   : > { %v3831_v18 = vpop.f32.mrb[8].mxu0 }
 0x1f5   : > { %3191 = vst [vmem:[%s5885_s4 + $0x50] sm:$0xff] %v3831_v18  ;;  %v3086_v52 = vpop.f32.mrb[9].mxu0  ;;  %v3260_v25 = vmul.f32 %v3831_v18, %v3831_v18 }
 0x1f6   : > { %3189 = vst [vmem:[%s5885_s4 + $0x40] sm:$0xff] %v3086_v52  ;;  %v3220_v5 = vadd.f32 %v3219_v62, %v3086_v52  ;;  %v3258_v26 = vmul.f32 %v3086_v52, %v3086_v52  ;;  %v3832_v8 = vpop.f32.mrb[10].mxu0 }
 0x1f7   : > { %3192 = vst [vmem:[%s5885_s4 + $0x58] sm:$0xff] %v3832_v8  ;;  %v3089_v31 = vpop.f32.mrb[11].mxu0  ;;  %v3261_v20 = vmul.f32 %v3832_v8, %v3832_v8 }
 0x1f8   : > { %v3289_v13 = vadd.f32 %v3288_v56, %v3258_v26  ;;  %3190 = vst [vmem:[%s5885_s4 + $0x48] sm:$0xff] %v3089_v31  ;;  %v3221_v11 = vadd.f32 %v3220_v5, %v3089_v31  ;;  %v3259_v36 = vmul.f32 %v3089_v31, %v3089_v31 }
 0x1fa   : > { %v3222_v41 = vadd.f32 %v3831_v18, %v3221_v11  ;;  %v3290_v51 = vadd.f32 %v3289_v13, %v3259_v36 }
 0x1fc   : > { %v3291_v15 = vadd.f32 %v3290_v51, %v3260_v25  ;;  %v3223_v37 = vadd.f32 %v3832_v8, %v3222_v41 }
 0x1fe   : > { %v3292_v47 = vadd.f32 %v3291_v15, %v3261_v20 }
 0x21f   : > { %v3835_v3 = vpop.f32.mrb[12].mxu0 }
 0x220   : > { %3195 = vst [vmem:[%s5885_s4 + $0x70] sm:$0xff] %v3835_v3  ;;  %v3102_v23 = vpop.f32.mrb[13].mxu0  ;;  %v3264_v0 = vmul.f32 %v3835_v3, %v3835_v3 }
 0x221   : > { %3193 = vst [vmem:[%s5885_s4 + $0x60] sm:$0xff] %v3102_v23  ;;  %v3224_v24 = vadd.f32 %v3223_v37, %v3102_v23  ;;  %v3262_v38 = vmul.f32 %v3102_v23, %v3102_v23  ;;  %v3836_v46 = vpop.f32.mrb[14].mxu0 }
 0x222   : > { %3196 = vst [vmem:[%s5885_s4 + $0x78] sm:$0xff] %v3836_v46  ;;  %v3105_v39 = vpop.f32.mrb[15].mxu0  ;;  %v3265_v60 = vmul.f32 %v3836_v46, %v3836_v46 }
 0x223   : > { %v3293_v48 = vadd.f32 %v3292_v47, %v3262_v38  ;;  %3194 = vst [vmem:[%s5885_s4 + $0x68] sm:$0xff] %v3105_v39  ;;  %v3225_v55 = vadd.f32 %v3224_v24, %v3105_v39  ;;  %v3263_v63 = vmul.f32 %v3105_v39, %v3105_v39 }
 0x225   : > { %v3226_v27 = vadd.f32 %v3835_v3, %v3225_v55  ;;  %v3294_v45 = vadd.f32 %v3293_v48, %v3263_v63 }
 0x227   : > { %v3295_v42 = vadd.f32 %v3294_v45, %v3264_v0  ;;  %v3227_v34 = vadd.f32 %v3836_v46, %v3226_v27 }
 0x229   : > { %v3296_v21 = vadd.f32 %v3295_v42, %v3265_v60 }
 0x232   : > { %v3839_v4 = vpop.f32.mrb[0].mxu1 }
 0x233   : > { %3199 = vst [vmem:[%s5885_s4 + $0x90] sm:$0xff] %v3839_v4  ;;  %v3118_v9 = vpop.f32.mrb[1].mxu1  ;;  %v3268_v29 = vmul.f32 %v3839_v4, %v3839_v4 }
 0x234   : > { %3197 = vst [vmem:[%s5885_s4 + $0x80] sm:$0xff] %v3118_v9  ;;  %v3228_v54 = vadd.f32 %v3227_v34, %v3118_v9  ;;  %v3266_v7 = vmul.f32 %v3118_v9, %v3118_v9  ;;  %v3840_v2 = vpop.f32.mrb[2].mxu1 }
 0x235   : > { %3200 = vst [vmem:[%s5885_s4 + $0x98] sm:$0xff] %v3840_v2  ;;  %v3121_v40 = vpop.f32.mrb[3].mxu1  ;;  %v3269_v35 = vmul.f32 %v3840_v2, %v3840_v2 }
 0x236   : > { %v3297_v58 = vadd.f32 %v3296_v21, %v3266_v7  ;;  %3198 = vst [vmem:[%s5885_s4 + $0x88] sm:$0xff] %v3121_v40  ;;  %v3229_v1 = vadd.f32 %v3228_v54, %v3121_v40  ;;  %v3267_v14 = vmul.f32 %v3121_v40, %v3121_v40 }
 0x238   : > { %v3230_v17 = vadd.f32 %v3839_v4, %v3229_v1  ;;  %v3298_v61 = vadd.f32 %v3297_v58, %v3267_v14 }
 0x23a   : > { %v3299_v33 = vadd.f32 %v3298_v61, %v3268_v29  ;;  %v3231_v53 = vadd.f32 %v3840_v2, %v3230_v17 }
 0x23c   : > { %v3300_v43 = vadd.f32 %v3299_v33, %v3269_v35 }
 0x25b   : > { %v3843_v49 = vpop.f32.mrb[4].mxu1 }
 0x25c   : > { %3203 = vst [vmem:[%s5885_s4 + $0xb0] sm:$0xff] %v3843_v49  ;;  %v3134_v50 = vpop.f32.mrb[5].mxu1  ;;  %v3272_v16 = vmul.f32 %v3843_v49, %v3843_v49 }
 0x25d   : > { %3201 = vst [vmem:[%s5885_s4 + $0xa0] sm:$0xff] %v3134_v50  ;;  %v3232_v10 = vadd.f32 %v3231_v53, %v3134_v50  ;;  %v3270_v44 = vmul.f32 %v3134_v50, %v3134_v50  ;;  %v3844_v59 = vpop.f32.mrb[6].mxu1 }
 0x25e   : > { %3204 = vst [vmem:[%s5885_s4 + $0xb8] sm:$0xff] %v3844_v59  ;;  %v3137_v12 = vpop.f32.mrb[7].mxu1  ;;  %v3273_v19 = vmul.f32 %v3844_v59, %v3844_v59 }
 0x25f   : > { %v3301_v57 = vadd.f32 %v3300_v43, %v3270_v44  ;;  %3202 = vst [vmem:[%s5885_s4 + $0xa8] sm:$0xff] %v3137_v12  ;;  %v3233_v22 = vadd.f32 %v3232_v10, %v3137_v12  ;;  %v3271_v32 = vmul.f32 %v3137_v12, %v3137_v12 }
 0x261   : > { %v3234_v28 = vadd.f32 %v3843_v49, %v3233_v22  ;;  %v3302_v30 = vadd.f32 %v3301_v57, %v3271_v32 }
 0x263   : > { %v3303_v62 = vadd.f32 %v3302_v30, %v3272_v16  ;;  %v3235_v56 = vadd.f32 %v3844_v59, %v3234_v28 }
 0x265   : > { %v3304_v18 = vadd.f32 %v3303_v62, %v3273_v19 }
 0x284   : > { %v3847_v52 = vpop.f32.mrb[8].mxu1 }
 0x285   : > { %3207 = vst [vmem:[%s5885_s4 + $0xd0] sm:$0xff] %v3847_v52  ;;  %v3150_v5 = vpop.f32.mrb[9].mxu1  ;;  %v3276_v41 = vmul.f32 %v3847_v52, %v3847_v52 }
 0x286   : > { %3205 = vst [vmem:[%s5885_s4 + $0xc0] sm:$0xff] %v3150_v5  ;;  %v3236_v26 = vadd.f32 %v3235_v56, %v3150_v5  ;;  %v3274_v8 = vmul.f32 %v3150_v5, %v3150_v5  ;;  %v3848_v31 = vpop.f32.mrb[10].mxu1 }
 0x287   : > { %3208 = vst [vmem:[%s5885_s4 + $0xd8] sm:$0xff] %v3848_v31  ;;  %v3153_v13 = vpop.f32.mrb[11].mxu1  ;;  %v3277_v15 = vmul.f32 %v3848_v31, %v3848_v31 }
 0x288   : > { %v3305_v11 = vadd.f32 %v3304_v18, %v3274_v8  ;;  %3206 = vst [vmem:[%s5885_s4 + $0xc8] sm:$0xff] %v3153_v13  ;;  %v3237_v36 = vadd.f32 %v3236_v26, %v3153_v13  ;;  %v3275_v25 = vmul.f32 %v3153_v13, %v3153_v13 }
 0x28a   : > { %v3238_v51 = vadd.f32 %v3847_v52, %v3237_v36  ;;  %v3306_v20 = vadd.f32 %v3305_v11, %v3275_v25 }
 0x28c   : > { %v3307_v37 = vadd.f32 %v3306_v20, %v3276_v41  ;;  %v3239_v47 = vadd.f32 %v3848_v31, %v3238_v51 }
 0x28e   : > { %v3308_v3 = vadd.f32 %v3307_v37, %v3277_v15 }
 0x2a7   : > { %v3851_v23 = vpop.f32.mrb[12].mxu1 }
 0x2a8   : > { %3211 = vst [vmem:[%s5885_s4 + $0xf0] sm:$0xff] %v3851_v23  ;;  %v3166_v24 = vpop.f32.mrb[13].mxu1 }
 0x2a9   : > { %3209 = vst [vmem:[%s5885_s4 + $0xe0] sm:$0xff] %v3166_v24  ;;  %v3240_v38 = vadd.f32 %v3239_v47, %v3166_v24  ;;  %v3278_v46 = vmul.f32 %v3166_v24, %v3166_v24  ;;  %v3852_v39 = vpop.f32.mrb[14].mxu1 }
 0x2aa   : > { %3212 = vst [vmem:[%s5885_s4 + $0xf8] sm:$0xff] %v3852_v39  ;;  %v3169_v48 = vpop.f32.mrb[15].mxu1 }
 0x2ab   : > { %v3309_v55 = vadd.f32 %v3308_v3, %v3278_v46  ;;  %3210 = vst [vmem:[%s5885_s4 + $0xe8] sm:$0xff] %v3169_v48  ;;  %v3241_v63 = vadd.f32 %v3240_v38, %v3169_v48  ;;  %v3279_v0 = vmul.f32 %v3169_v48, %v3169_v48 }
 0x2ac   : > { %4023 = shalt.err (!%p4020_p5)
}
 0x2ad   : > { %s4024_s27 = scalar_lea.hbm %s5963_s11, 4096  ;;  %s4028_s30 = scalar_lea.hbm %s6052_s2, 8192 }
 0x2ae   : > { %p4025_p6 = scmp.ne.s32.totalorder %s5963_s11, %s4024_s27  ;;  %p4029_p10 = scmp.lt.u32.totalorder %s5963_s11, %s6052_s2 }
 0x2af   : > { %p4030_p11 = scmp.lt.u32.totalorder %s4028_s30, %s4024_s27  ;;  %p4032_p13 = scmp.lt.u32.totalorder %s4024_s27, %s5963_s11 }
 0x2b0   : > { %p4026_p7 = pnand %p4025_p6, %p4194_p4 }
 0x2b1   : > { %p4031_p12 = por %p4030_p11, %p4029_p10 }
 0x2b2   : > { %p4027_p9 = pneg %p4026_p7 }
 0x2b3   : > { %p4033_p0 = por %p4032_p13, %p4031_p12 }
 0x2b5   : > { %p4034_p1 = pnand %p4033_p0, %p4027_p9 }
 0x2b7   : > { %4037 = shalt.err (!%p4034_p1)
}
 0x2b8   : > { %s4132_s10 = smov 128   ;;  %v3280_v27 = vmul.f32 %v3851_v23, %v3851_v23  ;;  %v3242_v45 = vadd.f32 %v3851_v23, %v3241_v63  ;;  %v3310_v60 = vadd.f32 %v3309_v55, %v3279_v0  ;;  %v3281_v42 = vmul.f32 %v3852_v39, %v3852_v39  ;;  %v3319_v35 = vld [vmem:[%s5946_s5] sm:$0x3]  ;;  %s3330_s21 = scalar_lea.sflag [#allocation5], %s5874_s28 }
 0x2b9   : > { %3862 = dma.vmem_to_hbm [thread:$0]  (%p4194_p4), %s5966_s8, 4096, %s5963_s11, %s3325_s18, %s4132_s10, %s4132_s10, %s4124_s6   ;;  %vm3320_vm0 = vcmask 1040384  }
 0x2ba   : > { %v3243_v34 = vadd.f32 %v3852_v39, %v3242_v45  ;;  %v3311_v21 = vadd.f32 %v3310_v60, %v3280_v27  ;;  %s3792_s6 = sshll.u32 %s4112_s15, 5  ;;  %s3361_s8 = sshll.u32 %s5946_s5, 4  ;;  %s6003_s8 = int_to_ptr.vmem [resolvable:$true] %s3361_s8 }
 0x2bb   : > { %s6001_s19 = scalar_lea.hbm %s6053_s3, %s3792_s6  ;;  %s4038_s23 = scalar_lea.vmem %s6003_s8, 32 }
 0x2bc   : > { %v3244_v4 = vrot.slane %v3243_v34, 4  ;;  %v3312_v9 = vadd.f32 %v3311_v21, %v3281_v42  ;;  %p4039_p2 = scmp.ne.s32.totalorder %s6003_s8, %s4038_s23  ;;  %s4133_s15 = smov [#allocation4]  }
 0x2bd   : > { %s4042_s26 = sshll.u32 %s4133_s15, 4  ;;  %s4043_s26 = int_to_ptr.vmem [resolvable:$false] %s4042_s26 }
 0x2be   : > { %v3245_v54 = vadd.f32 %v3244_v4, %v3243_v34  ;;  %v3313_v7 = vrot.slane %v3312_v9, 4  ;;  %p4040_p3 = pnand %p4039_p2, %p4194_p4  ;;  %s4044_s27 = scalar_lea.vmem %s4043_s26, 64 }
 0x2bf   : > { %p4045_p6 = scmp.lt.s32.totalorder %s6003_s8, %s4043_s26  ;;  %p4046_p7 = scmp.lt.s32.totalorder %s4044_s27, %s4038_s23 }
 0x2c0   : > { %v3246_v2 = vrot.slane %v3245_v54, 2  ;;  %v3314_v40 = vadd.f32 %v3313_v7, %v3312_v9  ;;  %p4041_p5 = pneg %p4040_p3 }
 0x2c1   : > { %p4047_p9 = por %p4046_p7, %p4045_p6 }
 0x2c2   : > { %v3247_v58 = vadd.f32 %v3246_v2, %v3245_v54  ;;  %v3315_v1 = vrot.slane %v3314_v40, 2 }
 0x2c3   : > { %p4048_p10 = pnand %p4047_p9, %p4041_p5 }
 0x2c4   : > { %v3248_v14 = vrot.slane %v3247_v58, 1  ;;  %v3316_v29 = vadd.f32 %v3315_v1, %v3314_v40 }
 0x2c6   : > { %v3317_v17 = vrot.slane %v3316_v29, 1  ;;  %v3249_v61 = vadd.f32 %v3248_v14, %v3247_v58 }
 0x2c8   : > { %v3318_v6 = vadd.f32 %v3317_v17, %v3316_v29 }
 0x2ca   : > { %v3321_v33 = vsel %vm3320_vm0, %v3249_v61, %v3318_v6 }
 0x2cb   : > { %v3322_v53 = vadd.f32 %v3321_v33, %v3319_v35 }
 0x2cd   : > { %3323 = vst [vmem:[%s5946_s5] sm:$0x3] %v3322_v53 }
 0x2ce   : > { %4051 = shalt.err (!%p4048_p10)
}
 0x2cf   : > { %s4052_s28 = scalar_lea.hbm %s6001_s19, 32  ;;  %s4056_s4 = scalar_lea.hbm %s6053_s3, 64 }
 0x2d0   : > { %p4053_p11 = scmp.ne.s32.totalorder %s6001_s19, %s4052_s28  ;;  %p4057_p0 = scmp.lt.u32.totalorder %s6001_s19, %s6053_s3 }
 0x2d1   : > { %p4058_p1 = scmp.lt.u32.totalorder %s4056_s4, %s4052_s28  ;;  %p4060_p3 = scmp.lt.u32.totalorder %s4052_s28, %s6001_s19 }
 0x2d2   : > { %p4054_p12 = pnand %p4053_p11, %p4194_p4 }
 0x2d3   : > { %p4059_p2 = por %p4058_p1, %p4057_p0 }
 0x2d4   : > { %p4055_p13 = pneg %p4054_p12 }
 0x2d5   : > { %p4061_p5 = por %p4060_p3, %p4059_p2 }
 0x2d7   : > { %p4062_p6 = pnand %p4061_p5, %p4055_p13 }
 0x2d9   : > { %4065 = shalt.err (!%p4062_p6)
}
 0x2da   : > { %3863 = dma.vmem_to_hbm [thread:$0]  (%p4194_p4), %s6003_s8, 32, %s6001_s19, %s3330_s21  }
 0x2db PF: > { %p3873_p7 = scmp.ge.s32.totalorder %s4120_s17, 2  ;;  %s3373_s9 = sand.u32 1, %s4100_s12  }
 0x2dc   : > { %s3374_s10 = scalar_lea.sflag [#allocation3], %s3373_s9 }
 0x2dd   : > { %p3867_p9 = pnand %p3873_p7, %p4201_p8 }
 0x2df   : > { %4091 = dma.done.wait (!%p3867_p9), %s3374_s10, 4096  }
 0x2e0   : > { %4093 = vsyncadd (!%p3867_p9), %s3374_s10, 4294963200  ;;  %s3383_s6 = scalar_lea.sflag [#allocation5], %s3373_s9 }
 0x2e1   : > { %4095 = dma.done.wait (!%p3867_p9), %s3383_s6, 32  }
 0x2e2   : > { %4097 = vsyncadd (!%p3867_p9), %s3383_s6, 4294967264  ;;  %s20_s17 = sadd.s32 1, %s4120_s17   ;;  %s6060_s12 = smov %s4104_s13 }
 0x2e3   : > { %p17_p10 = scmp.ge.s32.totalorder %s20_s17, 4   ;;  %s6061_s13 = smov %s4108_s14 }
 0x2e4   : > { %s6062_s14 = smov %s4207_s25  ;;  %s6063_s15 = smov %s4116_s16 }
 0x2e5   : > { %s6064_s16 = smov %s6066_s20  ;;  %19 = sbr.rel (!%p17_p10) target bundleno = 6 (0x6), region = 87 }
 0x2ec   :  { %3388 = vsyncpa [#allocation3], 1 }
 0x2ed   :  { %3390 = vsyncpa [#allocation3 + $0x1], 1 }
 0x2ee   :  { %3391 = vsyncpa [#allocation5], 1 }
 0x2ef   :  { %3393 = vsyncpa [#allocation5 + $0x1], 1 }

</bundles_post_ra>
